<compile_context>
chip_gen: v5e
topology: v5e:2x2
jax: 0.10.0
libtpu: 0.0.40
codegen_flags: <defaults>
</compile_context>

<pallas_src>
import jax
import jax.numpy as jnp
from jax.experimental import pallas as pl
from jax.experimental.pallas import tpu as pltpu


# ---------------------------------------------------------------------------
# Model configuration (small, consistent with the module's __init__)
# ---------------------------------------------------------------------------
BATCH = 8
SEQ = 8
INPUT_CHANNELS = 4
HIDDEN_CHANNELS = 32
HIDDEN_HIDDEN_CHANNELS = 32
NUM_HIDDEN_LAYERS = 2          # -> NUM_HIDDEN_LAYERS + 1 linear layers in ODE func
OUTPUT_CHANNELS = 8


def _sigmoid(x):
    # exact sigmoid (the f32 divide lowers to an EUP-backed reciprocal on TPU)
    return 1.0 / (1.0 + jnp.exp(-x))


# ---------------------------------------------------------------------------
# Pallas kernel
# ---------------------------------------------------------------------------
def _make_odernn_kernel(seq_len, batch, hidden, num_func_linears):
    """Builds the kernel body for a fixed seq length / batch / func depth."""
    H = hidden
    B = batch

    def kernel(*refs):
        x_ref, dts_ref, wih_ref, bih_ref, whh_ref, bhh_ref = refs[:6]
        func_refs = refs[6:6 + 2 * num_func_linears]
        wout_ref, bout_ref, out_ref = refs[6 + 2 * num_func_linears:]

        # ---- hoist all loop-resident weight / bias loads into vregs once ----
        whh = whh_ref[...]                       # (H, 3H)
        bhh = bhh_ref[...]                       # (1, 3H)
        func_w = [func_refs[2 * l][...] for l in range(num_func_linears)]
        func_b = [func_refs[2 * l + 1][...] for l in range(num_func_linears)]

        # ---- hoist the GRU input projection out of the time loop ----
        # one (SEQ*B, I) x (I, 3H) matmul replaces SEQ tiny K=I matmuls on the
        # serial dependency chain.
        gi_all = (jnp.dot(x_ref[...], wih_ref[...],
                          preferred_element_type=jnp.float32) + bih_ref[...])

        def gru_step(step, h):
            # static, sublane-aligned (B, 3H) slab of the precomputed projection
            gi = gi_all[step * B:(step + 1) * B]
            gh = jnp.dot(h, whh, preferred_element_type=jnp.float32) + bhh
            g = gi + gh
            r = _sigmoid(g[:, 0:H])
            z = _sigmoid(g[:, H:2 * H])
            n = jnp.tanh(gi[:, 2 * H:3 * H] + r * gh[:, 2 * H:3 * H])
            return n + z * (h - n)

        def ode_func(h):
            # Linear -> Tanh -> ... -> Linear (no tanh after the last layer)
            y = h
            for li in range(num_func_linears):
                y = jnp.dot(y, func_w[li],
                            preferred_element_type=jnp.float32) + func_b[li]
                if li < num_func_linears - 1:
                    y = jnp.tanh(y)
            return y

        def rk4_evolve(h, dt):
            # torchdiffeq 'rk4' = single fixed step, 3/8-rule (rk4_alt_step_func)
            k1 = ode_func(h)
            k2 = ode_func(h + dt * k1 * (1.0 / 3.0))
            k3 = ode_func(h + dt * (k2 - k1 * (1.0 / 3.0)))
            k4 = ode_func(h + dt * (k1 - k2 + k3))
            return h + dt * (k1 + 3.0 * (k2 + k3) + k4) * 0.125

        # ---- first observation: GRU step from h0 = zeros ----
        h = gru_step(0, jnp.zeros((B, H), jnp.float32))

        # ---- remaining observations: fully unrolled (static trip count) ----
        for i in range(1, seq_len):
            dt = dts_ref[i - 1]                  # precomputed dt, static SMEM read
            h = rk4_evolve(h, dt)
            h = gru_step(i, h)

        # ---- readout: Linear + softmax over last dim ----
        logits = jnp.dot(h, wout_ref[...],
                         preferred_element_type=jnp.float32) + bout_ref[...]
        m = jnp.max(logits, axis=-1, keepdims=True)
        e = jnp.exp(logits - m)
        out_ref[...] = e / jnp.sum(e, axis=-1, keepdims=True)

    return kernel


# ---------------------------------------------------------------------------
# Wrapper (jitted so the tiny transpose/dt prep fuses with the kernel launch)
# ---------------------------------------------------------------------------
@jax.jit
def odernn_forward_pallas(x, times, params):
    """x: (batch, seq, input_channels); times: (seq,). Returns (batch, output)."""
    batch, seq, in_ch = x.shape
    hidden = params["whh_T"].shape[0]
    out_ch = params["wout_T"].shape[1]
    num_func_linears = len(params["func_w"])

    # Time-major flatten: row (i*batch + b) holds observation i of sequence b,
    # so each per-step slab of the hoisted input projection is a contiguous,
    # vreg-aligned (batch, 3H) block.
    # TODO(synk): store x time-major upstream to drop this (tiny) transpose.
    x_tm = (jnp.transpose(x, (1, 0, 2))
            .reshape(seq * batch, in_ch).astype(jnp.float32))
    dts = (times[1:] - times[:-1]).astype(jnp.float32)        # (seq-1,)

    func_args = []
    for w, b in zip(params["func_w"], params["func_b"]):
        func_args += [w, b]

    kernel = _make_odernn_kernel(seq, batch, hidden, num_func_linears)

    n_vmem_weight_refs = 4 + 2 * num_func_linears + 2
    in_specs = (
        [pl.BlockSpec(memory_space=pltpu.MemorySpace.VMEM),   # x (time-major, flat)
         pl.BlockSpec(memory_space=pltpu.MemorySpace.SMEM)]   # dts (scalars)
        + [pl.BlockSpec(memory_space=pltpu.MemorySpace.VMEM)] * n_vmem_weight_refs
    )

    # NOTE: a single batch of 8 sequences keeps this grid-less (one TensorCore).
    # If many independent sequences are available, stack them on the batch axis
    # and add a "parallel" grid axis so v7x's two TensorCores split the work.
    return pl.pallas_call(
        kernel,
        out_shape=jax.ShapeDtypeStruct((batch, out_ch), jnp.float32),
        in_specs=in_specs,
        out_specs=pl.BlockSpec(memory_space=pltpu.MemorySpace.VMEM),
    )(
        x_tm, dts,
        params["wih_T"], params["bih"], params["whh_T"], params["bhh"],
        *func_args,
        params["wout_T"], params["bout"],
    )


# ---------------------------------------------------------------------------
# Pure-JAX reference (same math, no Pallas) used for a correctness check
# ---------------------------------------------------------------------------
def odernn_forward_reference(x, times, params):
    hidden = params["whh_T"].shape[0]
    H = hidden
    num_func_linears = len(params["func_w"])

    def gru_step(xi, h):
        gi = jnp.dot(xi, params["wih_T"]) + params["bih"]
        gh = jnp.dot(h, params["whh_T"]) + params["bhh"]
        r = _sigmoid(gi[:, 0:H] + gh[:, 0:H])
        z = _sigmoid(gi[:, H:2 * H] + gh[:, H:2 * H])
        n = jnp.tanh(gi[:, 2 * H:3 * H] + r * gh[:, 2 * H:3 * H])
        return (1.0 - z) * n + z * h

    def ode_func(h):
        y = h
        for li in range(num_func_linears):
            y = jnp.dot(y, params["func_w"][li]) + params["func_b"][li]
            if li < num_func_linears - 1:
                y = jnp.tanh(y)
        return y

    def rk4_evolve(h, dt):
        k1 = ode_func(h)
        k2 = ode_func(h + dt * k1 / 3.0)
        k3 = ode_func(h + dt * (k2 - k1 / 3.0))
        k4 = ode_func(h + dt * (k1 - k2 + k3))
        return h + dt * (k1 + 3.0 * (k2 + k3) + k4) * 0.125

    batch, seq, _ = x.shape
    h = gru_step(x[:, 0, :], jnp.zeros((batch, H), jnp.float32))
    for i in range(1, seq):
        dt = times[i] - times[i - 1]
        h = rk4_evolve(h, dt)
        h = gru_step(x[:, i, :], h)
    logits = jnp.dot(h, params["wout_T"]) + params["bout"]
    m = jnp.max(logits, axis=-1, keepdims=True)
    e = jnp.exp(logits - m)
    return e / jnp.sum(e, axis=-1, keepdims=True)


# ---------------------------------------------------------------------------
# Deterministic parameter initialisation (shapes from the module's __init__)
# ---------------------------------------------------------------------------
def init_params(key, input_channels, hidden, hidden_hidden, num_hidden_layers,
                output_channels):
    def uniform(k, shape, scale):
        return jax.random.uniform(k, shape, jnp.float32, -scale, scale)

    keys = iter(jax.random.split(key, 6 + 2 * (num_hidden_layers + 1) + 2))
    s_gru = 1.0 / float(hidden) ** 0.5

    params = {
        # GRUCell: weight_ih (3H, I), weight_hh (3H, H) -> stored transposed
        "wih_T": uniform(next(keys), (input_channels, 3 * hidden), s_gru),
        "whh_T": uniform(next(keys), (hidden, 3 * hidden), s_gru),
        "bih": uniform(next(keys), (1, 3 * hidden), s_gru),
        "bhh": uniform(next(keys), (1, 3 * hidden), s_gru),
    }

    # ODE func: Linear(H, HH), [Tanh, Linear(HH, HH)]*(L-1), Tanh, Linear(HH, H)
    dims = ([hidden] + [hidden_hidden] * num_hidden_layers + [hidden])
    func_w, func_b = [], []
    for d_in, d_out in zip(dims[:-1], dims[1:]):
        s = 1.0 / float(d_in) ** 0.5
        func_w.append(uniform(next(keys), (d_in, d_out), s))
        func_b.append(uniform(next(keys), (1, d_out), s))
    params["func_w"] = func_w
    params["func_b"] = func_b

    # readout Linear(H, O)
    s_out = 1.0 / float(hidden) ** 0.5
    params["wout_T"] = uniform(next(keys), (hidden, output_channels), s_out)
    params["bout"] = uniform(next(keys), (1, output_channels), s_out)
    return params


# ---------------------------------------------------------------------------
if __name__ == "__main__":
    root = jax.random.PRNGKey(0)
    k_params, k_x, k_dt = jax.random.split(root, 3)

    params = init_params(
        k_params, INPUT_CHANNELS, HIDDEN_CHANNELS, HIDDEN_HIDDEN_CHANNELS,
        NUM_HIDDEN_LAYERS, OUTPUT_CHANNELS,
    )

    x = jax.random.normal(k_x, (BATCH, SEQ, INPUT_CHANNELS), jnp.float32)
    dts = jax.random.uniform(k_dt, (SEQ,), jnp.float32, 0.05, 0.15)
    times = jnp.cumsum(dts)  # strictly increasing observation times

    out = odernn_forward_pallas(x, times, params)
    out = jax.block_until_ready(out)

    ref = odernn_forward_reference(x, times, params)

    assert out.shape == (BATCH, OUTPUT_CHANNELS)
    assert bool(jnp.all(jnp.isfinite(out)))
    # softmax rows must sum to 1
    assert bool(jnp.allclose(jnp.sum(out, axis=-1), 1.0, atol=1e-5))
    # match the pure-JAX reference (allow for MXU accumulation differences)
    assert bool(jnp.allclose(out, ref, atol=1e-3, rtol=1e-3))

    print("KERNEL_OK")
</pallas_src>

<mosaic_0001>
module attributes {stable_mosaic.version = 11 : i64} {
  func.func @kernel(%arg0: memref<64x4xf32, #tpu.memory_space<vmem>>, %arg1: memref<7xf32, #tpu.memory_space<smem>>, %arg2: memref<4x96xf32, #tpu.memory_space<vmem>>, %arg3: memref<1x96xf32, #tpu.memory_space<vmem>>, %arg4: memref<32x96xf32, #tpu.memory_space<vmem>>, %arg5: memref<1x96xf32, #tpu.memory_space<vmem>>, %arg6: memref<32x32xf32, #tpu.memory_space<vmem>>, %arg7: memref<1x32xf32, #tpu.memory_space<vmem>>, %arg8: memref<32x32xf32, #tpu.memory_space<vmem>>, %arg9: memref<1x32xf32, #tpu.memory_space<vmem>>, %arg10: memref<32x32xf32, #tpu.memory_space<vmem>>, %arg11: memref<1x32xf32, #tpu.memory_space<vmem>>, %arg12: memref<32x8xf32, #tpu.memory_space<vmem>>, %arg13: memref<1x8xf32, #tpu.memory_space<vmem>>, %arg14: memref<8x8xf32, #tpu.memory_space<vmem>>) attributes {dimension_semantics = [], scalar_prefetch = 0 : i64, scratch_operands = 0 : i64, tpu.core_type = #tpu.core_type<tc>} {
    %c0 = arith.constant 0 : index
    %c0_0 = arith.constant 0 : index
    %0 = vector.load %arg4[%c0, %c0_0] : memref<32x96xf32, #tpu.memory_space<vmem>>, vector<32x96xf32>
    %c0_1 = arith.constant 0 : index
    %c0_2 = arith.constant 0 : index
    %1 = vector.load %arg5[%c0_1, %c0_2] : memref<1x96xf32, #tpu.memory_space<vmem>>, vector<1x96xf32>
    %c0_3 = arith.constant 0 : index
    %c0_4 = arith.constant 0 : index
    %2 = vector.load %arg6[%c0_3, %c0_4] : memref<32x32xf32, #tpu.memory_space<vmem>>, vector<32x32xf32>
    %c0_5 = arith.constant 0 : index
    %c0_6 = arith.constant 0 : index
    %3 = vector.load %arg8[%c0_5, %c0_6] : memref<32x32xf32, #tpu.memory_space<vmem>>, vector<32x32xf32>
    %c0_7 = arith.constant 0 : index
    %c0_8 = arith.constant 0 : index
    %4 = vector.load %arg10[%c0_7, %c0_8] : memref<32x32xf32, #tpu.memory_space<vmem>>, vector<32x32xf32>
    %c0_9 = arith.constant 0 : index
    %c0_10 = arith.constant 0 : index
    %5 = vector.load %arg7[%c0_9, %c0_10] : memref<1x32xf32, #tpu.memory_space<vmem>>, vector<1x32xf32>
    %c0_11 = arith.constant 0 : index
    %c0_12 = arith.constant 0 : index
    %6 = vector.load %arg9[%c0_11, %c0_12] : memref<1x32xf32, #tpu.memory_space<vmem>>, vector<1x32xf32>
    %c0_13 = arith.constant 0 : index
    %c0_14 = arith.constant 0 : index
    %7 = vector.load %arg11[%c0_13, %c0_14] : memref<1x32xf32, #tpu.memory_space<vmem>>, vector<1x32xf32>
    %c0_15 = arith.constant 0 : index
    %c0_16 = arith.constant 0 : index
    %8 = vector.load %arg0[%c0_15, %c0_16] : memref<64x4xf32, #tpu.memory_space<vmem>>, vector<64x4xf32>
    %c0_17 = arith.constant 0 : index
    %c0_18 = arith.constant 0 : index
    %9 = vector.load %arg2[%c0_17, %c0_18] : memref<4x96xf32, #tpu.memory_space<vmem>>, vector<4x96xf32>
    %cst = arith.constant dense<0.000000e+00> : vector<64x96xf32>
    %10 = tpu.matmul %8, %9, %cst {dimension_numbers = #tpu.dot_dimension_numbers<[1], [0], [0], [1], [0, 0, 1, 1], [], []>} : vector<64x4xf32>, vector<4x96xf32>, vector<64x96xf32> -> vector<64x96xf32>
    %c0_19 = arith.constant 0 : index
    %c0_20 = arith.constant 0 : index
    %11 = vector.load %arg3[%c0_19, %c0_20] : memref<1x96xf32, #tpu.memory_space<vmem>>, vector<1x96xf32>
    %12 = vector.broadcast %11 : vector<1x96xf32> to vector<64x96xf32>
    %13 = arith.addf %10, %12 : vector<64x96xf32>
    %cst_21 = arith.constant 0.000000e+00 : f32
    %14 = vector.broadcast %cst_21 : f32 to vector<8x32xf32>
    %15 = vector.extract_strided_slice %13 {offsets = [0, 0], sizes = [8, 96], strides = [1, 1]} : vector<64x96xf32> to vector<8x96xf32>
    %cst_22 = arith.constant dense<0.000000e+00> : vector<8x96xf32>
    %16 = tpu.matmul %14, %0, %cst_22 {dimension_numbers = #tpu.dot_dimension_numbers<[1], [0], [0], [1], [0, 0, 1, 1], [], []>} : vector<8x32xf32>, vector<32x96xf32>, vector<8x96xf32> -> vector<8x96xf32>
    %17 = vector.broadcast %1 : vector<1x96xf32> to vector<8x96xf32>
    %18 = arith.addf %16, %17 : vector<8x96xf32>
    %19 = arith.addf %15, %18 : vector<8x96xf32>
    %20 = vector.extract_strided_slice %19 {offsets = [0, 0], sizes = [8, 32], strides = [1, 1]} : vector<8x96xf32> to vector<8x32xf32>
    %cst_23 = arith.constant 0.000000e+00 : f32
    %21 = vector.broadcast %cst_23 : f32 to vector<8x32xf32>
    %22 = arith.subf %21, %20 : vector<8x32xf32>
    %23 = math.exp %22 : vector<8x32xf32>
    %cst_24 = arith.constant 1.000000e+00 : f32
    %24 = vector.broadcast %cst_24 : f32 to vector<8x32xf32>
    %25 = arith.addf %24, %23 : vector<8x32xf32>
    %cst_25 = arith.constant 1.000000e+00 : f32
    %26 = vector.broadcast %cst_25 : f32 to vector<8x32xf32>
    %27 = arith.divf %26, %25 : vector<8x32xf32>
    %28 = vector.extract_strided_slice %19 {offsets = [0, 32], sizes = [8, 32], strides = [1, 1]} : vector<8x96xf32> to vector<8x32xf32>
    %cst_26 = arith.constant 0.000000e+00 : f32
    %29 = vector.broadcast %cst_26 : f32 to vector<8x32xf32>
    %30 = arith.subf %29, %28 : vector<8x32xf32>
    %31 = math.exp %30 : vector<8x32xf32>
    %cst_27 = arith.constant 1.000000e+00 : f32
    %32 = vector.broadcast %cst_27 : f32 to vector<8x32xf32>
    %33 = arith.addf %32, %31 : vector<8x32xf32>
    %cst_28 = arith.constant 1.000000e+00 : f32
    %34 = vector.broadcast %cst_28 : f32 to vector<8x32xf32>
    %35 = arith.divf %34, %33 : vector<8x32xf32>
    %36 = vector.extract_strided_slice %15 {offsets = [0, 64], sizes = [8, 32], strides = [1, 1]} : vector<8x96xf32> to vector<8x32xf32>
    %37 = vector.extract_strided_slice %18 {offsets = [0, 64], sizes = [8, 32], strides = [1, 1]} : vector<8x96xf32> to vector<8x32xf32>
    %38 = arith.mulf %27, %37 : vector<8x32xf32>
    %39 = arith.addf %36, %38 : vector<8x32xf32>
    %40 = math.tanh %39 : vector<8x32xf32>
    %41 = arith.subf %14, %40 : vector<8x32xf32>
    %42 = arith.mulf %35, %41 : vector<8x32xf32>
    %43 = arith.addf %40, %42 : vector<8x32xf32>
    %c0_29 = arith.constant 0 : index
    %44 = memref.load %arg1[%c0_29] : memref<7xf32, #tpu.memory_space<smem>>
    %cst_30 = arith.constant dense<0.000000e+00> : vector<8x32xf32>
    %45 = tpu.matmul %43, %2, %cst_30 {dimension_numbers = #tpu.dot_dimension_numbers<[1], [0], [0], [1], [0, 0, 1, 1], [], []>} : vector<8x32xf32>, vector<32x32xf32>, vector<8x32xf32> -> vector<8x32xf32>
    %46 = vector.broadcast %5 : vector<1x32xf32> to vector<8x32xf32>
    %47 = arith.addf %45, %46 : vector<8x32xf32>
    %48 = math.tanh %47 : vector<8x32xf32>
    %cst_31 = arith.constant dense<0.000000e+00> : vector<8x32xf32>
    %49 = tpu.matmul %48, %3, %cst_31 {dimension_numbers = #tpu.dot_dimension_numbers<[1], [0], [0], [1], [0, 0, 1, 1], [], []>} : vector<8x32xf32>, vector<32x32xf32>, vector<8x32xf32> -> vector<8x32xf32>
    %50 = vector.broadcast %6 : vector<1x32xf32> to vector<8x32xf32>
    %51 = arith.addf %49, %50 : vector<8x32xf32>
    %52 = math.tanh %51 : vector<8x32xf32>
    %cst_32 = arith.constant dense<0.000000e+00> : vector<8x32xf32>
    %53 = tpu.matmul %52, %4, %cst_32 {dimension_numbers = #tpu.dot_dimension_numbers<[1], [0], [0], [1], [0, 0, 1, 1], [], []>} : vector<8x32xf32>, vector<32x32xf32>, vector<8x32xf32> -> vector<8x32xf32>
    %54 = vector.broadcast %7 : vector<1x32xf32> to vector<8x32xf32>
    %55 = arith.addf %53, %54 : vector<8x32xf32>
    %56 = vector.broadcast %44 : f32 to vector<8x32xf32>
    %57 = arith.mulf %56, %55 : vector<8x32xf32>
    %cst_33 = arith.constant 0.333333343 : f32
    %58 = vector.broadcast %cst_33 : f32 to vector<8x32xf32>
    %59 = arith.mulf %57, %58 : vector<8x32xf32>
    %60 = arith.addf %43, %59 : vector<8x32xf32>
    %cst_34 = arith.constant dense<0.000000e+00> : vector<8x32xf32>
    %61 = tpu.matmul %60, %2, %cst_34 {dimension_numbers = #tpu.dot_dimension_numbers<[1], [0], [0], [1], [0, 0, 1, 1], [], []>} : vector<8x32xf32>, vector<32x32xf32>, vector<8x32xf32> -> vector<8x32xf32>
    %62 = vector.broadcast %5 : vector<1x32xf32> to vector<8x32xf32>
    %63 = arith.addf %61, %62 : vector<8x32xf32>
    %64 = math.tanh %63 : vector<8x32xf32>
    %cst_35 = arith.constant dense<0.000000e+00> : vector<8x32xf32>
    %65 = tpu.matmul %64, %3, %cst_35 {dimension_numbers = #tpu.dot_dimension_numbers<[1], [0], [0], [1], [0, 0, 1, 1], [], []>} : vector<8x32xf32>, vector<32x32xf32>, vector<8x32xf32> -> vector<8x32xf32>
    %66 = vector.broadcast %6 : vector<1x32xf32> to vector<8x32xf32>
    %67 = arith.addf %65, %66 : vector<8x32xf32>
    %68 = math.tanh %67 : vector<8x32xf32>
    %cst_36 = arith.constant dense<0.000000e+00> : vector<8x32xf32>
    %69 = tpu.matmul %68, %4, %cst_36 {dimension_numbers = #tpu.dot_dimension_numbers<[1], [0], [0], [1], [0, 0, 1, 1], [], []>} : vector<8x32xf32>, vector<32x32xf32>, vector<8x32xf32> -> vector<8x32xf32>
    %70 = vector.broadcast %7 : vector<1x32xf32> to vector<8x32xf32>
    %71 = arith.addf %69, %70 : vector<8x32xf32>
    %cst_37 = arith.constant 0.333333343 : f32
    %72 = vector.broadcast %cst_37 : f32 to vector<8x32xf32>
    %73 = arith.mulf %55, %72 : vector<8x32xf32>
    %74 = arith.subf %71, %73 : vector<8x32xf32>
    %75 = vector.broadcast %44 : f32 to vector<8x32xf32>
    %76 = arith.mulf %75, %74 : vector<8x32xf32>
    %77 = arith.addf %43, %76 : vector<8x32xf32>
    %cst_38 = arith.constant dense<0.000000e+00> : vector<8x32xf32>
    %78 = tpu.matmul %77, %2, %cst_38 {dimension_numbers = #tpu.dot_dimension_numbers<[1], [0], [0], [1], [0, 0, 1, 1], [], []>} : vector<8x32xf32>, vector<32x32xf32>, vector<8x32xf32> -> vector<8x32xf32>
    %79 = vector.broadcast %5 : vector<1x32xf32> to vector<8x32xf32>
    %80 = arith.addf %78, %79 : vector<8x32xf32>
    %81 = math.tanh %80 : vector<8x32xf32>
    %cst_39 = arith.constant dense<0.000000e+00> : vector<8x32xf32>
    %82 = tpu.matmul %81, %3, %cst_39 {dimension_numbers = #tpu.dot_dimension_numbers<[1], [0], [0], [1], [0, 0, 1, 1], [], []>} : vector<8x32xf32>, vector<32x32xf32>, vector<8x32xf32> -> vector<8x32xf32>
    %83 = vector.broadcast %6 : vector<1x32xf32> to vector<8x32xf32>
    %84 = arith.addf %82, %83 : vector<8x32xf32>
    %85 = math.tanh %84 : vector<8x32xf32>
    %cst_40 = arith.constant dense<0.000000e+00> : vector<8x32xf32>
    %86 = tpu.matmul %85, %4, %cst_40 {dimension_numbers = #tpu.dot_dimension_numbers<[1], [0], [0], [1], [0, 0, 1, 1], [], []>} : vector<8x32xf32>, vector<32x32xf32>, vector<8x32xf32> -> vector<8x32xf32>
    %87 = vector.broadcast %7 : vector<1x32xf32> to vector<8x32xf32>
    %88 = arith.addf %86, %87 : vector<8x32xf32>
    %89 = arith.subf %55, %71 : vector<8x32xf32>
    %90 = arith.addf %89, %88 : vector<8x32xf32>
    %91 = vector.broadcast %44 : f32 to vector<8x32xf32>
    %92 = arith.mulf %91, %90 : vector<8x32xf32>
    %93 = arith.addf %43, %92 : vector<8x32xf32>
    %cst_41 = arith.constant dense<0.000000e+00> : vector<8x32xf32>
    %94 = tpu.matmul %93, %2, %cst_41 {dimension_numbers = #tpu.dot_dimension_numbers<[1], [0], [0], [1], [0, 0, 1, 1], [], []>} : vector<8x32xf32>, vector<32x32xf32>, vector<8x32xf32> -> vector<8x32xf32>
    %95 = vector.broadcast %5 : vector<1x32xf32> to vector<8x32xf32>
    %96 = arith.addf %94, %95 : vector<8x32xf32>
    %97 = math.tanh %96 : vector<8x32xf32>
    %cst_42 = arith.constant dense<0.000000e+00> : vector<8x32xf32>
    %98 = tpu.matmul %97, %3, %cst_42 {dimension_numbers = #tpu.dot_dimension_numbers<[1], [0], [0], [1], [0, 0, 1, 1], [], []>} : vector<8x32xf32>, vector<32x32xf32>, vector<8x32xf32> -> vector<8x32xf32>
    %99 = vector.broadcast %6 : vector<1x32xf32> to vector<8x32xf32>
    %100 = arith.addf %98, %99 : vector<8x32xf32>
    %101 = math.tanh %100 : vector<8x32xf32>
    %cst_43 = arith.constant dense<0.000000e+00> : vector<8x32xf32>
    %102 = tpu.matmul %101, %4, %cst_43 {dimension_numbers = #tpu.dot_dimension_numbers<[1], [0], [0], [1], [0, 0, 1, 1], [], []>} : vector<8x32xf32>, vector<32x32xf32>, vector<8x32xf32> -> vector<8x32xf32>
    %103 = vector.broadcast %7 : vector<1x32xf32> to vector<8x32xf32>
    %104 = arith.addf %102, %103 : vector<8x32xf32>
    %105 = arith.addf %71, %88 : vector<8x32xf32>
    %cst_44 = arith.constant 3.000000e+00 : f32
    %106 = vector.broadcast %cst_44 : f32 to vector<8x32xf32>
    %107 = arith.mulf %106, %105 : vector<8x32xf32>
    %108 = arith.addf %55, %107 : vector<8x32xf32>
    %109 = arith.addf %108, %104 : vector<8x32xf32>
    %110 = vector.broadcast %44 : f32 to vector<8x32xf32>
    %111 = arith.mulf %110, %109 : vector<8x32xf32>
    %cst_45 = arith.constant 1.250000e-01 : f32
    %112 = vector.broadcast %cst_45 : f32 to vector<8x32xf32>
    %113 = arith.mulf %111, %112 : vector<8x32xf32>
    %114 = arith.addf %43, %113 : vector<8x32xf32>
    %115 = vector.extract_strided_slice %13 {offsets = [8, 0], sizes = [8, 96], strides = [1, 1]} : vector<64x96xf32> to vector<8x96xf32>
    %cst_46 = arith.constant dense<0.000000e+00> : vector<8x96xf32>
    %116 = tpu.matmul %114, %0, %cst_46 {dimension_numbers = #tpu.dot_dimension_numbers<[1], [0], [0], [1], [0, 0, 1, 1], [], []>} : vector<8x32xf32>, vector<32x96xf32>, vector<8x96xf32> -> vector<8x96xf32>
    %117 = vector.broadcast %1 : vector<1x96xf32> to vector<8x96xf32>
    %118 = arith.addf %116, %117 : vector<8x96xf32>
    %119 = arith.addf %115, %118 : vector<8x96xf32>
    %120 = vector.extract_strided_slice %119 {offsets = [0, 0], sizes = [8, 32], strides = [1, 1]} : vector<8x96xf32> to vector<8x32xf32>
    %cst_47 = arith.constant 0.000000e+00 : f32
    %121 = vector.broadcast %cst_47 : f32 to vector<8x32xf32>
    %122 = arith.subf %121, %120 : vector<8x32xf32>
    %123 = math.exp %122 : vector<8x32xf32>
    %cst_48 = arith.constant 1.000000e+00 : f32
    %124 = vector.broadcast %cst_48 : f32 to vector<8x32xf32>
    %125 = arith.addf %124, %123 : vector<8x32xf32>
    %cst_49 = arith.constant 1.000000e+00 : f32
    %126 = vector.broadcast %cst_49 : f32 to vector<8x32xf32>
    %127 = arith.divf %126, %125 : vector<8x32xf32>
    %128 = vector.extract_strided_slice %119 {offsets = [0, 32], sizes = [8, 32], strides = [1, 1]} : vector<8x96xf32> to vector<8x32xf32>
    %cst_50 = arith.constant 0.000000e+00 : f32
    %129 = vector.broadcast %cst_50 : f32 to vector<8x32xf32>
    %130 = arith.subf %129, %128 : vector<8x32xf32>
    %131 = math.exp %130 : vector<8x32xf32>
    %cst_51 = arith.constant 1.000000e+00 : f32
    %132 = vector.broadcast %cst_51 : f32 to vector<8x32xf32>
    %133 = arith.addf %132, %131 : vector<8x32xf32>
    %cst_52 = arith.constant 1.000000e+00 : f32
    %134 = vector.broadcast %cst_52 : f32 to vector<8x32xf32>
    %135 = arith.divf %134, %133 : vector<8x32xf32>
    %136 = vector.extract_strided_slice %115 {offsets = [0, 64], sizes = [8, 32], strides = [1, 1]} : vector<8x96xf32> to vector<8x32xf32>
    %137 = vector.extract_strided_slice %118 {offsets = [0, 64], sizes = [8, 32], strides = [1, 1]} : vector<8x96xf32> to vector<8x32xf32>
    %138 = arith.mulf %127, %137 : vector<8x32xf32>
    %139 = arith.addf %136, %138 : vector<8x32xf32>
    %140 = math.tanh %139 : vector<8x32xf32>
    %141 = arith.subf %114, %140 : vector<8x32xf32>
    %142 = arith.mulf %135, %141 : vector<8x32xf32>
    %143 = arith.addf %140, %142 : vector<8x32xf32>
    %c1 = arith.constant 1 : index
    %144 = memref.load %arg1[%c1] : memref<7xf32, #tpu.memory_space<smem>>
    %cst_53 = arith.constant dense<0.000000e+00> : vector<8x32xf32>
    %145 = tpu.matmul %143, %2, %cst_53 {dimension_numbers = #tpu.dot_dimension_numbers<[1], [0], [0], [1], [0, 0, 1, 1], [], []>} : vector<8x32xf32>, vector<32x32xf32>, vector<8x32xf32> -> vector<8x32xf32>
    %146 = vector.broadcast %5 : vector<1x32xf32> to vector<8x32xf32>
    %147 = arith.addf %145, %146 : vector<8x32xf32>
    %148 = math.tanh %147 : vector<8x32xf32>
    %cst_54 = arith.constant dense<0.000000e+00> : vector<8x32xf32>
    %149 = tpu.matmul %148, %3, %cst_54 {dimension_numbers = #tpu.dot_dimension_numbers<[1], [0], [0], [1], [0, 0, 1, 1], [], []>} : vector<8x32xf32>, vector<32x32xf32>, vector<8x32xf32> -> vector<8x32xf32>
    %150 = vector.broadcast %6 : vector<1x32xf32> to vector<8x32xf32>
    %151 = arith.addf %149, %150 : vector<8x32xf32>
    %152 = math.tanh %151 : vector<8x32xf32>
    %cst_55 = arith.constant dense<0.000000e+00> : vector<8x32xf32>
    %153 = tpu.matmul %152, %4, %cst_55 {dimension_numbers = #tpu.dot_dimension_numbers<[1], [0], [0], [1], [0, 0, 1, 1], [], []>} : vector<8x32xf32>, vector<32x32xf32>, vector<8x32xf32> -> vector<8x32xf32>
    %154 = vector.broadcast %7 : vector<1x32xf32> to vector<8x32xf32>
    %155 = arith.addf %153, %154 : vector<8x32xf32>
    %156 = vector.broadcast %144 : f32 to vector<8x32xf32>
    %157 = arith.mulf %156, %155 : vector<8x32xf32>
    %cst_56 = arith.constant 0.333333343 : f32
    %158 = vector.broadcast %cst_56 : f32 to vector<8x32xf32>
    %159 = arith.mulf %157, %158 : vector<8x32xf32>
    %160 = arith.addf %143, %159 : vector<8x32xf32>
    %cst_57 = arith.constant dense<0.000000e+00> : vector<8x32xf32>
    %161 = tpu.matmul %160, %2, %cst_57 {dimension_numbers = #tpu.dot_dimension_numbers<[1], [0], [0], [1], [0, 0, 1, 1], [], []>} : vector<8x32xf32>, vector<32x32xf32>, vector<8x32xf32> -> vector<8x32xf32>
    %162 = vector.broadcast %5 : vector<1x32xf32> to vector<8x32xf32>
    %163 = arith.addf %161, %162 : vector<8x32xf32>
    %164 = math.tanh %163 : vector<8x32xf32>
    %cst_58 = arith.constant dense<0.000000e+00> : vector<8x32xf32>
    %165 = tpu.matmul %164, %3, %cst_58 {dimension_numbers = #tpu.dot_dimension_numbers<[1], [0], [0], [1], [0, 0, 1, 1], [], []>} : vector<8x32xf32>, vector<32x32xf32>, vector<8x32xf32> -> vector<8x32xf32>
    %166 = vector.broadcast %6 : vector<1x32xf32> to vector<8x32xf32>
    %167 = arith.addf %165, %166 : vector<8x32xf32>
    %168 = math.tanh %167 : vector<8x32xf32>
    %cst_59 = arith.constant dense<0.000000e+00> : vector<8x32xf32>
    %169 = tpu.matmul %168, %4, %cst_59 {dimension_numbers = #tpu.dot_dimension_numbers<[1], [0], [0], [1], [0, 0, 1, 1], [], []>} : vector<8x32xf32>, vector<32x32xf32>, vector<8x32xf32> -> vector<8x32xf32>
    %170 = vector.broadcast %7 : vector<1x32xf32> to vector<8x32xf32>
    %171 = arith.addf %169, %170 : vector<8x32xf32>
    %cst_60 = arith.constant 0.333333343 : f32
    %172 = vector.broadcast %cst_60 : f32 to vector<8x32xf32>
    %173 = arith.mulf %155, %172 : vector<8x32xf32>
    %174 = arith.subf %171, %173 : vector<8x32xf32>
    %175 = vector.broadcast %144 : f32 to vector<8x32xf32>
    %176 = arith.mulf %175, %174 : vector<8x32xf32>
    %177 = arith.addf %143, %176 : vector<8x32xf32>
    %cst_61 = arith.constant dense<0.000000e+00> : vector<8x32xf32>
    %178 = tpu.matmul %177, %2, %cst_61 {dimension_numbers = #tpu.dot_dimension_numbers<[1], [0], [0], [1], [0, 0, 1, 1], [], []>} : vector<8x32xf32>, vector<32x32xf32>, vector<8x32xf32> -> vector<8x32xf32>
    %179 = vector.broadcast %5 : vector<1x32xf32> to vector<8x32xf32>
    %180 = arith.addf %178, %179 : vector<8x32xf32>
    %181 = math.tanh %180 : vector<8x32xf32>
    %cst_62 = arith.constant dense<0.000000e+00> : vector<8x32xf32>
    %182 = tpu.matmul %181, %3, %cst_62 {dimension_numbers = #tpu.dot_dimension_numbers<[1], [0], [0], [1], [0, 0, 1, 1], [], []>} : vector<8x32xf32>, vector<32x32xf32>, vector<8x32xf32> -> vector<8x32xf32>
    %183 = vector.broadcast %6 : vector<1x32xf32> to vector<8x32xf32>
    %184 = arith.addf %182, %183 : vector<8x32xf32>
    %185 = math.tanh %184 : vector<8x32xf32>
    %cst_63 = arith.constant dense<0.000000e+00> : vector<8x32xf32>
    %186 = tpu.matmul %185, %4, %cst_63 {dimension_numbers = #tpu.dot_dimension_numbers<[1], [0], [0], [1], [0, 0, 1, 1], [], []>} : vector<8x32xf32>, vector<32x32xf32>, vector<8x32xf32> -> vector<8x32xf32>
    %187 = vector.broadcast %7 : vector<1x32xf32> to vector<8x32xf32>
    %188 = arith.addf %186, %187 : vector<8x32xf32>
    %189 = arith.subf %155, %171 : vector<8x32xf32>
    %190 = arith.addf %189, %188 : vector<8x32xf32>
    %191 = vector.broadcast %144 : f32 to vector<8x32xf32>
    %192 = arith.mulf %191, %190 : vector<8x32xf32>
    %193 = arith.addf %143, %192 : vector<8x32xf32>
    %cst_64 = arith.constant dense<0.000000e+00> : vector<8x32xf32>
    %194 = tpu.matmul %193, %2, %cst_64 {dimension_numbers = #tpu.dot_dimension_numbers<[1], [0], [0], [1], [0, 0, 1, 1], [], []>} : vector<8x32xf32>, vector<32x32xf32>, vector<8x32xf32> -> vector<8x32xf32>
    %195 = vector.broadcast %5 : vector<1x32xf32> to vector<8x32xf32>
    %196 = arith.addf %194, %195 : vector<8x32xf32>
    %197 = math.tanh %196 : vector<8x32xf32>
    %cst_65 = arith.constant dense<0.000000e+00> : vector<8x32xf32>
    %198 = tpu.matmul %197, %3, %cst_65 {dimension_numbers = #tpu.dot_dimension_numbers<[1], [0], [0], [1], [0, 0, 1, 1], [], []>} : vector<8x32xf32>, vector<32x32xf32>, vector<8x32xf32> -> vector<8x32xf32>
    %199 = vector.broadcast %6 : vector<1x32xf32> to vector<8x32xf32>
    %200 = arith.addf %198, %199 : vector<8x32xf32>
    %201 = math.tanh %200 : vector<8x32xf32>
    %cst_66 = arith.constant dense<0.000000e+00> : vector<8x32xf32>
    %202 = tpu.matmul %201, %4, %cst_66 {dimension_numbers = #tpu.dot_dimension_numbers<[1], [0], [0], [1], [0, 0, 1, 1], [], []>} : vector<8x32xf32>, vector<32x32xf32>, vector<8x32xf32> -> vector<8x32xf32>
    %203 = vector.broadcast %7 : vector<1x32xf32> to vector<8x32xf32>
    %204 = arith.addf %202, %203 : vector<8x32xf32>
    %205 = arith.addf %171, %188 : vector<8x32xf32>
    %cst_67 = arith.constant 3.000000e+00 : f32
    %206 = vector.broadcast %cst_67 : f32 to vector<8x32xf32>
    %207 = arith.mulf %206, %205 : vector<8x32xf32>
    %208 = arith.addf %155, %207 : vector<8x32xf32>
    %209 = arith.addf %208, %204 : vector<8x32xf32>
    %210 = vector.broadcast %144 : f32 to vector<8x32xf32>
    %211 = arith.mulf %210, %209 : vector<8x32xf32>
    %cst_68 = arith.constant 1.250000e-01 : f32
    %212 = vector.broadcast %cst_68 : f32 to vector<8x32xf32>
    %213 = arith.mulf %211, %212 : vector<8x32xf32>
    %214 = arith.addf %143, %213 : vector<8x32xf32>
    %215 = vector.extract_strided_slice %13 {offsets = [16, 0], sizes = [8, 96], strides = [1, 1]} : vector<64x96xf32> to vector<8x96xf32>
    %cst_69 = arith.constant dense<0.000000e+00> : vector<8x96xf32>
    %216 = tpu.matmul %214, %0, %cst_69 {dimension_numbers = #tpu.dot_dimension_numbers<[1], [0], [0], [1], [0, 0, 1, 1], [], []>} : vector<8x32xf32>, vector<32x96xf32>, vector<8x96xf32> -> vector<8x96xf32>
    %217 = vector.broadcast %1 : vector<1x96xf32> to vector<8x96xf32>
    %218 = arith.addf %216, %217 : vector<8x96xf32>
    %219 = arith.addf %215, %218 : vector<8x96xf32>
    %220 = vector.extract_strided_slice %219 {offsets = [0, 0], sizes = [8, 32], strides = [1, 1]} : vector<8x96xf32> to vector<8x32xf32>
    %cst_70 = arith.constant 0.000000e+00 : f32
    %221 = vector.broadcast %cst_70 : f32 to vector<8x32xf32>
    %222 = arith.subf %221, %220 : vector<8x32xf32>
    %223 = math.exp %222 : vector<8x32xf32>
    %cst_71 = arith.constant 1.000000e+00 : f32
    %224 = vector.broadcast %cst_71 : f32 to vector<8x32xf32>
    %225 = arith.addf %224, %223 : vector<8x32xf32>
    %cst_72 = arith.constant 1.000000e+00 : f32
    %226 = vector.broadcast %cst_72 : f32 to vector<8x32xf32>
    %227 = arith.divf %226, %225 : vector<8x32xf32>
    %228 = vector.extract_strided_slice %219 {offsets = [0, 32], sizes = [8, 32], strides = [1, 1]} : vector<8x96xf32> to vector<8x32xf32>
    %cst_73 = arith.constant 0.000000e+00 : f32
    %229 = vector.broadcast %cst_73 : f32 to vector<8x32xf32>
    %230 = arith.subf %229, %228 : vector<8x32xf32>
    %231 = math.exp %230 : vector<8x32xf32>
    %cst_74 = arith.constant 1.000000e+00 : f32
    %232 = vector.broadcast %cst_74 : f32 to vector<8x32xf32>
    %233 = arith.addf %232, %231 : vector<8x32xf32>
    %cst_75 = arith.constant 1.000000e+00 : f32
    %234 = vector.broadcast %cst_75 : f32 to vector<8x32xf32>
    %235 = arith.divf %234, %233 : vector<8x32xf32>
    %236 = vector.extract_strided_slice %215 {offsets = [0, 64], sizes = [8, 32], strides = [1, 1]} : vector<8x96xf32> to vector<8x32xf32>
    %237 = vector.extract_strided_slice %218 {offsets = [0, 64], sizes = [8, 32], strides = [1, 1]} : vector<8x96xf32> to vector<8x32xf32>
    %238 = arith.mulf %227, %237 : vector<8x32xf32>
    %239 = arith.addf %236, %238 : vector<8x32xf32>
    %240 = math.tanh %239 : vector<8x32xf32>
    %241 = arith.subf %214, %240 : vector<8x32xf32>
    %242 = arith.mulf %235, %241 : vector<8x32xf32>
    %243 = arith.addf %240, %242 : vector<8x32xf32>
    %c2 = arith.constant 2 : index
    %244 = memref.load %arg1[%c2] : memref<7xf32, #tpu.memory_space<smem>>
    %cst_76 = arith.constant dense<0.000000e+00> : vector<8x32xf32>
    %245 = tpu.matmul %243, %2, %cst_76 {dimension_numbers = #tpu.dot_dimension_numbers<[1], [0], [0], [1], [0, 0, 1, 1], [], []>} : vector<8x32xf32>, vector<32x32xf32>, vector<8x32xf32> -> vector<8x32xf32>
    %246 = vector.broadcast %5 : vector<1x32xf32> to vector<8x32xf32>
    %247 = arith.addf %245, %246 : vector<8x32xf32>
    %248 = math.tanh %247 : vector<8x32xf32>
    %cst_77 = arith.constant dense<0.000000e+00> : vector<8x32xf32>
    %249 = tpu.matmul %248, %3, %cst_77 {dimension_numbers = #tpu.dot_dimension_numbers<[1], [0], [0], [1], [0, 0, 1, 1], [], []>} : vector<8x32xf32>, vector<32x32xf32>, vector<8x32xf32> -> vector<8x32xf32>
    %250 = vector.broadcast %6 : vector<1x32xf32> to vector<8x32xf32>
    %251 = arith.addf %249, %250 : vector<8x32xf32>
    %252 = math.tanh %251 : vector<8x32xf32>
    %cst_78 = arith.constant dense<0.000000e+00> : vector<8x32xf32>
    %253 = tpu.matmul %252, %4, %cst_78 {dimension_numbers = #tpu.dot_dimension_numbers<[1], [0], [0], [1], [0, 0, 1, 1], [], []>} : vector<8x32xf32>, vector<32x32xf32>, vector<8x32xf32> -> vector<8x32xf32>
    %254 = vector.broadcast %7 : vector<1x32xf32> to vector<8x32xf32>
    %255 = arith.addf %253, %254 : vector<8x32xf32>
    %256 = vector.broadcast %244 : f32 to vector<8x32xf32>
    %257 = arith.mulf %256, %255 : vector<8x32xf32>
    %cst_79 = arith.constant 0.333333343 : f32
    %258 = vector.broadcast %cst_79 : f32 to vector<8x32xf32>
    %259 = arith.mulf %257, %258 : vector<8x32xf32>
    %260 = arith.addf %243, %259 : vector<8x32xf32>
    %cst_80 = arith.constant dense<0.000000e+00> : vector<8x32xf32>
    %261 = tpu.matmul %260, %2, %cst_80 {dimension_numbers = #tpu.dot_dimension_numbers<[1], [0], [0], [1], [0, 0, 1, 1], [], []>} : vector<8x32xf32>, vector<32x32xf32>, vector<8x32xf32> -> vector<8x32xf32>
    %262 = vector.broadcast %5 : vector<1x32xf32> to vector<8x32xf32>
    %263 = arith.addf %261, %262 : vector<8x32xf32>
    %264 = math.tanh %263 : vector<8x32xf32>
    %cst_81 = arith.constant dense<0.000000e+00> : vector<8x32xf32>
    %265 = tpu.matmul %264, %3, %cst_81 {dimension_numbers = #tpu.dot_dimension_numbers<[1], [0], [0], [1], [0, 0, 1, 1], [], []>} : vector<8x32xf32>, vector<32x32xf32>, vector<8x32xf32> -> vector<8x32xf32>
    %266 = vector.broadcast %6 : vector<1x32xf32> to vector<8x32xf32>
    %267 = arith.addf %265, %266 : vector<8x32xf32>
    %268 = math.tanh %267 : vector<8x32xf32>
    %cst_82 = arith.constant dense<0.000000e+00> : vector<8x32xf32>
    %269 = tpu.matmul %268, %4, %cst_82 {dimension_numbers = #tpu.dot_dimension_numbers<[1], [0], [0], [1], [0, 0, 1, 1], [], []>} : vector<8x32xf32>, vector<32x32xf32>, vector<8x32xf32> -> vector<8x32xf32>
    %270 = vector.broadcast %7 : vector<1x32xf32> to vector<8x32xf32>
    %271 = arith.addf %269, %270 : vector<8x32xf32>
    %cst_83 = arith.constant 0.333333343 : f32
    %272 = vector.broadcast %cst_83 : f32 to vector<8x32xf32>
    %273 = arith.mulf %255, %272 : vector<8x32xf32>
    %274 = arith.subf %271, %273 : vector<8x32xf32>
    %275 = vector.broadcast %244 : f32 to vector<8x32xf32>
    %276 = arith.mulf %275, %274 : vector<8x32xf32>
    %277 = arith.addf %243, %276 : vector<8x32xf32>
    %cst_84 = arith.constant dense<0.000000e+00> : vector<8x32xf32>
    %278 = tpu.matmul %277, %2, %cst_84 {dimension_numbers = #tpu.dot_dimension_numbers<[1], [0], [0], [1], [0, 0, 1, 1], [], []>} : vector<8x32xf32>, vector<32x32xf32>, vector<8x32xf32> -> vector<8x32xf32>
    %279 = vector.broadcast %5 : vector<1x32xf32> to vector<8x32xf32>
    %280 = arith.addf %278, %279 : vector<8x32xf32>
    %281 = math.tanh %280 : vector<8x32xf32>
    %cst_85 = arith.constant dense<0.000000e+00> : vector<8x32xf32>
    %282 = tpu.matmul %281, %3, %cst_85 {dimension_numbers = #tpu.dot_dimension_numbers<[1], [0], [0], [1], [0, 0, 1, 1], [], []>} : vector<8x32xf32>, vector<32x32xf32>, vector<8x32xf32> -> vector<8x32xf32>
    %283 = vector.broadcast %6 : vector<1x32xf32> to vector<8x32xf32>
    %284 = arith.addf %282, %283 : vector<8x32xf32>
    %285 = math.tanh %284 : vector<8x32xf32>
    %cst_86 = arith.constant dense<0.000000e+00> : vector<8x32xf32>
    %286 = tpu.matmul %285, %4, %cst_86 {dimension_numbers = #tpu.dot_dimension_numbers<[1], [0], [0], [1], [0, 0, 1, 1], [], []>} : vector<8x32xf32>, vector<32x32xf32>, vector<8x32xf32> -> vector<8x32xf32>
    %287 = vector.broadcast %7 : vector<1x32xf32> to vector<8x32xf32>
    %288 = arith.addf %286, %287 : vector<8x32xf32>
    %289 = arith.subf %255, %271 : vector<8x32xf32>
    %290 = arith.addf %289, %288 : vector<8x32xf32>
    %291 = vector.broadcast %244 : f32 to vector<8x32xf32>
    %292 = arith.mulf %291, %290 : vector<8x32xf32>
    %293 = arith.addf %243, %292 : vector<8x32xf32>
    %cst_87 = arith.constant dense<0.000000e+00> : vector<8x32xf32>
    %294 = tpu.matmul %293, %2, %cst_87 {dimension_numbers = #tpu.dot_dimension_numbers<[1], [0], [0], [1], [0, 0, 1, 1], [], []>} : vector<8x32xf32>, vector<32x32xf32>, vector<8x32xf32> -> vector<8x32xf32>
    %295 = vector.broadcast %5 : vector<1x32xf32> to vector<8x32xf32>
    %296 = arith.addf %294, %295 : vector<8x32xf32>
    %297 = math.tanh %296 : vector<8x32xf32>
    %cst_88 = arith.constant dense<0.000000e+00> : vector<8x32xf32>
    %298 = tpu.matmul %297, %3, %cst_88 {dimension_numbers = #tpu.dot_dimension_numbers<[1], [0], [0], [1], [0, 0, 1, 1], [], []>} : vector<8x32xf32>, vector<32x32xf32>, vector<8x32xf32> -> vector<8x32xf32>
    %299 = vector.broadcast %6 : vector<1x32xf32> to vector<8x32xf32>
    %300 = arith.addf %298, %299 : vector<8x32xf32>
    %301 = math.tanh %300 : vector<8x32xf32>
    %cst_89 = arith.constant dense<0.000000e+00> : vector<8x32xf32>
    %302 = tpu.matmul %301, %4, %cst_89 {dimension_numbers = #tpu.dot_dimension_numbers<[1], [0], [0], [1], [0, 0, 1, 1], [], []>} : vector<8x32xf32>, vector<32x32xf32>, vector<8x32xf32> -> vector<8x32xf32>
    %303 = vector.broadcast %7 : vector<1x32xf32> to vector<8x32xf32>
    %304 = arith.addf %302, %303 : vector<8x32xf32>
    %305 = arith.addf %271, %288 : vector<8x32xf32>
    %cst_90 = arith.constant 3.000000e+00 : f32
    %306 = vector.broadcast %cst_90 : f32 to vector<8x32xf32>
    %307 = arith.mulf %306, %305 : vector<8x32xf32>
    %308 = arith.addf %255, %307 : vector<8x32xf32>
    %309 = arith.addf %308, %304 : vector<8x32xf32>
    %310 = vector.broadcast %244 : f32 to vector<8x32xf32>
    %311 = arith.mulf %310, %309 : vector<8x32xf32>
    %cst_91 = arith.constant 1.250000e-01 : f32
    %312 = vector.broadcast %cst_91 : f32 to vector<8x32xf32>
    %313 = arith.mulf %311, %312 : vector<8x32xf32>
    %314 = arith.addf %243, %313 : vector<8x32xf32>
    %315 = vector.extract_strided_slice %13 {offsets = [24, 0], sizes = [8, 96], strides = [1, 1]} : vector<64x96xf32> to vector<8x96xf32>
    %cst_92 = arith.constant dense<0.000000e+00> : vector<8x96xf32>
    %316 = tpu.matmul %314, %0, %cst_92 {dimension_numbers = #tpu.dot_dimension_numbers<[1], [0], [0], [1], [0, 0, 1, 1], [], []>} : vector<8x32xf32>, vector<32x96xf32>, vector<8x96xf32> -> vector<8x96xf32>
    %317 = vector.broadcast %1 : vector<1x96xf32> to vector<8x96xf32>
    %318 = arith.addf %316, %317 : vector<8x96xf32>
    %319 = arith.addf %315, %318 : vector<8x96xf32>
    %320 = vector.extract_strided_slice %319 {offsets = [0, 0], sizes = [8, 32], strides = [1, 1]} : vector<8x96xf32> to vector<8x32xf32>
    %cst_93 = arith.constant 0.000000e+00 : f32
    %321 = vector.broadcast %cst_93 : f32 to vector<8x32xf32>
    %322 = arith.subf %321, %320 : vector<8x32xf32>
    %323 = math.exp %322 : vector<8x32xf32>
    %cst_94 = arith.constant 1.000000e+00 : f32
    %324 = vector.broadcast %cst_94 : f32 to vector<8x32xf32>
    %325 = arith.addf %324, %323 : vector<8x32xf32>
    %cst_95 = arith.constant 1.000000e+00 : f32
    %326 = vector.broadcast %cst_95 : f32 to vector<8x32xf32>
    %327 = arith.divf %326, %325 : vector<8x32xf32>
    %328 = vector.extract_strided_slice %319 {offsets = [0, 32], sizes = [8, 32], strides = [1, 1]} : vector<8x96xf32> to vector<8x32xf32>
    %cst_96 = arith.constant 0.000000e+00 : f32
    %329 = vector.broadcast %cst_96 : f32 to vector<8x32xf32>
    %330 = arith.subf %329, %328 : vector<8x32xf32>
    %331 = math.exp %330 : vector<8x32xf32>
    %cst_97 = arith.constant 1.000000e+00 : f32
    %332 = vector.broadcast %cst_97 : f32 to vector<8x32xf32>
    %333 = arith.addf %332, %331 : vector<8x32xf32>
    %cst_98 = arith.constant 1.000000e+00 : f32
    %334 = vector.broadcast %cst_98 : f32 to vector<8x32xf32>
    %335 = arith.divf %334, %333 : vector<8x32xf32>
    %336 = vector.extract_strided_slice %315 {offsets = [0, 64], sizes = [8, 32], strides = [1, 1]} : vector<8x96xf32> to vector<8x32xf32>
    %337 = vector.extract_strided_slice %318 {offsets = [0, 64], sizes = [8, 32], strides = [1, 1]} : vector<8x96xf32> to vector<8x32xf32>
    %338 = arith.mulf %327, %337 : vector<8x32xf32>
    %339 = arith.addf %336, %338 : vector<8x32xf32>
    %340 = math.tanh %339 : vector<8x32xf32>
    %341 = arith.subf %314, %340 : vector<8x32xf32>
    %342 = arith.mulf %335, %341 : vector<8x32xf32>
    %343 = arith.addf %340, %342 : vector<8x32xf32>
    %c3 = arith.constant 3 : index
    %344 = memref.load %arg1[%c3] : memref<7xf32, #tpu.memory_space<smem>>
    %cst_99 = arith.constant dense<0.000000e+00> : vector<8x32xf32>
    %345 = tpu.matmul %343, %2, %cst_99 {dimension_numbers = #tpu.dot_dimension_numbers<[1], [0], [0], [1], [0, 0, 1, 1], [], []>} : vector<8x32xf32>, vector<32x32xf32>, vector<8x32xf32> -> vector<8x32xf32>
    %346 = vector.broadcast %5 : vector<1x32xf32> to vector<8x32xf32>
    %347 = arith.addf %345, %346 : vector<8x32xf32>
    %348 = math.tanh %347 : vector<8x32xf32>
    %cst_100 = arith.constant dense<0.000000e+00> : vector<8x32xf32>
    %349 = tpu.matmul %348, %3, %cst_100 {dimension_numbers = #tpu.dot_dimension_numbers<[1], [0], [0], [1], [0, 0, 1, 1], [], []>} : vector<8x32xf32>, vector<32x32xf32>, vector<8x32xf32> -> vector<8x32xf32>
    %350 = vector.broadcast %6 : vector<1x32xf32> to vector<8x32xf32>
    %351 = arith.addf %349, %350 : vector<8x32xf32>
    %352 = math.tanh %351 : vector<8x32xf32>
    %cst_101 = arith.constant dense<0.000000e+00> : vector<8x32xf32>
    %353 = tpu.matmul %352, %4, %cst_101 {dimension_numbers = #tpu.dot_dimension_numbers<[1], [0], [0], [1], [0, 0, 1, 1], [], []>} : vector<8x32xf32>, vector<32x32xf32>, vector<8x32xf32> -> vector<8x32xf32>
    %354 = vector.broadcast %7 : vector<1x32xf32> to vector<8x32xf32>
    %355 = arith.addf %353, %354 : vector<8x32xf32>
    %356 = vector.broadcast %344 : f32 to vector<8x32xf32>
    %357 = arith.mulf %356, %355 : vector<8x32xf32>
    %cst_102 = arith.constant 0.333333343 : f32
    %358 = vector.broadcast %cst_102 : f32 to vector<8x32xf32>
    %359 = arith.mulf %357, %358 : vector<8x32xf32>
    %360 = arith.addf %343, %359 : vector<8x32xf32>
    %cst_103 = arith.constant dense<0.000000e+00> : vector<8x32xf32>
    %361 = tpu.matmul %360, %2, %cst_103 {dimension_numbers = #tpu.dot_dimension_numbers<[1], [0], [0], [1], [0, 0, 1, 1], [], []>} : vector<8x32xf32>, vector<32x32xf32>, vector<8x32xf32> -> vector<8x32xf32>
    %362 = vector.broadcast %5 : vector<1x32xf32> to vector<8x32xf32>
    %363 = arith.addf %361, %362 : vector<8x32xf32>
    %364 = math.tanh %363 : vector<8x32xf32>
    %cst_104 = arith.constant dense<0.000000e+00> : vector<8x32xf32>
    %365 = tpu.matmul %364, %3, %cst_104 {dimension_numbers = #tpu.dot_dimension_numbers<[1], [0], [0], [1], [0, 0, 1, 1], [], []>} : vector<8x32xf32>, vector<32x32xf32>, vector<8x32xf32> -> vector<8x32xf32>
    %366 = vector.broadcast %6 : vector<1x32xf32> to vector<8x32xf32>
    %367 = arith.addf %365, %366 : vector<8x32xf32>
    %368 = math.tanh %367 : vector<8x32xf32>
    %cst_105 = arith.constant dense<0.000000e+00> : vector<8x32xf32>
    %369 = tpu.matmul %368, %4, %cst_105 {dimension_numbers = #tpu.dot_dimension_numbers<[1], [0], [0], [1], [0, 0, 1, 1], [], []>} : vector<8x32xf32>, vector<32x32xf32>, vector<8x32xf32> -> vector<8x32xf32>
    %370 = vector.broadcast %7 : vector<1x32xf32> to vector<8x32xf32>
    %371 = arith.addf %369, %370 : vector<8x32xf32>
    %cst_106 = arith.constant 0.333333343 : f32
    %372 = vector.broadcast %cst_106 : f32 to vector<8x32xf32>
    %373 = arith.mulf %355, %372 : vector<8x32xf32>
    %374 = arith.subf %371, %373 : vector<8x32xf32>
    %375 = vector.broadcast %344 : f32 to vector<8x32xf32>
    %376 = arith.mulf %375, %374 : vector<8x32xf32>
    %377 = arith.addf %343, %376 : vector<8x32xf32>
    %cst_107 = arith.constant dense<0.000000e+00> : vector<8x32xf32>
    %378 = tpu.matmul %377, %2, %cst_107 {dimension_numbers = #tpu.dot_dimension_numbers<[1], [0], [0], [1], [0, 0, 1, 1], [], []>} : vector<8x32xf32>, vector<32x32xf32>, vector<8x32xf32> -> vector<8x32xf32>
    %379 = vector.broadcast %5 : vector<1x32xf32> to vector<8x32xf32>
    %380 = arith.addf %378, %379 : vector<8x32xf32>
    %381 = math.tanh %380 : vector<8x32xf32>
    %cst_108 = arith.constant dense<0.000000e+00> : vector<8x32xf32>
    %382 = tpu.matmul %381, %3, %cst_108 {dimension_numbers = #tpu.dot_dimension_numbers<[1], [0], [0], [1], [0, 0, 1, 1], [], []>} : vector<8x32xf32>, vector<32x32xf32>, vector<8x32xf32> -> vector<8x32xf32>
    %383 = vector.broadcast %6 : vector<1x32xf32> to vector<8x32xf32>
    %384 = arith.addf %382, %383 : vector<8x32xf32>
    %385 = math.tanh %384 : vector<8x32xf32>
    %cst_109 = arith.constant dense<0.000000e+00> : vector<8x32xf32>
    %386 = tpu.matmul %385, %4, %cst_109 {dimension_numbers = #tpu.dot_dimension_numbers<[1], [0], [0], [1], [0, 0, 1, 1], [], []>} : vector<8x32xf32>, vector<32x32xf32>, vector<8x32xf32> -> vector<8x32xf32>
    %387 = vector.broadcast %7 : vector<1x32xf32> to vector<8x32xf32>
    %388 = arith.addf %386, %387 : vector<8x32xf32>
    %389 = arith.subf %355, %371 : vector<8x32xf32>
    %390 = arith.addf %389, %388 : vector<8x32xf32>
    %391 = vector.broadcast %344 : f32 to vector<8x32xf32>
    %392 = arith.mulf %391, %390 : vector<8x32xf32>
    %393 = arith.addf %343, %392 : vector<8x32xf32>
    %cst_110 = arith.constant dense<0.000000e+00> : vector<8x32xf32>
    %394 = tpu.matmul %393, %2, %cst_110 {dimension_numbers = #tpu.dot_dimension_numbers<[1], [0], [0], [1], [0, 0, 1, 1], [], []>} : vector<8x32xf32>, vector<32x32xf32>, vector<8x32xf32> -> vector<8x32xf32>
    %395 = vector.broadcast %5 : vector<1x32xf32> to vector<8x32xf32>
    %396 = arith.addf %394, %395 : vector<8x32xf32>
    %397 = math.tanh %396 : vector<8x32xf32>
    %cst_111 = arith.constant dense<0.000000e+00> : vector<8x32xf32>
    %398 = tpu.matmul %397, %3, %cst_111 {dimension_numbers = #tpu.dot_dimension_numbers<[1], [0], [0], [1], [0, 0, 1, 1], [], []>} : vector<8x32xf32>, vector<32x32xf32>, vector<8x32xf32> -> vector<8x32xf32>
    %399 = vector.broadcast %6 : vector<1x32xf32> to vector<8x32xf32>
    %400 = arith.addf %398, %399 : vector<8x32xf32>
    %401 = math.tanh %400 : vector<8x32xf32>
    %cst_112 = arith.constant dense<0.000000e+00> : vector<8x32xf32>
    %402 = tpu.matmul %401, %4, %cst_112 {dimension_numbers = #tpu.dot_dimension_numbers<[1], [0], [0], [1], [0, 0, 1, 1], [], []>} : vector<8x32xf32>, vector<32x32xf32>, vector<8x32xf32> -> vector<8x32xf32>
    %403 = vector.broadcast %7 : vector<1x32xf32> to vector<8x32xf32>
    %404 = arith.addf %402, %403 : vector<8x32xf32>
    %405 = arith.addf %371, %388 : vector<8x32xf32>
    %cst_113 = arith.constant 3.000000e+00 : f32
    %406 = vector.broadcast %cst_113 : f32 to vector<8x32xf32>
    %407 = arith.mulf %406, %405 : vector<8x32xf32>
    %408 = arith.addf %355, %407 : vector<8x32xf32>
    %409 = arith.addf %408, %404 : vector<8x32xf32>
    %410 = vector.broadcast %344 : f32 to vector<8x32xf32>
    %411 = arith.mulf %410, %409 : vector<8x32xf32>
    %cst_114 = arith.constant 1.250000e-01 : f32
    %412 = vector.broadcast %cst_114 : f32 to vector<8x32xf32>
    %413 = arith.mulf %411, %412 : vector<8x32xf32>
    %414 = arith.addf %343, %413 : vector<8x32xf32>
    %415 = vector.extract_strided_slice %13 {offsets = [32, 0], sizes = [8, 96], strides = [1, 1]} : vector<64x96xf32> to vector<8x96xf32>
    %cst_115 = arith.constant dense<0.000000e+00> : vector<8x96xf32>
    %416 = tpu.matmul %414, %0, %cst_115 {dimension_numbers = #tpu.dot_dimension_numbers<[1], [0], [0], [1], [0, 0, 1, 1], [], []>} : vector<8x32xf32>, vector<32x96xf32>, vector<8x96xf32> -> vector<8x96xf32>
    %417 = vector.broadcast %1 : vector<1x96xf32> to vector<8x96xf32>
    %418 = arith.addf %416, %417 : vector<8x96xf32>
    %419 = arith.addf %415, %418 : vector<8x96xf32>
    %420 = vector.extract_strided_slice %419 {offsets = [0, 0], sizes = [8, 32], strides = [1, 1]} : vector<8x96xf32> to vector<8x32xf32>
    %cst_116 = arith.constant 0.000000e+00 : f32
    %421 = vector.broadcast %cst_116 : f32 to vector<8x32xf32>
    %422 = arith.subf %421, %420 : vector<8x32xf32>
    %423 = math.exp %422 : vector<8x32xf32>
    %cst_117 = arith.constant 1.000000e+00 : f32
    %424 = vector.broadcast %cst_117 : f32 to vector<8x32xf32>
    %425 = arith.addf %424, %423 : vector<8x32xf32>
    %cst_118 = arith.constant 1.000000e+00 : f32
    %426 = vector.broadcast %cst_118 : f32 to vector<8x32xf32>
    %427 = arith.divf %426, %425 : vector<8x32xf32>
    %428 = vector.extract_strided_slice %419 {offsets = [0, 32], sizes = [8, 32], strides = [1, 1]} : vector<8x96xf32> to vector<8x32xf32>
    %cst_119 = arith.constant 0.000000e+00 : f32
    %429 = vector.broadcast %cst_119 : f32 to vector<8x32xf32>
    %430 = arith.subf %429, %428 : vector<8x32xf32>
    %431 = math.exp %430 : vector<8x32xf32>
    %cst_120 = arith.constant 1.000000e+00 : f32
    %432 = vector.broadcast %cst_120 : f32 to vector<8x32xf32>
    %433 = arith.addf %432, %431 : vector<8x32xf32>
    %cst_121 = arith.constant 1.000000e+00 : f32
    %434 = vector.broadcast %cst_121 : f32 to vector<8x32xf32>
    %435 = arith.divf %434, %433 : vector<8x32xf32>
    %436 = vector.extract_strided_slice %415 {offsets = [0, 64], sizes = [8, 32], strides = [1, 1]} : vector<8x96xf32> to vector<8x32xf32>
    %437 = vector.extract_strided_slice %418 {offsets = [0, 64], sizes = [8, 32], strides = [1, 1]} : vector<8x96xf32> to vector<8x32xf32>
    %438 = arith.mulf %427, %437 : vector<8x32xf32>
    %439 = arith.addf %436, %438 : vector<8x32xf32>
    %440 = math.tanh %439 : vector<8x32xf32>
    %441 = arith.subf %414, %440 : vector<8x32xf32>
    %442 = arith.mulf %435, %441 : vector<8x32xf32>
    %443 = arith.addf %440, %442 : vector<8x32xf32>
    %c4 = arith.constant 4 : index
    %444 = memref.load %arg1[%c4] : memref<7xf32, #tpu.memory_space<smem>>
    %cst_122 = arith.constant dense<0.000000e+00> : vector<8x32xf32>
    %445 = tpu.matmul %443, %2, %cst_122 {dimension_numbers = #tpu.dot_dimension_numbers<[1], [0], [0], [1], [0, 0, 1, 1], [], []>} : vector<8x32xf32>, vector<32x32xf32>, vector<8x32xf32> -> vector<8x32xf32>
    %446 = vector.broadcast %5 : vector<1x32xf32> to vector<8x32xf32>
    %447 = arith.addf %445, %446 : vector<8x32xf32>
    %448 = math.tanh %447 : vector<8x32xf32>
    %cst_123 = arith.constant dense<0.000000e+00> : vector<8x32xf32>
    %449 = tpu.matmul %448, %3, %cst_123 {dimension_numbers = #tpu.dot_dimension_numbers<[1], [0], [0], [1], [0, 0, 1, 1], [], []>} : vector<8x32xf32>, vector<32x32xf32>, vector<8x32xf32> -> vector<8x32xf32>
    %450 = vector.broadcast %6 : vector<1x32xf32> to vector<8x32xf32>
    %451 = arith.addf %449, %450 : vector<8x32xf32>
    %452 = math.tanh %451 : vector<8x32xf32>
    %cst_124 = arith.constant dense<0.000000e+00> : vector<8x32xf32>
    %453 = tpu.matmul %452, %4, %cst_124 {dimension_numbers = #tpu.dot_dimension_numbers<[1], [0], [0], [1], [0, 0, 1, 1], [], []>} : vector<8x32xf32>, vector<32x32xf32>, vector<8x32xf32> -> vector<8x32xf32>
    %454 = vector.broadcast %7 : vector<1x32xf32> to vector<8x32xf32>
    %455 = arith.addf %453, %454 : vector<8x32xf32>
    %456 = vector.broadcast %444 : f32 to vector<8x32xf32>
    %457 = arith.mulf %456, %455 : vector<8x32xf32>
    %cst_125 = arith.constant 0.333333343 : f32
    %458 = vector.broadcast %cst_125 : f32 to vector<8x32xf32>
    %459 = arith.mulf %457, %458 : vector<8x32xf32>
    %460 = arith.addf %443, %459 : vector<8x32xf32>
    %cst_126 = arith.constant dense<0.000000e+00> : vector<8x32xf32>
    %461 = tpu.matmul %460, %2, %cst_126 {dimension_numbers = #tpu.dot_dimension_numbers<[1], [0], [0], [1], [0, 0, 1, 1], [], []>} : vector<8x32xf32>, vector<32x32xf32>, vector<8x32xf32> -> vector<8x32xf32>
    %462 = vector.broadcast %5 : vector<1x32xf32> to vector<8x32xf32>
    %463 = arith.addf %461, %462 : vector<8x32xf32>
    %464 = math.tanh %463 : vector<8x32xf32>
    %cst_127 = arith.constant dense<0.000000e+00> : vector<8x32xf32>
    %465 = tpu.matmul %464, %3, %cst_127 {dimension_numbers = #tpu.dot_dimension_numbers<[1], [0], [0], [1], [0, 0, 1, 1], [], []>} : vector<8x32xf32>, vector<32x32xf32>, vector<8x32xf32> -> vector<8x32xf32>
    %466 = vector.broadcast %6 : vector<1x32xf32> to vector<8x32xf32>
    %467 = arith.addf %465, %466 : vector<8x32xf32>
    %468 = math.tanh %467 : vector<8x32xf32>
    %cst_128 = arith.constant dense<0.000000e+00> : vector<8x32xf32>
    %469 = tpu.matmul %468, %4, %cst_128 {dimension_numbers = #tpu.dot_dimension_numbers<[1], [0], [0], [1], [0, 0, 1, 1], [], []>} : vector<8x32xf32>, vector<32x32xf32>, vector<8x32xf32> -> vector<8x32xf32>
    %470 = vector.broadcast %7 : vector<1x32xf32> to vector<8x32xf32>
    %471 = arith.addf %469, %470 : vector<8x32xf32>
    %cst_129 = arith.constant 0.333333343 : f32
    %472 = vector.broadcast %cst_129 : f32 to vector<8x32xf32>
    %473 = arith.mulf %455, %472 : vector<8x32xf32>
    %474 = arith.subf %471, %473 : vector<8x32xf32>
    %475 = vector.broadcast %444 : f32 to vector<8x32xf32>
    %476 = arith.mulf %475, %474 : vector<8x32xf32>
    %477 = arith.addf %443, %476 : vector<8x32xf32>
    %cst_130 = arith.constant dense<0.000000e+00> : vector<8x32xf32>
    %478 = tpu.matmul %477, %2, %cst_130 {dimension_numbers = #tpu.dot_dimension_numbers<[1], [0], [0], [1], [0, 0, 1, 1], [], []>} : vector<8x32xf32>, vector<32x32xf32>, vector<8x32xf32> -> vector<8x32xf32>
    %479 = vector.broadcast %5 : vector<1x32xf32> to vector<8x32xf32>
    %480 = arith.addf %478, %479 : vector<8x32xf32>
    %481 = math.tanh %480 : vector<8x32xf32>
    %cst_131 = arith.constant dense<0.000000e+00> : vector<8x32xf32>
    %482 = tpu.matmul %481, %3, %cst_131 {dimension_numbers = #tpu.dot_dimension_numbers<[1], [0], [0], [1], [0, 0, 1, 1], [], []>} : vector<8x32xf32>, vector<32x32xf32>, vector<8x32xf32> -> vector<8x32xf32>
    %483 = vector.broadcast %6 : vector<1x32xf32> to vector<8x32xf32>
    %484 = arith.addf %482, %483 : vector<8x32xf32>
    %485 = math.tanh %484 : vector<8x32xf32>
    %cst_132 = arith.constant dense<0.000000e+00> : vector<8x32xf32>
    %486 = tpu.matmul %485, %4, %cst_132 {dimension_numbers = #tpu.dot_dimension_numbers<[1], [0], [0], [1], [0, 0, 1, 1], [], []>} : vector<8x32xf32>, vector<32x32xf32>, vector<8x32xf32> -> vector<8x32xf32>
    %487 = vector.broadcast %7 : vector<1x32xf32> to vector<8x32xf32>
    %488 = arith.addf %486, %487 : vector<8x32xf32>
    %489 = arith.subf %455, %471 : vector<8x32xf32>
    %490 = arith.addf %489, %488 : vector<8x32xf32>
    %491 = vector.broadcast %444 : f32 to vector<8x32xf32>
    %492 = arith.mulf %491, %490 : vector<8x32xf32>
    %493 = arith.addf %443, %492 : vector<8x32xf32>
    %cst_133 = arith.constant dense<0.000000e+00> : vector<8x32xf32>
    %494 = tpu.matmul %493, %2, %cst_133 {dimension_numbers = #tpu.dot_dimension_numbers<[1], [0], [0], [1], [0, 0, 1, 1], [], []>} : vector<8x32xf32>, vector<32x32xf32>, vector<8x32xf32> -> vector<8x32xf32>
    %495 = vector.broadcast %5 : vector<1x32xf32> to vector<8x32xf32>
    %496 = arith.addf %494, %495 : vector<8x32xf32>
    %497 = math.tanh %496 : vector<8x32xf32>
    %cst_134 = arith.constant dense<0.000000e+00> : vector<8x32xf32>
    %498 = tpu.matmul %497, %3, %cst_134 {dimension_numbers = #tpu.dot_dimension_numbers<[1], [0], [0], [1], [0, 0, 1, 1], [], []>} : vector<8x32xf32>, vector<32x32xf32>, vector<8x32xf32> -> vector<8x32xf32>
    %499 = vector.broadcast %6 : vector<1x32xf32> to vector<8x32xf32>
    %500 = arith.addf %498, %499 : vector<8x32xf32>
    %501 = math.tanh %500 : vector<8x32xf32>
    %cst_135 = arith.constant dense<0.000000e+00> : vector<8x32xf32>
    %502 = tpu.matmul %501, %4, %cst_135 {dimension_numbers = #tpu.dot_dimension_numbers<[1], [0], [0], [1], [0, 0, 1, 1], [], []>} : vector<8x32xf32>, vector<32x32xf32>, vector<8x32xf32> -> vector<8x32xf32>
    %503 = vector.broadcast %7 : vector<1x32xf32> to vector<8x32xf32>
    %504 = arith.addf %502, %503 : vector<8x32xf32>
    %505 = arith.addf %471, %488 : vector<8x32xf32>
    %cst_136 = arith.constant 3.000000e+00 : f32
    %506 = vector.broadcast %cst_136 : f32 to vector<8x32xf32>
    %507 = arith.mulf %506, %505 : vector<8x32xf32>
    %508 = arith.addf %455, %507 : vector<8x32xf32>
    %509 = arith.addf %508, %504 : vector<8x32xf32>
    %510 = vector.broadcast %444 : f32 to vector<8x32xf32>
    %511 = arith.mulf %510, %509 : vector<8x32xf32>
    %cst_137 = arith.constant 1.250000e-01 : f32
    %512 = vector.broadcast %cst_137 : f32 to vector<8x32xf32>
    %513 = arith.mulf %511, %512 : vector<8x32xf32>
    %514 = arith.addf %443, %513 : vector<8x32xf32>
    %515 = vector.extract_strided_slice %13 {offsets = [40, 0], sizes = [8, 96], strides = [1, 1]} : vector<64x96xf32> to vector<8x96xf32>
    %cst_138 = arith.constant dense<0.000000e+00> : vector<8x96xf32>
    %516 = tpu.matmul %514, %0, %cst_138 {dimension_numbers = #tpu.dot_dimension_numbers<[1], [0], [0], [1], [0, 0, 1, 1], [], []>} : vector<8x32xf32>, vector<32x96xf32>, vector<8x96xf32> -> vector<8x96xf32>
    %517 = vector.broadcast %1 : vector<1x96xf32> to vector<8x96xf32>
    %518 = arith.addf %516, %517 : vector<8x96xf32>
    %519 = arith.addf %515, %518 : vector<8x96xf32>
    %520 = vector.extract_strided_slice %519 {offsets = [0, 0], sizes = [8, 32], strides = [1, 1]} : vector<8x96xf32> to vector<8x32xf32>
    %cst_139 = arith.constant 0.000000e+00 : f32
    %521 = vector.broadcast %cst_139 : f32 to vector<8x32xf32>
    %522 = arith.subf %521, %520 : vector<8x32xf32>
    %523 = math.exp %522 : vector<8x32xf32>
    %cst_140 = arith.constant 1.000000e+00 : f32
    %524 = vector.broadcast %cst_140 : f32 to vector<8x32xf32>
    %525 = arith.addf %524, %523 : vector<8x32xf32>
    %cst_141 = arith.constant 1.000000e+00 : f32
    %526 = vector.broadcast %cst_141 : f32 to vector<8x32xf32>
    %527 = arith.divf %526, %525 : vector<8x32xf32>
    %528 = vector.extract_strided_slice %519 {offsets = [0, 32], sizes = [8, 32], strides = [1, 1]} : vector<8x96xf32> to vector<8x32xf32>
    %cst_142 = arith.constant 0.000000e+00 : f32
    %529 = vector.broadcast %cst_142 : f32 to vector<8x32xf32>
    %530 = arith.subf %529, %528 : vector<8x32xf32>
    %531 = math.exp %530 : vector<8x32xf32>
    %cst_143 = arith.constant 1.000000e+00 : f32
    %532 = vector.broadcast %cst_143 : f32 to vector<8x32xf32>
    %533 = arith.addf %532, %531 : vector<8x32xf32>
    %cst_144 = arith.constant 1.000000e+00 : f32
    %534 = vector.broadcast %cst_144 : f32 to vector<8x32xf32>
    %535 = arith.divf %534, %533 : vector<8x32xf32>
    %536 = vector.extract_strided_slice %515 {offsets = [0, 64], sizes = [8, 32], strides = [1, 1]} : vector<8x96xf32> to vector<8x32xf32>
    %537 = vector.extract_strided_slice %518 {offsets = [0, 64], sizes = [8, 32], strides = [1, 1]} : vector<8x96xf32> to vector<8x32xf32>
    %538 = arith.mulf %527, %537 : vector<8x32xf32>
    %539 = arith.addf %536, %538 : vector<8x32xf32>
    %540 = math.tanh %539 : vector<8x32xf32>
    %541 = arith.subf %514, %540 : vector<8x32xf32>
    %542 = arith.mulf %535, %541 : vector<8x32xf32>
    %543 = arith.addf %540, %542 : vector<8x32xf32>
    %c5 = arith.constant 5 : index
    %544 = memref.load %arg1[%c5] : memref<7xf32, #tpu.memory_space<smem>>
    %cst_145 = arith.constant dense<0.000000e+00> : vector<8x32xf32>
    %545 = tpu.matmul %543, %2, %cst_145 {dimension_numbers = #tpu.dot_dimension_numbers<[1], [0], [0], [1], [0, 0, 1, 1], [], []>} : vector<8x32xf32>, vector<32x32xf32>, vector<8x32xf32> -> vector<8x32xf32>
    %546 = vector.broadcast %5 : vector<1x32xf32> to vector<8x32xf32>
    %547 = arith.addf %545, %546 : vector<8x32xf32>
    %548 = math.tanh %547 : vector<8x32xf32>
    %cst_146 = arith.constant dense<0.000000e+00> : vector<8x32xf32>
    %549 = tpu.matmul %548, %3, %cst_146 {dimension_numbers = #tpu.dot_dimension_numbers<[1], [0], [0], [1], [0, 0, 1, 1], [], []>} : vector<8x32xf32>, vector<32x32xf32>, vector<8x32xf32> -> vector<8x32xf32>
    %550 = vector.broadcast %6 : vector<1x32xf32> to vector<8x32xf32>
    %551 = arith.addf %549, %550 : vector<8x32xf32>
    %552 = math.tanh %551 : vector<8x32xf32>
    %cst_147 = arith.constant dense<0.000000e+00> : vector<8x32xf32>
    %553 = tpu.matmul %552, %4, %cst_147 {dimension_numbers = #tpu.dot_dimension_numbers<[1], [0], [0], [1], [0, 0, 1, 1], [], []>} : vector<8x32xf32>, vector<32x32xf32>, vector<8x32xf32> -> vector<8x32xf32>
    %554 = vector.broadcast %7 : vector<1x32xf32> to vector<8x32xf32>
    %555 = arith.addf %553, %554 : vector<8x32xf32>
    %556 = vector.broadcast %544 : f32 to vector<8x32xf32>
    %557 = arith.mulf %556, %555 : vector<8x32xf32>
    %cst_148 = arith.constant 0.333333343 : f32
    %558 = vector.broadcast %cst_148 : f32 to vector<8x32xf32>
    %559 = arith.mulf %557, %558 : vector<8x32xf32>
    %560 = arith.addf %543, %559 : vector<8x32xf32>
    %cst_149 = arith.constant dense<0.000000e+00> : vector<8x32xf32>
    %561 = tpu.matmul %560, %2, %cst_149 {dimension_numbers = #tpu.dot_dimension_numbers<[1], [0], [0], [1], [0, 0, 1, 1], [], []>} : vector<8x32xf32>, vector<32x32xf32>, vector<8x32xf32> -> vector<8x32xf32>
    %562 = vector.broadcast %5 : vector<1x32xf32> to vector<8x32xf32>
    %563 = arith.addf %561, %562 : vector<8x32xf32>
    %564 = math.tanh %563 : vector<8x32xf32>
    %cst_150 = arith.constant dense<0.000000e+00> : vector<8x32xf32>
    %565 = tpu.matmul %564, %3, %cst_150 {dimension_numbers = #tpu.dot_dimension_numbers<[1], [0], [0], [1], [0, 0, 1, 1], [], []>} : vector<8x32xf32>, vector<32x32xf32>, vector<8x32xf32> -> vector<8x32xf32>
    %566 = vector.broadcast %6 : vector<1x32xf32> to vector<8x32xf32>
    %567 = arith.addf %565, %566 : vector<8x32xf32>
    %568 = math.tanh %567 : vector<8x32xf32>
    %cst_151 = arith.constant dense<0.000000e+00> : vector<8x32xf32>
    %569 = tpu.matmul %568, %4, %cst_151 {dimension_numbers = #tpu.dot_dimension_numbers<[1], [0], [0], [1], [0, 0, 1, 1], [], []>} : vector<8x32xf32>, vector<32x32xf32>, vector<8x32xf32> -> vector<8x32xf32>
    %570 = vector.broadcast %7 : vector<1x32xf32> to vector<8x32xf32>
    %571 = arith.addf %569, %570 : vector<8x32xf32>
    %cst_152 = arith.constant 0.333333343 : f32
    %572 = vector.broadcast %cst_152 : f32 to vector<8x32xf32>
    %573 = arith.mulf %555, %572 : vector<8x32xf32>
    %574 = arith.subf %571, %573 : vector<8x32xf32>
    %575 = vector.broadcast %544 : f32 to vector<8x32xf32>
    %576 = arith.mulf %575, %574 : vector<8x32xf32>
    %577 = arith.addf %543, %576 : vector<8x32xf32>
    %cst_153 = arith.constant dense<0.000000e+00> : vector<8x32xf32>
    %578 = tpu.matmul %577, %2, %cst_153 {dimension_numbers = #tpu.dot_dimension_numbers<[1], [0], [0], [1], [0, 0, 1, 1], [], []>} : vector<8x32xf32>, vector<32x32xf32>, vector<8x32xf32> -> vector<8x32xf32>
    %579 = vector.broadcast %5 : vector<1x32xf32> to vector<8x32xf32>
    %580 = arith.addf %578, %579 : vector<8x32xf32>
    %581 = math.tanh %580 : vector<8x32xf32>
    %cst_154 = arith.constant dense<0.000000e+00> : vector<8x32xf32>
    %582 = tpu.matmul %581, %3, %cst_154 {dimension_numbers = #tpu.dot_dimension_numbers<[1], [0], [0], [1], [0, 0, 1, 1], [], []>} : vector<8x32xf32>, vector<32x32xf32>, vector<8x32xf32> -> vector<8x32xf32>
    %583 = vector.broadcast %6 : vector<1x32xf32> to vector<8x32xf32>
    %584 = arith.addf %582, %583 : vector<8x32xf32>
    %585 = math.tanh %584 : vector<8x32xf32>
    %cst_155 = arith.constant dense<0.000000e+00> : vector<8x32xf32>
    %586 = tpu.matmul %585, %4, %cst_155 {dimension_numbers = #tpu.dot_dimension_numbers<[1], [0], [0], [1], [0, 0, 1, 1], [], []>} : vector<8x32xf32>, vector<32x32xf32>, vector<8x32xf32> -> vector<8x32xf32>
    %587 = vector.broadcast %7 : vector<1x32xf32> to vector<8x32xf32>
    %588 = arith.addf %586, %587 : vector<8x32xf32>
    %589 = arith.subf %555, %571 : vector<8x32xf32>
    %590 = arith.addf %589, %588 : vector<8x32xf32>
    %591 = vector.broadcast %544 : f32 to vector<8x32xf32>
    %592 = arith.mulf %591, %590 : vector<8x32xf32>
    %593 = arith.addf %543, %592 : vector<8x32xf32>
    %cst_156 = arith.constant dense<0.000000e+00> : vector<8x32xf32>
    %594 = tpu.matmul %593, %2, %cst_156 {dimension_numbers = #tpu.dot_dimension_numbers<[1], [0], [0], [1], [0, 0, 1, 1], [], []>} : vector<8x32xf32>, vector<32x32xf32>, vector<8x32xf32> -> vector<8x32xf32>
    %595 = vector.broadcast %5 : vector<1x32xf32> to vector<8x32xf32>
    %596 = arith.addf %594, %595 : vector<8x32xf32>
    %597 = math.tanh %596 : vector<8x32xf32>
    %cst_157 = arith.constant dense<0.000000e+00> : vector<8x32xf32>
    %598 = tpu.matmul %597, %3, %cst_157 {dimension_numbers = #tpu.dot_dimension_numbers<[1], [0], [0], [1], [0, 0, 1, 1], [], []>} : vector<8x32xf32>, vector<32x32xf32>, vector<8x32xf32> -> vector<8x32xf32>
    %599 = vector.broadcast %6 : vector<1x32xf32> to vector<8x32xf32>
    %600 = arith.addf %598, %599 : vector<8x32xf32>
    %601 = math.tanh %600 : vector<8x32xf32>
    %cst_158 = arith.constant dense<0.000000e+00> : vector<8x32xf32>
    %602 = tpu.matmul %601, %4, %cst_158 {dimension_numbers = #tpu.dot_dimension_numbers<[1], [0], [0], [1], [0, 0, 1, 1], [], []>} : vector<8x32xf32>, vector<32x32xf32>, vector<8x32xf32> -> vector<8x32xf32>
    %603 = vector.broadcast %7 : vector<1x32xf32> to vector<8x32xf32>
    %604 = arith.addf %602, %603 : vector<8x32xf32>
    %605 = arith.addf %571, %588 : vector<8x32xf32>
    %cst_159 = arith.constant 3.000000e+00 : f32
    %606 = vector.broadcast %cst_159 : f32 to vector<8x32xf32>
    %607 = arith.mulf %606, %605 : vector<8x32xf32>
    %608 = arith.addf %555, %607 : vector<8x32xf32>
    %609 = arith.addf %608, %604 : vector<8x32xf32>
    %610 = vector.broadcast %544 : f32 to vector<8x32xf32>
    %611 = arith.mulf %610, %609 : vector<8x32xf32>
    %cst_160 = arith.constant 1.250000e-01 : f32
    %612 = vector.broadcast %cst_160 : f32 to vector<8x32xf32>
    %613 = arith.mulf %611, %612 : vector<8x32xf32>
    %614 = arith.addf %543, %613 : vector<8x32xf32>
    %615 = vector.extract_strided_slice %13 {offsets = [48, 0], sizes = [8, 96], strides = [1, 1]} : vector<64x96xf32> to vector<8x96xf32>
    %cst_161 = arith.constant dense<0.000000e+00> : vector<8x96xf32>
    %616 = tpu.matmul %614, %0, %cst_161 {dimension_numbers = #tpu.dot_dimension_numbers<[1], [0], [0], [1], [0, 0, 1, 1], [], []>} : vector<8x32xf32>, vector<32x96xf32>, vector<8x96xf32> -> vector<8x96xf32>
    %617 = vector.broadcast %1 : vector<1x96xf32> to vector<8x96xf32>
    %618 = arith.addf %616, %617 : vector<8x96xf32>
    %619 = arith.addf %615, %618 : vector<8x96xf32>
    %620 = vector.extract_strided_slice %619 {offsets = [0, 0], sizes = [8, 32], strides = [1, 1]} : vector<8x96xf32> to vector<8x32xf32>
    %cst_162 = arith.constant 0.000000e+00 : f32
    %621 = vector.broadcast %cst_162 : f32 to vector<8x32xf32>
    %622 = arith.subf %621, %620 : vector<8x32xf32>
    %623 = math.exp %622 : vector<8x32xf32>
    %cst_163 = arith.constant 1.000000e+00 : f32
    %624 = vector.broadcast %cst_163 : f32 to vector<8x32xf32>
    %625 = arith.addf %624, %623 : vector<8x32xf32>
    %cst_164 = arith.constant 1.000000e+00 : f32
    %626 = vector.broadcast %cst_164 : f32 to vector<8x32xf32>
    %627 = arith.divf %626, %625 : vector<8x32xf32>
    %628 = vector.extract_strided_slice %619 {offsets = [0, 32], sizes = [8, 32], strides = [1, 1]} : vector<8x96xf32> to vector<8x32xf32>
    %cst_165 = arith.constant 0.000000e+00 : f32
    %629 = vector.broadcast %cst_165 : f32 to vector<8x32xf32>
    %630 = arith.subf %629, %628 : vector<8x32xf32>
    %631 = math.exp %630 : vector<8x32xf32>
    %cst_166 = arith.constant 1.000000e+00 : f32
    %632 = vector.broadcast %cst_166 : f32 to vector<8x32xf32>
    %633 = arith.addf %632, %631 : vector<8x32xf32>
    %cst_167 = arith.constant 1.000000e+00 : f32
    %634 = vector.broadcast %cst_167 : f32 to vector<8x32xf32>
    %635 = arith.divf %634, %633 : vector<8x32xf32>
    %636 = vector.extract_strided_slice %615 {offsets = [0, 64], sizes = [8, 32], strides = [1, 1]} : vector<8x96xf32> to vector<8x32xf32>
    %637 = vector.extract_strided_slice %618 {offsets = [0, 64], sizes = [8, 32], strides = [1, 1]} : vector<8x96xf32> to vector<8x32xf32>
    %638 = arith.mulf %627, %637 : vector<8x32xf32>
    %639 = arith.addf %636, %638 : vector<8x32xf32>
    %640 = math.tanh %639 : vector<8x32xf32>
    %641 = arith.subf %614, %640 : vector<8x32xf32>
    %642 = arith.mulf %635, %641 : vector<8x32xf32>
    %643 = arith.addf %640, %642 : vector<8x32xf32>
    %c6 = arith.constant 6 : index
    %644 = memref.load %arg1[%c6] : memref<7xf32, #tpu.memory_space<smem>>
    %cst_168 = arith.constant dense<0.000000e+00> : vector<8x32xf32>
    %645 = tpu.matmul %643, %2, %cst_168 {dimension_numbers = #tpu.dot_dimension_numbers<[1], [0], [0], [1], [0, 0, 1, 1], [], []>} : vector<8x32xf32>, vector<32x32xf32>, vector<8x32xf32> -> vector<8x32xf32>
    %646 = vector.broadcast %5 : vector<1x32xf32> to vector<8x32xf32>
    %647 = arith.addf %645, %646 : vector<8x32xf32>
    %648 = math.tanh %647 : vector<8x32xf32>
    %cst_169 = arith.constant dense<0.000000e+00> : vector<8x32xf32>
    %649 = tpu.matmul %648, %3, %cst_169 {dimension_numbers = #tpu.dot_dimension_numbers<[1], [0], [0], [1], [0, 0, 1, 1], [], []>} : vector<8x32xf32>, vector<32x32xf32>, vector<8x32xf32> -> vector<8x32xf32>
    %650 = vector.broadcast %6 : vector<1x32xf32> to vector<8x32xf32>
    %651 = arith.addf %649, %650 : vector<8x32xf32>
    %652 = math.tanh %651 : vector<8x32xf32>
    %cst_170 = arith.constant dense<0.000000e+00> : vector<8x32xf32>
    %653 = tpu.matmul %652, %4, %cst_170 {dimension_numbers = #tpu.dot_dimension_numbers<[1], [0], [0], [1], [0, 0, 1, 1], [], []>} : vector<8x32xf32>, vector<32x32xf32>, vector<8x32xf32> -> vector<8x32xf32>
    %654 = vector.broadcast %7 : vector<1x32xf32> to vector<8x32xf32>
    %655 = arith.addf %653, %654 : vector<8x32xf32>
    %656 = vector.broadcast %644 : f32 to vector<8x32xf32>
    %657 = arith.mulf %656, %655 : vector<8x32xf32>
    %cst_171 = arith.constant 0.333333343 : f32
    %658 = vector.broadcast %cst_171 : f32 to vector<8x32xf32>
    %659 = arith.mulf %657, %658 : vector<8x32xf32>
    %660 = arith.addf %643, %659 : vector<8x32xf32>
    %cst_172 = arith.constant dense<0.000000e+00> : vector<8x32xf32>
    %661 = tpu.matmul %660, %2, %cst_172 {dimension_numbers = #tpu.dot_dimension_numbers<[1], [0], [0], [1], [0, 0, 1, 1], [], []>} : vector<8x32xf32>, vector<32x32xf32>, vector<8x32xf32> -> vector<8x32xf32>
    %662 = vector.broadcast %5 : vector<1x32xf32> to vector<8x32xf32>
    %663 = arith.addf %661, %662 : vector<8x32xf32>
    %664 = math.tanh %663 : vector<8x32xf32>
    %cst_173 = arith.constant dense<0.000000e+00> : vector<8x32xf32>
    %665 = tpu.matmul %664, %3, %cst_173 {dimension_numbers = #tpu.dot_dimension_numbers<[1], [0], [0], [1], [0, 0, 1, 1], [], []>} : vector<8x32xf32>, vector<32x32xf32>, vector<8x32xf32> -> vector<8x32xf32>
    %666 = vector.broadcast %6 : vector<1x32xf32> to vector<8x32xf32>
    %667 = arith.addf %665, %666 : vector<8x32xf32>
    %668 = math.tanh %667 : vector<8x32xf32>
    %cst_174 = arith.constant dense<0.000000e+00> : vector<8x32xf32>
    %669 = tpu.matmul %668, %4, %cst_174 {dimension_numbers = #tpu.dot_dimension_numbers<[1], [0], [0], [1], [0, 0, 1, 1], [], []>} : vector<8x32xf32>, vector<32x32xf32>, vector<8x32xf32> -> vector<8x32xf32>
    %670 = vector.broadcast %7 : vector<1x32xf32> to vector<8x32xf32>
    %671 = arith.addf %669, %670 : vector<8x32xf32>
    %cst_175 = arith.constant 0.333333343 : f32
    %672 = vector.broadcast %cst_175 : f32 to vector<8x32xf32>
    %673 = arith.mulf %655, %672 : vector<8x32xf32>
    %674 = arith.subf %671, %673 : vector<8x32xf32>
    %675 = vector.broadcast %644 : f32 to vector<8x32xf32>
    %676 = arith.mulf %675, %674 : vector<8x32xf32>
    %677 = arith.addf %643, %676 : vector<8x32xf32>
    %cst_176 = arith.constant dense<0.000000e+00> : vector<8x32xf32>
    %678 = tpu.matmul %677, %2, %cst_176 {dimension_numbers = #tpu.dot_dimension_numbers<[1], [0], [0], [1], [0, 0, 1, 1], [], []>} : vector<8x32xf32>, vector<32x32xf32>, vector<8x32xf32> -> vector<8x32xf32>
    %679 = vector.broadcast %5 : vector<1x32xf32> to vector<8x32xf32>
    %680 = arith.addf %678, %679 : vector<8x32xf32>
    %681 = math.tanh %680 : vector<8x32xf32>
    %cst_177 = arith.constant dense<0.000000e+00> : vector<8x32xf32>
    %682 = tpu.matmul %681, %3, %cst_177 {dimension_numbers = #tpu.dot_dimension_numbers<[1], [0], [0], [1], [0, 0, 1, 1], [], []>} : vector<8x32xf32>, vector<32x32xf32>, vector<8x32xf32> -> vector<8x32xf32>
    %683 = vector.broadcast %6 : vector<1x32xf32> to vector<8x32xf32>
    %684 = arith.addf %682, %683 : vector<8x32xf32>
    %685 = math.tanh %684 : vector<8x32xf32>
    %cst_178 = arith.constant dense<0.000000e+00> : vector<8x32xf32>
    %686 = tpu.matmul %685, %4, %cst_178 {dimension_numbers = #tpu.dot_dimension_numbers<[1], [0], [0], [1], [0, 0, 1, 1], [], []>} : vector<8x32xf32>, vector<32x32xf32>, vector<8x32xf32> -> vector<8x32xf32>
    %687 = vector.broadcast %7 : vector<1x32xf32> to vector<8x32xf32>
    %688 = arith.addf %686, %687 : vector<8x32xf32>
    %689 = arith.subf %655, %671 : vector<8x32xf32>
    %690 = arith.addf %689, %688 : vector<8x32xf32>
    %691 = vector.broadcast %644 : f32 to vector<8x32xf32>
    %692 = arith.mulf %691, %690 : vector<8x32xf32>
    %693 = arith.addf %643, %692 : vector<8x32xf32>
    %cst_179 = arith.constant dense<0.000000e+00> : vector<8x32xf32>
    %694 = tpu.matmul %693, %2, %cst_179 {dimension_numbers = #tpu.dot_dimension_numbers<[1], [0], [0], [1], [0, 0, 1, 1], [], []>} : vector<8x32xf32>, vector<32x32xf32>, vector<8x32xf32> -> vector<8x32xf32>
    %695 = vector.broadcast %5 : vector<1x32xf32> to vector<8x32xf32>
    %696 = arith.addf %694, %695 : vector<8x32xf32>
    %697 = math.tanh %696 : vector<8x32xf32>
    %cst_180 = arith.constant dense<0.000000e+00> : vector<8x32xf32>
    %698 = tpu.matmul %697, %3, %cst_180 {dimension_numbers = #tpu.dot_dimension_numbers<[1], [0], [0], [1], [0, 0, 1, 1], [], []>} : vector<8x32xf32>, vector<32x32xf32>, vector<8x32xf32> -> vector<8x32xf32>
    %699 = vector.broadcast %6 : vector<1x32xf32> to vector<8x32xf32>
    %700 = arith.addf %698, %699 : vector<8x32xf32>
    %701 = math.tanh %700 : vector<8x32xf32>
    %cst_181 = arith.constant dense<0.000000e+00> : vector<8x32xf32>
    %702 = tpu.matmul %701, %4, %cst_181 {dimension_numbers = #tpu.dot_dimension_numbers<[1], [0], [0], [1], [0, 0, 1, 1], [], []>} : vector<8x32xf32>, vector<32x32xf32>, vector<8x32xf32> -> vector<8x32xf32>
    %703 = vector.broadcast %7 : vector<1x32xf32> to vector<8x32xf32>
    %704 = arith.addf %702, %703 : vector<8x32xf32>
    %705 = arith.addf %671, %688 : vector<8x32xf32>
    %cst_182 = arith.constant 3.000000e+00 : f32
    %706 = vector.broadcast %cst_182 : f32 to vector<8x32xf32>
    %707 = arith.mulf %706, %705 : vector<8x32xf32>
    %708 = arith.addf %655, %707 : vector<8x32xf32>
    %709 = arith.addf %708, %704 : vector<8x32xf32>
    %710 = vector.broadcast %644 : f32 to vector<8x32xf32>
    %711 = arith.mulf %710, %709 : vector<8x32xf32>
    %cst_183 = arith.constant 1.250000e-01 : f32
    %712 = vector.broadcast %cst_183 : f32 to vector<8x32xf32>
    %713 = arith.mulf %711, %712 : vector<8x32xf32>
    %714 = arith.addf %643, %713 : vector<8x32xf32>
    %715 = vector.extract_strided_slice %13 {offsets = [56, 0], sizes = [8, 96], strides = [1, 1]} : vector<64x96xf32> to vector<8x96xf32>
    %cst_184 = arith.constant dense<0.000000e+00> : vector<8x96xf32>
    %716 = tpu.matmul %714, %0, %cst_184 {dimension_numbers = #tpu.dot_dimension_numbers<[1], [0], [0], [1], [0, 0, 1, 1], [], []>} : vector<8x32xf32>, vector<32x96xf32>, vector<8x96xf32> -> vector<8x96xf32>
    %717 = vector.broadcast %1 : vector<1x96xf32> to vector<8x96xf32>
    %718 = arith.addf %716, %717 : vector<8x96xf32>
    %719 = arith.addf %715, %718 : vector<8x96xf32>
    %720 = vector.extract_strided_slice %719 {offsets = [0, 0], sizes = [8, 32], strides = [1, 1]} : vector<8x96xf32> to vector<8x32xf32>
    %cst_185 = arith.constant 0.000000e+00 : f32
    %721 = vector.broadcast %cst_185 : f32 to vector<8x32xf32>
    %722 = arith.subf %721, %720 : vector<8x32xf32>
    %723 = math.exp %722 : vector<8x32xf32>
    %cst_186 = arith.constant 1.000000e+00 : f32
    %724 = vector.broadcast %cst_186 : f32 to vector<8x32xf32>
    %725 = arith.addf %724, %723 : vector<8x32xf32>
    %cst_187 = arith.constant 1.000000e+00 : f32
    %726 = vector.broadcast %cst_187 : f32 to vector<8x32xf32>
    %727 = arith.divf %726, %725 : vector<8x32xf32>
    %728 = vector.extract_strided_slice %719 {offsets = [0, 32], sizes = [8, 32], strides = [1, 1]} : vector<8x96xf32> to vector<8x32xf32>
    %cst_188 = arith.constant 0.000000e+00 : f32
    %729 = vector.broadcast %cst_188 : f32 to vector<8x32xf32>
    %730 = arith.subf %729, %728 : vector<8x32xf32>
    %731 = math.exp %730 : vector<8x32xf32>
    %cst_189 = arith.constant 1.000000e+00 : f32
    %732 = vector.broadcast %cst_189 : f32 to vector<8x32xf32>
    %733 = arith.addf %732, %731 : vector<8x32xf32>
    %cst_190 = arith.constant 1.000000e+00 : f32
    %734 = vector.broadcast %cst_190 : f32 to vector<8x32xf32>
    %735 = arith.divf %734, %733 : vector<8x32xf32>
    %736 = vector.extract_strided_slice %715 {offsets = [0, 64], sizes = [8, 32], strides = [1, 1]} : vector<8x96xf32> to vector<8x32xf32>
    %737 = vector.extract_strided_slice %718 {offsets = [0, 64], sizes = [8, 32], strides = [1, 1]} : vector<8x96xf32> to vector<8x32xf32>
    %738 = arith.mulf %727, %737 : vector<8x32xf32>
    %739 = arith.addf %736, %738 : vector<8x32xf32>
    %740 = math.tanh %739 : vector<8x32xf32>
    %741 = arith.subf %714, %740 : vector<8x32xf32>
    %742 = arith.mulf %735, %741 : vector<8x32xf32>
    %743 = arith.addf %740, %742 : vector<8x32xf32>
    %c0_191 = arith.constant 0 : index
    %c0_192 = arith.constant 0 : index
    %744 = vector.load %arg12[%c0_191, %c0_192] : memref<32x8xf32, #tpu.memory_space<vmem>>, vector<32x8xf32>
    %cst_193 = arith.constant dense<0.000000e+00> : vector<8x8xf32>
    %745 = tpu.matmul %743, %744, %cst_193 {dimension_numbers = #tpu.dot_dimension_numbers<[1], [0], [0], [1], [0, 0, 1, 1], [], []>} : vector<8x32xf32>, vector<32x8xf32>, vector<8x8xf32> -> vector<8x8xf32>
    %c0_194 = arith.constant 0 : index
    %c0_195 = arith.constant 0 : index
    %746 = vector.load %arg13[%c0_194, %c0_195] : memref<1x8xf32, #tpu.memory_space<vmem>>, vector<1x8xf32>
    %747 = vector.broadcast %746 : vector<1x8xf32> to vector<8x8xf32>
    %748 = arith.addf %745, %747 : vector<8x8xf32>
    %cst_196 = arith.constant dense<0xFF800000> : vector<8xf32>
    %749 = vector.multi_reduction <maximumf>, %748, %cst_196 [1] : vector<8x8xf32> to vector<8xf32>
    %750 = vector.shape_cast %749 : vector<8xf32> to vector<8x1xf32>
    %751 = vector.broadcast %750 : vector<8x1xf32> to vector<8x8xf32>
    %752 = arith.subf %748, %751 : vector<8x8xf32>
    %753 = math.exp %752 : vector<8x8xf32>
    %cst_197 = arith.constant dense<0.000000e+00> : vector<8xf32>
    %754 = vector.multi_reduction <add>, %753, %cst_197 [1] : vector<8x8xf32> to vector<8xf32>
    %755 = vector.shape_cast %754 : vector<8xf32> to vector<8x1xf32>
    %756 = vector.broadcast %755 : vector<8x1xf32> to vector<8x8xf32>
    %757 = arith.divf %753, %756 : vector<8x8xf32>
    %c0_198 = arith.constant 0 : index
    %c0_199 = arith.constant 0 : index
    %758 = vector.load %arg14[%c0_198, %c0_199] : memref<8x8xf32, #tpu.memory_space<vmem>>, vector<8x8xf32>
    tpu.vector_store %arg14[%c0_198, %c0_199], %757 {strides = array<i32>} : memref<8x8xf32, #tpu.memory_space<vmem>>, vector<8x8xf32>,
    return
  }
}

</mosaic_0001>

<bundles_post_ra>
// kernel: odernn_forward_pallas.1
= control target key start
LH: loop header
LB: loop body
LE: loop exit
PB: predicated region body
PF: predicated region fallthrough
CT: control target
= control target key end

     0   :  { %19 = vsyncpa [#allocation5], 0  ;;  %s4737_s0 = inlined_call_operand.vmem [shape: f32[64,4], index: 0, kind: input, shape index: {}]   ;;  %s4738_s1 = inlined_call_operand.vmem [shape: f32[7], index: 1, kind: input, shape index: {}]   ;;  %s4739_s2 = inlined_call_operand.vmem [shape: f32[4,96], index: 2, kind: input, shape index: {}]   ;;  %s4740_s3 = inlined_call_operand.vmem [shape: f32[1,96], index: 3, kind: input, shape index: {}]   ;;  %s4741_s4 = inlined_call_operand.vmem [shape: f32[32,96], index: 4, kind: input, shape index: {}]   ;;  %s4742_s5 = inlined_call_operand.vmem [shape: f32[1,96], index: 5, kind: input, shape index: {}]   ;;  %s4743_s6 = inlined_call_operand.vmem [shape: f32[32,32], index: 6, kind: input, shape index: {}]   ;;  %s4744_s7 = inlined_call_operand.vmem [shape: f32[1,32], index: 7, kind: input, shape index: {}]   ;;  %s4745_s8 = inlined_call_operand.vmem [shape: f32[32,32], index: 8, kind: input, shape index: {}]   ;;  %s4746_s9 = inlined_call_operand.vmem [shape: f32[1,32], index: 9, kind: input, shape index: {}]   ;;  %s4747_s10 = inlined_call_operand.hbm [shape: f32[32,32], index: 10, kind: input, shape index: {}]   ;;  %s4748_s11 = inlined_call_operand.vmem [shape: f32[1,32], index: 11, kind: input, shape index: {}]   ;;  %s4749_s12 = inlined_call_operand.vmem [shape: f32[32,8], index: 12, kind: input, shape index: {}]   ;;  %s4750_s13 = inlined_call_operand.vmem [shape: f32[1,8], index: 13, kind: input, shape index: {}]   ;;  %s4751_s14 = inlined_call_operand.hbm [shape: f32[8,8], index: 14, kind: output, shape index: {}]  }
   0x1   :  { %20 = vsyncpa [#allocation3], 0 }
   0x2   :  { %21 = vsyncpa [#allocation4], 0  ;;  %s29_s15 = sshll.u32 %s4738_s1, 4  ;;  %s53_s18 = sshll.u32 %s4747_s10, 4  ;;  %s30_s15 = int_to_ptr.vmem [resolvable:$true] %s29_s15  ;;  %s54_s18 = int_to_ptr.hbm [resolvable:$true] %s53_s18 }
   0x3   :  { %s3494_s19 = smov [#allocation2]   ;;  %s3495_s20 = smov [#allocation6]  }
   0x4   :  { %32 = dma.vmem_to_smem %s30_s15, 16, %s3494_s19, [#allocation5]  }
   0x5   :  { %s55_s21 = sshll.u32 %s3495_s20, 4  ;;  %s3496_s22 = smov 128   ;;  %s56_s21 = int_to_ptr.vmem [resolvable:$true] %s55_s21 }
   0x6   :  { %s3497_s23 = smov 8  }
   0x7   :  { %61 = dma.hbm_to_vmem [thread:$0]  %s54_s18, 512, %s56_s21, [#allocation3], %s3496_s22, %s3496_s22, %s3497_s23  }
   0x8   :  { %3488 = dma.done.wait [#allocation5], 16  }
   0x9   :  { %3489 = vsyncadd [#allocation5], 4294967280 }
   0xa   :  { %3490 = dma.done.wait [#allocation3], 512  }
   0xb   :  { %3491 = vsyncadd [#allocation3], 4294966784 }
   0xc   :  { %76 = sfence }
   0xd   :  { %v3587_v0 = vld [vmem:[%s4741_s4 + $0x18] sm:$0xff]  ;;  %v3592_v1 = vld [vmem:[%s4741_s4 + $0x10] sm:$0xff]  ;;  %vm135_vm0 = vcmask 1043456   ;;  %vm110_vm1 = vcmask 31744   ;;  %v105_v2 = vld [vmem:[%s4739_s2] sm:$0xf] }
   0xe   :  { %199 = vmatpush.msra.mxu1 %v3587_v0  ;;  %v97_v3 = vld [vmem:[%s4737_s0] sm:$0xff]  ;;  %v3604_v4 = vld [vmem:[%s4741_s4 + $0x8] sm:$0xff]  ;;  %3100 = vmatpush.msk.msra.mxu0 %vm135_vm0, %v105_v2  ;;  %v3498_v6 = vmov 0.0   ;;  %s3499_s19 = smov 64   ;;  %s3500_s22 = smov 96   ;;  %v3634_v36 = vld [vmem:[%s4743_s6 + $0x18] sm:$0xff] }
   0xf   :  { %3101 = vmatmul.msk.f32.vlgmr.msra.gmra.mxu0 %vm110_vm1, %v97_v3  ;;  %v3611_v5 = vld [vmem:[%s4741_s4] sm:$0xff]  ;;  %s3501_s23 = smov 32   ;;  %v3639_v37 = vld [vmem:[%s4743_s6 + $0x10] sm:$0xff]  ;;  %270 = vmatpush.msra.mxu2 %v3634_v36  ;;  %v3645_v38 = vld [vmem:[%s4743_s6 + $0x8] sm:$0xff]  ;;  %vm183_vm6 = vcmask 261120   ;;  %s249_s26 = sld [smem:[#allocation2]] }
  0x10   :  { %200 = vmatpush.msra.mxu1 %v3592_v1  ;;  %v3618_v7 = vld [vmem:[%s4742_s5] ss:$0 sm:$0xff]  ;;  %v3671_v43 = vld [vmem:[%s4745_s8 + $0x18] sm:$0xff]  ;;  %v3677_v44 = vld [vmem:[%s4745_s8 + $0x10] sm:$0xff]  ;;  %s3122_s15 = sld [smem:[#allocation2 + $0x1]] }
  0x11   :  { %v3625_v10 = vld [vmem:[%s4740_s3] ss:$0 sm:$0xff]  ;;  %271 = vmatpush.msra.mxu2 %v3639_v37  ;;  %297 = vmatpush.msra.mxu3 %v3671_v43  ;;  %v3683_v45 = vld [vmem:[%s4745_s8 + $0x8] sm:$0xff]  ;;  %v3715_v51 = vld [vmem:[#allocation6 + $0x18] sm:$0xff]  ;;  %s3150_s27 = sld [smem:[#allocation2 + $0x3]] }
  0x12   :  { %201 = vmatpush.msra.mxu1 %v3604_v4  ;;  %v3651_v39 = vld [vmem:[%s4743_s6] sm:$0xff]  ;;  %938 = vmatpush.msrb.mxu0 %v3671_v43  ;;  %v3718_v52 = vld [vmem:[#allocation6 + $0x10] sm:$0xff]  ;;  %v3720_v53 = vld [vmem:[#allocation6 + $0x8] sm:$0xff]  ;;  %s3164_s29 = sld [smem:[#allocation2 + $0x4]] }
  0x13   :  { %272 = vmatpush.msra.mxu2 %v3645_v38  ;;  %298 = vmatpush.msra.mxu3 %v3677_v44  ;;  %v3690_v46 = vld [vmem:[%s4745_s8] sm:$0xff]  ;;  %s3178_s30 = sld [smem:[#allocation2 + $0x5]] }
  0x14   :  { %202 = vmatpush.msra.mxu1 %v3611_v5  ;;  %939 = vmatpush.msrb.mxu0 %v3677_v44  ;;  %v3707_v47 = vld [vmem:[%s4744_s7] ss:$0 sm:$0xff] }
  0x15   :  { %203 = vmatmul.f32.vlgmr.msra.gmra.mxu1 %v3498_v6  ;;  %273 = vmatpush.msra.mxu2 %v3651_v39  ;;  %v3723_v54 = vld [vmem:[#allocation6] sm:$0xff]  ;;  %v3747_v61 = vstv %s249_s26 }
  0x16   :  { %299 = vmatpush.msra.mxu3 %v3683_v45  ;;  %940 = vmatpush.msrb.mxu0 %v3683_v45  ;;  %v3734_v55 = vld [vmem:[%s4746_s9] ss:$0 sm:$0xff] }
  0x17   :  { %357 = vmatpush.msrb.mxu2 %v3634_v36  ;;  %324 = vmatpush.msrb.mxu1 %v3715_v51  ;;  %v3745_v59 = vld [vmem:[%s4748_s11] ss:$0 sm:$0xff] }
  0x18   :  { %300 = vmatpush.msra.mxu3 %v3690_v46  ;;  %941 = vmatpush.msrb.mxu0 %v3690_v46 }
  0x19   :  { %358 = vmatpush.msrb.mxu2 %v3639_v37  ;;  %325 = vmatpush.msrb.mxu1 %v3718_v52 }
  0x1a   :  { %381 = vmatpush.msrb.mxu3 %v3671_v43  ;;  %1090 = vmatpush.msra.mxu0 %v3671_v43 }
  0x1b   :  { %359 = vmatpush.msrb.mxu2 %v3645_v38  ;;  %326 = vmatpush.msrb.mxu1 %v3720_v53 }
  0x1c   :  { %382 = vmatpush.msrb.mxu3 %v3677_v44  ;;  %1091 = vmatpush.msra.mxu0 %v3677_v44 }
  0x1d   :  { %360 = vmatpush.msrb.mxu2 %v3651_v39  ;;  %327 = vmatpush.msrb.mxu1 %v3723_v54 }
  0x1e   :  { %383 = vmatpush.msrb.mxu3 %v3683_v45  ;;  %1092 = vmatpush.msra.mxu0 %v3683_v45 }
  0x1f   :  { %405 = vmatpush.msra.mxu1 %v3715_v51 }
  0x20   :  { %384 = vmatpush.msrb.mxu3 %v3690_v46  ;;  %1093 = vmatpush.msra.mxu0 %v3690_v46 }
  0x21   :  { %406 = vmatpush.msra.mxu1 %v3718_v52 }
  0x23   :  { %407 = vmatpush.msra.mxu1 %v3720_v53 }
  0x25   :  { %408 = vmatpush.msra.mxu1 %v3723_v54 }
  0x8c   :  { %v156_v11 = vpop.f32.mrf.mxu0 }
  0x8d   :  { %v157_v12 = vadd.f32 %v3625_v10, %v156_v11 }
  0x92   :  { %v204_v8 = vpop.f32.mrf.mxu1 }
  0x93   :  { %v205_v9 = vadd.f32 %v3618_v7, %v204_v8 }
  0x95   :  { %228 = vrot.lane.b32.xlu0 %v205_v9, %s3499_s19  ;;  %v207_v13 = vadd.f32 %v205_v9, %v157_v12 }
  0x97   :  { %v208_v14 = vsub.f32 0.0, %v207_v13 }
  0x99   :  { %v209_v15 = vmul.f32 1.442695, %v208_v14 }
  0x9b   :  { %3222 = vpow2.f32 %v209_v15 }
  0xa1   :  { %v3223_v16 = vpop.eup %3222 }
  0xa2   :  { %v211_v17 = vadd.f32 1.0, %v3223_v16 }
  0xa4   :  { %3224 = vrcp.f32 %v211_v17  ;;  %v223_v23 = vand.u32 2147483648, %v211_v17  ;;  %vm217_vm3 = vweird.f32 %v211_v17  ;;  %v221_v24 = vand.u32 2147483647, %v211_v17 }
  0xa6   :  { %v224_v26 = vor.u32 1.1754944e-38, %v223_v23  ;;  %vm222_vm5 = vcmp.eq.f32.partialorder %v221_v24, 8.507059e+37 }
  0xaa   :  { %v3225_v18 = vpop.eup %3224 }
  0xab   :  { %v213_v19 = vmul.f32 %v3225_v18, %v211_v17  ;;  %vm218_vm2 = vweird.f32 %v3225_v18 }
  0xac   :  { %vm219_vm4 = vmor %vm217_vm3, %vm218_vm2 }
  0xad   :  { %v214_v20 = vsub.f32 1.0, %v213_v19 }
  0xaf   :  { %v215_v21 = vmul.f32 %v3225_v18, %v214_v20 }
  0xb1   :  { %v216_v22 = vadd.f32 %v3225_v18, %v215_v21 }
  0xb3   :  { %v220_v25 = vsel %vm219_vm4, %v3225_v18, %v216_v22 }
  0xb4   :  { %v225_v28 = vsel %vm222_vm5, %v224_v26, %v220_v25 }
 0x107   :  { %v229_v27 = vpop.permute.xlu0 %228 }
 0x108   :  { %v231_v29 = vmul.f32 %v229_v27, %v225_v28 }
 0x10a   :  { %233 = vrot.lane.b32.xlu0 %v231_v29, %s3499_s19 }
 0x17c   :  { %v234_v30 = vpop.permute.xlu0 %233 }
 0x17d   :  { %v236_v31 = vadd.f32 %v234_v30, %v157_v12 }
 0x17f   :  { %3226 = vtanh.f32 %v236_v31 }
 0x185   :  { %v3227_v32 = vpop.eup %3226 }
 0x186   :  { %v238_v33 = vsub.f32 0.0, %v3227_v32 }
 0x188   :  { %240 = vrot.lane.b32.xlu1 %v238_v33, %s3500_s22 }
 0x1fa   :  { %v241_v34 = vpop.permute.xlu1 %240 }
 0x1fb   :  { %v243_v35 = vmul.f32 %v241_v34, %v225_v28 }
 0x1fd   :  { %245 = vrot.lane.b32.xlu1 %v243_v35, %s3501_s23 }
 0x26f   :  { %v246_v40 = vpop.permute.xlu1 %245 }
 0x270   :  { %v3659_v41 = vadd.f32 %v3227_v32, %v246_v40 }
 0x272   :  { %254 = vrot.lane.b32.xlu2 %v3659_v41, %s3499_s19 }
 0x2cc   :  { %v255_v42 = vpop.permute.xlu2 %254 }
 0x2cd   :  { %3109 = vmatmul.msk.f32.vlgmr.msra.gmra.mxu2 %vm183_vm6, %v255_v42 }
 0x2ce   :  { %438 = vmatpush.msra.mxu2 %v3634_v36 }
 0x2d0   :  { %439 = vmatpush.msra.mxu2 %v3639_v37 }
 0x2d2   :  { %440 = vmatpush.msra.mxu2 %v3645_v38 }
 0x2d4   :  { %441 = vmatpush.msra.mxu2 %v3651_v39 }
 0x350   :  { %v275_v48 = vpop.f32.mrf.mxu2 }
 0x351   :  { %v276_v49 = vadd.f32 %v3707_v47, %v275_v48 }
 0x353   :  { %3228 = vtanh.f32 %v276_v49 }
 0x359   :  { %v3229_v50 = vpop.eup %3228 }
 0x35a   :  { %3110 = vmatmul.msk.f32.vlgmr.msra.gmra.mxu3 %vm183_vm6, %v3229_v50 }
 0x35b   :  { %462 = vmatpush.msra.mxu3 %v3671_v43 }
 0x35d   :  { %463 = vmatpush.msra.mxu3 %v3677_v44 }
 0x35f   :  { %464 = vmatpush.msra.mxu3 %v3683_v45 }
 0x361   :  { %465 = vmatpush.msra.mxu3 %v3690_v46 }
 0x3dd   :  { %v302_v56 = vpop.f32.mrf.mxu3 }
 0x3de   :  { %v303_v57 = vadd.f32 %v3734_v55, %v302_v56 }
 0x3e0   :  { %3230 = vtanh.f32 %v303_v57 }
 0x3e6   :  { %v3231_v58 = vpop.eup %3230 }
 0x3e7   :  { %3111 = vmatmul.msk.f32.vlgmr.msrb.gmra.mxu1 %vm183_vm6, %v3231_v58 }
 0x3e8   :  { %486 = vmatpush.msrb.mxu1 %v3715_v51 }
 0x3ea   :  { %487 = vmatpush.msrb.mxu1 %v3718_v52 }
 0x3ec   :  { %488 = vmatpush.msrb.mxu1 %v3720_v53 }
 0x3ee   :  { %489 = vmatpush.msrb.mxu1 %v3723_v54 }
 0x464   :  { %v329_v60 = vpop.f32.mrf.mxu1 }
 0x465   :  { %v3750_v62 = vadd.f32 %v3745_v59, %v329_v60 }
 0x467   :  { %v333_v63 = vmul.f32 %v3747_v61, %v3750_v62  ;;  %v413_v18 = vmul.f32 0.33333334, %v3750_v62 }
 0x469   :  { %v334_v2 = vmul.f32 0.33333334, %v333_v63 }
 0x46b   :  { %336 = vrot.lane.b32.xlu2 %v334_v2, %s3499_s19 }
 0x4c5   :  { %v337_v3 = vpop.permute.xlu2 %336 }
 0x4c6   :  { %v339_v6 = vadd.f32 %v337_v3, %v3659_v41 }
 0x4c8   :  { %341 = vrot.lane.b32.xlu0 %v339_v6, %s3499_s19 }
 0x53a   :  { %v342_v8 = vpop.permute.xlu0 %341 }
 0x53b   :  { %3112 = vmatmul.msk.f32.vlgmr.msrb.gmra.mxu2 %vm183_vm6, %v342_v8 }
 0x53c   :  { %519 = vmatpush.msrb.mxu2 %v3634_v36 }
 0x53e   :  { %520 = vmatpush.msrb.mxu2 %v3639_v37 }
 0x540   :  { %521 = vmatpush.msrb.mxu2 %v3645_v38 }
 0x542   :  { %522 = vmatpush.msrb.mxu2 %v3651_v39 }
 0x5be   :  { %v362_v9 = vpop.f32.mrf.mxu2 }
 0x5bf   :  { %v363_v11 = vadd.f32 %v3707_v47, %v362_v9 }
 0x5c1   :  { %3232 = vtanh.f32 %v363_v11 }
 0x5c7   :  { %v3233_v12 = vpop.eup %3232 }
 0x5c8   :  { %3113 = vmatmul.msk.f32.vlgmr.msrb.gmra.mxu3 %vm183_vm6, %v3233_v12 }
 0x5c9   :  { %543 = vmatpush.msrb.mxu3 %v3671_v43 }
 0x5cb   :  { %544 = vmatpush.msrb.mxu3 %v3677_v44 }
 0x5cd   :  { %545 = vmatpush.msrb.mxu3 %v3683_v45 }
 0x5cf   :  { %546 = vmatpush.msrb.mxu3 %v3690_v46 }
 0x64b   :  { %v386_v13 = vpop.f32.mrf.mxu3 }
 0x64c   :  { %v387_v14 = vadd.f32 %v3734_v55, %v386_v13 }
 0x64e   :  { %3234 = vtanh.f32 %v387_v14  ;;  %v98_v14 = vld [vmem:[%s4737_s0 + $0x8] sm:$0xff] }
 0x64f   :  { %3102 = vmatmul.msk.f32.gmra.mxu0 %vm110_vm1, %v98_v14 }
 0x654   :  { %v3235_v15 = vpop.eup %3234 }
 0x655   :  { %3114 = vmatmul.msk.f32.vlgmr.msra.gmra.mxu1 %vm183_vm6, %v3235_v15 }
 0x656   :  { %567 = vmatpush.msra.mxu1 %v3715_v51 }
 0x658   :  { %568 = vmatpush.msra.mxu1 %v3718_v52 }
 0x65a   :  { %569 = vmatpush.msra.mxu1 %v3720_v53 }
 0x65c   :  { %570 = vmatpush.msra.mxu1 %v3723_v54 }
 0x6d2   :  { %v410_v16 = vpop.f32.mrf.mxu1 }
 0x6d3   :  { %v3775_v17 = vadd.f32 %v3745_v59, %v410_v16 }
 0x6d5   :  { %v414_v19 = vsub.f32 %v3775_v17, %v413_v18  ;;  %v494_v32 = vsub.f32 %v3750_v62, %v3775_v17 }
 0x6d7   :  { %v415_v20 = vmul.f32 %v414_v19, %v3747_v61 }
 0x6d9   :  { %417 = vrot.lane.b32.xlu1 %v415_v20, %s3499_s19 }
 0x74b   :  { %v418_v21 = vpop.permute.xlu1 %417 }
 0x74c   :  { %v420_v22 = vadd.f32 %v418_v21, %v3659_v41 }
 0x74e   :  { %422 = vrot.lane.b32.xlu2 %v420_v22, %s3499_s19 }
 0x7a8   :  { %v423_v23 = vpop.permute.xlu2 %422 }
 0x7a9   :  { %3115 = vmatmul.msk.f32.vlgmr.msra.gmra.mxu2 %vm183_vm6, %v423_v23 }
 0x7aa   :  { %603 = vmatpush.msra.mxu2 %v3587_v0 }
 0x7ac   :  { %604 = vmatpush.msra.mxu2 %v3592_v1 }
 0x7ae   :  { %605 = vmatpush.msra.mxu2 %v3604_v4 }
 0x7b0   :  { %606 = vmatpush.msra.mxu2 %v3611_v5 }
 0x82c   :  { %v443_v24 = vpop.f32.mrf.mxu2 }
 0x82d   :  { %v444_v25 = vadd.f32 %v3707_v47, %v443_v24 }
 0x82f   :  { %3236 = vtanh.f32 %v444_v25 }
 0x835   :  { %v3237_v26 = vpop.eup %3236 }
 0x836   :  { %3116 = vmatmul.msk.f32.vlgmr.msra.gmra.mxu3 %vm183_vm6, %v3237_v26 }
 0x837   :  { %671 = vmatpush.msra.mxu3 %v3634_v36 }
 0x839   :  { %672 = vmatpush.msra.mxu3 %v3639_v37 }
 0x83b   :  { %673 = vmatpush.msra.mxu3 %v3645_v38 }
 0x83d   :  { %674 = vmatpush.msra.mxu3 %v3651_v39 }
 0x8b9   :  { %v467_v27 = vpop.f32.mrf.mxu3 }
 0x8ba   :  { %v468_v28 = vadd.f32 %v3734_v55, %v467_v27 }
 0x8bc   :  { %3238 = vtanh.f32 %v468_v28 }
 0x8c2   :  { %v3239_v29 = vpop.eup %3238 }
 0x8c3   :  { %3117 = vmatmul.msk.f32.vlgmr.msrb.gmra.mxu1 %vm183_vm6, %v3239_v29 }
 0x8c4   :  { %695 = vmatpush.msrb.mxu1 %v3671_v43 }
 0x8c6   :  { %696 = vmatpush.msrb.mxu1 %v3677_v44 }
 0x8c8   :  { %697 = vmatpush.msrb.mxu1 %v3683_v45 }
 0x8ca   :  { %698 = vmatpush.msrb.mxu1 %v3690_v46 }
 0x940   :  { %v491_v30 = vpop.f32.mrf.mxu1 }
 0x941   :  { %v492_v31 = vadd.f32 %v3745_v59, %v491_v30 }
 0x943   :  { %v495_v33 = vadd.f32 %v494_v32, %v492_v31  ;;  %v575_v60 = vadd.f32 %v492_v31, %v3775_v17 }
 0x945   :  { %v496_v34 = vmul.f32 %v495_v33, %v3747_v61  ;;  %v576_v63 = vmul.f32 3.0, %v575_v60 }
 0x947   :  { %498 = vrot.lane.b32.xlu0 %v496_v34, %s3499_s19  ;;  %v577_v6 = vadd.f32 %v576_v63, %v3750_v62  ;;  %v159_v62 = vpop.f32.mrf.mxu0 }
 0x948   :  { %v160_v16 = vadd.f32 %v3625_v10, %v159_v62 }
 0x9b9   :  { %v499_v35 = vpop.permute.xlu0 %498 }
 0x9ba   :  { %v501_v40 = vadd.f32 %v499_v35, %v3659_v41 }
 0x9bc   :  { %503 = vrot.lane.b32.xlu1 %v501_v40, %s3499_s19 }
 0xa2e   :  { %v504_v42 = vpop.permute.xlu1 %503 }
 0xa2f   :  { %3118 = vmatmul.msk.f32.vlgmr.msrb.gmra.mxu2 %vm183_vm6, %v504_v42 }
 0xa30   :  { %719 = vmatpush.msrb.mxu2 %v3715_v51 }
 0xa32   :  { %720 = vmatpush.msrb.mxu2 %v3718_v52 }
 0xa34   :  { %721 = vmatpush.msrb.mxu2 %v3720_v53 }
 0xa36   :  { %722 = vmatpush.msrb.mxu2 %v3723_v54 }
 0xab2   :  { %v524_v48 = vpop.f32.mrf.mxu2 }
 0xab3   :  { %v525_v49 = vadd.f32 %v3707_v47, %v524_v48 }
 0xab5   :  { %3240 = vtanh.f32 %v525_v49 }
 0xabb   :  { %v3241_v50 = vpop.eup %3240 }
 0xabc   :  { %3119 = vmatmul.msk.f32.vlgmr.msrb.gmra.mxu3 %vm183_vm6, %v3241_v50 }
 0xabd   :  { %752 = vmatpush.msrb.mxu3 %v3634_v36 }
 0xabf   :  { %753 = vmatpush.msrb.mxu3 %v3639_v37 }
 0xac1   :  { %754 = vmatpush.msrb.mxu3 %v3645_v38 }
 0xac3   :  { %755 = vmatpush.msrb.mxu3 %v3651_v39 }
 0xb3f   :  { %v548_v56 = vpop.f32.mrf.mxu3 }
 0xb40   :  { %v549_v57 = vadd.f32 %v3734_v55, %v548_v56 }
 0xb42   :  { %3242 = vtanh.f32 %v549_v57 }
 0xb48   :  { %v3243_v58 = vpop.eup %3242 }
 0xb49   :  { %3120 = vmatmul.msk.f32.vlgmr.msra.gmra.mxu1 %vm183_vm6, %v3243_v58 }
 0xb4a   :  { %776 = vmatpush.msra.mxu1 %v3671_v43 }
 0xb4c   :  { %777 = vmatpush.msra.mxu1 %v3677_v44 }
 0xb4e   :  { %778 = vmatpush.msra.mxu1 %v3683_v45 }
 0xb50   :  { %779 = vmatpush.msra.mxu1 %v3690_v46 }
 0xbc6   :  { %v572_v2 = vpop.f32.mrf.mxu1 }
 0xbc7   :  { %v573_v3 = vadd.f32 %v3745_v59, %v572_v2 }
 0xbc9   :  { %v578_v8 = vadd.f32 %v577_v6, %v573_v3 }
 0xbcb   :  { %v579_v9 = vmul.f32 %v578_v8, %v3747_v61 }
 0xbcd   :  { %v580_v11 = vmul.f32 0.125, %v579_v9  ;;  %v3867_v9 = vstv %s3122_s15  ;;  %s3089_s15 = sshll.u32 %s4751_s14, 4  ;;  %s3090_s15 = int_to_ptr.hbm [resolvable:$true] %s3089_s15 }
 0xbcf   :  { %582 = vrot.lane.b32.xlu2 %v580_v11, %s3499_s19 }
 0xc29   :  { %v583_v12 = vpop.permute.xlu2 %582 }
 0xc2a   :  { %v585_v13 = vadd.f32 %v583_v12, %v3659_v41 }
 0xc2c   :  { %587 = vrot.lane.b32.xlu0 %v585_v13, %s3499_s19 }
 0xc9e   :  { %v588_v15 = vpop.permute.xlu0 %587 }
 0xc9f   :  { %3121 = vmatmul.msk.f32.vlgmr.msra.gmra.mxu2 %vm183_vm6, %v588_v15 }
 0xca0   :  { %800 = vmatpush.msra.mxu2 %v3715_v51 }
 0xca2   :  { %801 = vmatpush.msra.mxu2 %v3718_v52 }
 0xca4   :  { %802 = vmatpush.msra.mxu2 %v3720_v53 }
 0xca6   :  { %803 = vmatpush.msra.mxu2 %v3723_v54 }
 0xd22   :  { %v608_v41 = vpop.f32.mrf.mxu2 }
 0xd23   :  { %v609_v61 = vadd.f32 %v3618_v7, %v608_v41 }
 0xd25   :  { %632 = vrot.lane.b32.xlu1 %v609_v61, %s3499_s19  ;;  %v611_v17 = vadd.f32 %v609_v61, %v160_v16 }
 0xd27   :  { %v612_v18 = vsub.f32 0.0, %v611_v17 }
 0xd29   :  { %v613_v19 = vmul.f32 1.442695, %v612_v18 }
 0xd2b   :  { %3244 = vpow2.f32 %v613_v19 }
 0xd31   :  { %v3245_v20 = vpop.eup %3244 }
 0xd32   :  { %v615_v21 = vadd.f32 1.0, %v3245_v20 }
 0xd34   :  { %3246 = vrcp.f32 %v615_v21  ;;  %v627_v27 = vand.u32 2147483648, %v615_v21  ;;  %vm621_vm8 = vweird.f32 %v615_v21  ;;  %v625_v28 = vand.u32 2147483647, %v615_v21 }
 0xd36   :  { %v628_v30 = vor.u32 1.1754944e-38, %v627_v27  ;;  %vm626_vm10 = vcmp.eq.f32.partialorder %v625_v28, 8.507059e+37 }
 0xd3a   :  { %v3247_v22 = vpop.eup %3246 }
 0xd3b   :  { %v617_v23 = vmul.f32 %v3247_v22, %v615_v21  ;;  %vm622_vm7 = vweird.f32 %v3247_v22 }
 0xd3c   :  { %vm623_vm9 = vmor %vm621_vm8, %vm622_vm7 }
 0xd3d   :  { %v618_v24 = vsub.f32 1.0, %v617_v23 }
 0xd3f   :  { %v619_v25 = vmul.f32 %v3247_v22, %v618_v24 }
 0xd41   :  { %v620_v26 = vadd.f32 %v3247_v22, %v619_v25 }
 0xd43   :  { %v624_v29 = vsel %vm623_vm9, %v3247_v22, %v620_v26 }
 0xd44   :  { %v629_v32 = vsel %vm626_vm10, %v628_v30, %v624_v29 }
 0xd97   :  { %v633_v31 = vpop.permute.xlu1 %632 }
 0xd98   :  { %v635_v33 = vmul.f32 %v633_v31, %v629_v32 }
 0xd9a   :  { %637 = vrot.lane.b32.xlu2 %v635_v33, %s3499_s19 }
 0xdf4   :  { %v638_v34 = vpop.permute.xlu2 %637 }
 0xdf5   :  { %v640_v35 = vadd.f32 %v638_v34, %v160_v16 }
 0xdf7   :  { %3248 = vtanh.f32 %v640_v35 }
 0xdfd   :  { %v3249_v40 = vpop.eup %3248 }
 0xdfe   :  { %v642_v42 = vsub.f32 %v585_v13, %v3249_v40 }
 0xe00   :  { %644 = vrot.lane.b32.xlu0 %v642_v42, %s3500_s22  ;;  %v99_v42 = vld [vmem:[%s4737_s0 + $0x10] sm:$0xff] }
 0xe01   :  { %3103 = vmatmul.msk.f32.gmra.mxu0 %vm110_vm1, %v99_v42 }
 0xe72   :  { %v645_v48 = vpop.permute.xlu0 %644 }
 0xe73   :  { %v647_v49 = vmul.f32 %v645_v48, %v629_v32  ;;  %v100_v48 = vld [vmem:[%s4737_s0 + $0x18] sm:$0xff] }
 0xe74   :  { %3104 = vmatmul.msk.f32.gmra.mxu0 %vm110_vm1, %v100_v48 }
 0xe75   :  { %649 = vrot.lane.b32.xlu1 %v647_v49, %s3501_s23  ;;  %v101_v49 = vld [vmem:[%s4737_s0 + $0x20] sm:$0xff] }
 0xe7c   :  { %3105 = vmatmul.msk.f32.gmra.mxu0 %vm110_vm1, %v101_v49 }
 0xee7   :  { %v650_v50 = vpop.permute.xlu1 %649 }
 0xee8   :  { %v3846_v56 = vadd.f32 %v3249_v40, %v650_v50  ;;  %v102_v50 = vld [vmem:[%s4737_s0 + $0x28] sm:$0xff] }
 0xee9   :  { %3106 = vmatmul.msk.f32.gmra.mxu0 %vm110_vm1, %v102_v50 }
 0xeea   :  { %655 = vrot.lane.b32.xlu2 %v3846_v56, %s3499_s19 }
 0xf44   :  { %v656_v57 = vpop.permute.xlu2 %655 }
 0xf45   :  { %3123 = vmatmul.msk.f32.vlgmr.msra.gmra.mxu3 %vm183_vm6, %v656_v57  ;;  %v103_v57 = vld [vmem:[%s4737_s0 + $0x30] sm:$0xff] }
 0xf46   :  { %833 = vmatpush.msra.mxu3 %v3634_v36  ;;  %3107 = vmatmul.msk.f32.gmra.mxu0 %vm110_vm1, %v103_v57 }
 0xf48   :  { %834 = vmatpush.msra.mxu3 %v3639_v37 }
 0xf4a   :  { %835 = vmatpush.msra.mxu3 %v3645_v38 }
 0xf4c   :  { %836 = vmatpush.msra.mxu3 %v3651_v39 }
 0xfc8   :  { %v676_v58 = vpop.f32.mrf.mxu3 }
 0xfc9   :  { %v677_v60 = vadd.f32 %v3707_v47, %v676_v58 }
 0xfcb   :  { %3250 = vtanh.f32 %v677_v60  ;;  %v104_v60 = vld [vmem:[%s4737_s0 + $0x38] sm:$0xff]  ;;  %s3136_s0 = sld [smem:[#allocation2 + $0x2]] }
 0xfcc   :  { %3108 = vmatmul.msk.f32.gmra.mxu0 %vm110_vm1, %v104_v60 }
 0xfd1   :  { %v3251_v63 = vpop.eup %3250 }
 0xfd2   :  { %3124 = vmatmul.msk.f32.vlgmr.msrb.gmra.mxu1 %vm183_vm6, %v3251_v63 }
 0xfd3   :  { %857 = vmatpush.msrb.mxu1 %v3671_v43 }
 0xfd5   :  { %858 = vmatpush.msrb.mxu1 %v3677_v44 }
 0xfd7   :  { %859 = vmatpush.msrb.mxu1 %v3683_v45 }
 0xfd9   :  { %860 = vmatpush.msrb.mxu1 %v3690_v46 }
0x104f   :  { %v700_v2 = vpop.f32.mrf.mxu1 }
0x1050   :  { %v701_v3 = vadd.f32 %v3734_v55, %v700_v2 }
0x1052   :  { %3252 = vtanh.f32 %v701_v3 }
0x1058   :  { %v3253_v6 = vpop.eup %3252 }
0x1059   :  { %3125 = vmatmul.msk.f32.vlgmr.msrb.gmra.mxu2 %vm183_vm6, %v3253_v6  ;;  %v162_v6 = vpop.f32.mrf.mxu0 }
0x105a   :  { %881 = vmatpush.msrb.mxu2 %v3715_v51 }
0x105c   :  { %882 = vmatpush.msrb.mxu2 %v3718_v52 }
0x105e   :  { %883 = vmatpush.msrb.mxu2 %v3720_v53 }
0x1060   :  { %884 = vmatpush.msrb.mxu2 %v3723_v54 }
0x10dc   :  { %v724_v8 = vpop.f32.mrf.mxu2 }
0x10dd   :  { %v3870_v11 = vadd.f32 %v3745_v59, %v724_v8  ;;  %v3962_v8 = vpop.f32.mrf.mxu0 }
0x10df   :  { %v728_v12 = vmul.f32 %v3867_v9, %v3870_v11  ;;  %v808_v22 = vmul.f32 0.33333334, %v3870_v11 }
0x10e1   :  { %v729_v13 = vmul.f32 0.33333334, %v728_v12 }
0x10e3   :  { %731 = vrot.lane.b32.xlu0 %v729_v13, %s3499_s19 }
0x10e5   :  { %v3964_v12 = vpop.f32.mrf.mxu0 }
0x10ed   :  { %v3966_v13 = vpop.f32.mrf.mxu0 }
0x1155   :  { %v732_v14 = vpop.permute.xlu0 %731 }
0x1156   :  { %v734_v15 = vadd.f32 %v732_v14, %v3846_v56  ;;  %v3968_v14 = vpop.f32.mrf.mxu0 }
0x1158   :  { %736 = vrot.lane.b32.xlu1 %v734_v15, %s3499_s19 }
0x115e   :  { %v3970_v15 = vpop.f32.mrf.mxu0 }
0x11ca   :  { %v737_v41 = vpop.permute.xlu1 %736 }
0x11cb   :  { %3126 = vmatmul.msk.f32.vlgmr.msrb.gmra.mxu3 %vm183_vm6, %v737_v41 }
0x11cc   :  { %914 = vmatpush.msrb.mxu3 %v3634_v36 }
0x11ce   :  { %915 = vmatpush.msrb.mxu3 %v3639_v37 }
0x11d0   :  { %916 = vmatpush.msrb.mxu3 %v3645_v38 }
0x11d2   :  { %917 = vmatpush.msrb.mxu3 %v3651_v39 }
0x124e   :  { %v757_v61 = vpop.f32.mrf.mxu3 }
0x124f   :  { %v758_v62 = vadd.f32 %v3707_v47, %v757_v61 }
0x1251   :  { %3254 = vtanh.f32 %v758_v62 }
0x1257   :  { %v3255_v16 = vpop.eup %3254 }
0x1258   :  { %3127 = vmatmul.msk.f32.vlgmr.msra.gmra.mxu1 %vm183_vm6, %v3255_v16 }
0x1259   :  { %962 = vmatpush.msra.mxu1 %v3715_v51 }
0x125b   :  { %963 = vmatpush.msra.mxu1 %v3718_v52 }
0x125d   :  { %964 = vmatpush.msra.mxu1 %v3720_v53 }
0x125f   :  { %965 = vmatpush.msra.mxu1 %v3723_v54 }
0x12d5   :  { %v781_v17 = vpop.f32.mrf.mxu1 }
0x12d6   :  { %v782_v18 = vadd.f32 %v3734_v55, %v781_v17 }
0x12d8   :  { %3256 = vtanh.f32 %v782_v18 }
0x12de   :  { %v3257_v19 = vpop.eup %3256 }
0x12df   :  { %3128 = vmatmul.msk.f32.vlgmr.msra.gmra.mxu2 %vm183_vm6, %v3257_v19 }
0x12e0   :  { %998 = vmatpush.msra.mxu2 %v3587_v0 }
0x12e2   :  { %999 = vmatpush.msra.mxu2 %v3592_v1 }
0x12e4   :  { %1000 = vmatpush.msra.mxu2 %v3604_v4 }
0x12e6   :  { %1001 = vmatpush.msra.mxu2 %v3611_v5 }
0x1362   :  { %v805_v20 = vpop.f32.mrf.mxu2 }
0x1363   :  { %v3895_v21 = vadd.f32 %v3745_v59, %v805_v20 }
0x1365   :  { %v809_v23 = vsub.f32 %v3895_v21, %v808_v22  ;;  %v889_v32 = vsub.f32 %v3870_v11, %v3895_v21 }
0x1367   :  { %v810_v24 = vmul.f32 %v809_v23, %v3867_v9 }
0x1369   :  { %812 = vrot.lane.b32.xlu2 %v810_v24, %s3499_s19 }
0x13c3   :  { %v813_v25 = vpop.permute.xlu2 %812 }
0x13c4   :  { %v815_v0 = vadd.f32 %v813_v25, %v3846_v56 }
0x13c6   :  { %817 = vrot.lane.b32.xlu0 %v815_v0, %s3499_s19 }
0x1438   :  { %v818_v1 = vpop.permute.xlu0 %817 }
0x1439   :  { %3129 = vmatmul.msk.f32.vlgmr.msra.gmra.mxu3 %vm183_vm6, %v818_v1 }
0x143a   :  { %1066 = vmatpush.msra.mxu3 %v3634_v36 }
0x143c   :  { %1067 = vmatpush.msra.mxu3 %v3639_v37 }
0x143e   :  { %1068 = vmatpush.msra.mxu3 %v3645_v38 }
0x1440   :  { %1069 = vmatpush.msra.mxu3 %v3651_v39 }
0x14bc   :  { %v838_v4 = vpop.f32.mrf.mxu3 }
0x14bd   :  { %v839_v5 = vadd.f32 %v3707_v47, %v838_v4 }
0x14bf   :  { %3258 = vtanh.f32 %v839_v5 }
0x14c5   :  { %v3259_v26 = vpop.eup %3258 }
0x14c6   :  { %3130 = vmatmul.msk.f32.vlgmr.msrb.gmra.mxu1 %vm183_vm6, %v3259_v26 }
0x14c7   :  { %1114 = vmatpush.msrb.mxu1 %v3715_v51 }
0x14c9   :  { %1115 = vmatpush.msrb.mxu1 %v3718_v52 }
0x14cb   :  { %1116 = vmatpush.msrb.mxu1 %v3720_v53 }
0x14cd   :  { %1117 = vmatpush.msrb.mxu1 %v3723_v54 }
0x1543   :  { %v862_v27 = vpop.f32.mrf.mxu1 }
0x1544   :  { %v863_v28 = vadd.f32 %v3734_v55, %v862_v27 }
0x1546   :  { %3260 = vtanh.f32 %v863_v28 }
0x154c   :  { %v3261_v29 = vpop.eup %3260 }
0x154d   :  { %3131 = vmatmul.msk.f32.vlgmr.msrb.gmra.mxu2 %vm183_vm6, %v3261_v29 }
0x154e   :  { %1147 = vmatpush.msrb.mxu2 %v3634_v36 }
0x1550   :  { %1148 = vmatpush.msrb.mxu2 %v3639_v37 }
0x1552   :  { %1149 = vmatpush.msrb.mxu2 %v3645_v38 }
0x1554   :  { %1150 = vmatpush.msrb.mxu2 %v3651_v39 }
0x15d0   :  { %v886_v30 = vpop.f32.mrf.mxu2 }
0x15d1   :  { %v887_v31 = vadd.f32 %v3745_v59, %v886_v30 }
0x15d3   :  { %v890_v33 = vadd.f32 %v889_v32, %v887_v31  ;;  %v970_v16 = vadd.f32 %v887_v31, %v3895_v21 }
0x15d5   :  { %v891_v34 = vmul.f32 %v890_v33, %v3867_v9  ;;  %v971_v17 = vmul.f32 3.0, %v970_v16 }
0x15d7   :  { %893 = vrot.lane.b32.xlu1 %v891_v34, %s3499_s19  ;;  %v972_v20 = vadd.f32 %v971_v17, %v3870_v11 }
0x1649   :  { %v894_v35 = vpop.permute.xlu1 %893 }
0x164a   :  { %v896_v40 = vadd.f32 %v894_v35, %v3846_v56 }
0x164c   :  { %898 = vrot.lane.b32.xlu2 %v896_v40, %s3499_s19 }
0x16a6   :  { %v899_v58 = vpop.permute.xlu2 %898 }
0x16a7   :  { %3132 = vmatmul.msk.f32.vlgmr.msrb.gmra.mxu3 %vm183_vm6, %v899_v58 }
0x16a8   :  { %1171 = vmatpush.msrb.mxu3 %v3671_v43 }
0x16aa   :  { %1172 = vmatpush.msrb.mxu3 %v3677_v44 }
0x16ac   :  { %1173 = vmatpush.msrb.mxu3 %v3683_v45 }
0x16ae   :  { %1174 = vmatpush.msrb.mxu3 %v3690_v46 }
0x172a   :  { %v919_v63 = vpop.f32.mrf.mxu3 }
0x172b   :  { %v920_v2 = vadd.f32 %v3707_v47, %v919_v63 }
0x172d   :  { %3262 = vtanh.f32 %v920_v2 }
0x1733   :  { %v3263_v3 = vpop.eup %3262 }
0x1734   :  { %3133 = vmatmul.msk.f32.vlgmr.msrb.gmra.mxu0 %vm183_vm6, %v3263_v3 }
0x1735   :  { %1195 = vmatpush.msrb.mxu0 %v3715_v51 }
0x1737   :  { %1196 = vmatpush.msrb.mxu0 %v3718_v52 }
0x1739   :  { %1197 = vmatpush.msrb.mxu0 %v3720_v53 }
0x173b   :  { %1198 = vmatpush.msrb.mxu0 %v3723_v54 }
0x17b1   :  { %v943_v41 = vpop.f32.mrf.mxu0 }
0x17b2   :  { %v944_v61 = vadd.f32 %v3734_v55, %v943_v41 }
0x17b4   :  { %3264 = vtanh.f32 %v944_v61 }
0x17ba   :  { %v3265_v62 = vpop.eup %3264 }
0x17bb   :  { %3134 = vmatmul.msk.f32.vlgmr.msra.gmra.mxu1 %vm183_vm6, %v3265_v62 }
0x17bc   :  { %1228 = vmatpush.msra.mxu1 %v3634_v36 }
0x17be   :  { %1229 = vmatpush.msra.mxu1 %v3639_v37 }
0x17c0   :  { %1230 = vmatpush.msra.mxu1 %v3645_v38 }
0x17c2   :  { %1231 = vmatpush.msra.mxu1 %v3651_v39 }
0x1838   :  { %v967_v18 = vpop.f32.mrf.mxu1 }
0x1839   :  { %v968_v19 = vadd.f32 %v3745_v59, %v967_v18 }
0x183b   :  { %v973_v22 = vadd.f32 %v972_v20, %v968_v19  ;;  %v4017_v19 = vstv %s3136_s0 }
0x183d   :  { %v974_v23 = vmul.f32 %v973_v22, %v3867_v9 }
0x183f   :  { %v975_v24 = vmul.f32 0.125, %v974_v23 }
0x1841   :  { %977 = vrot.lane.b32.xlu0 %v975_v24, %s3499_s19 }
0x18b3   :  { %v978_v25 = vpop.permute.xlu0 %977 }
0x18b4   :  { %v980_v0 = vadd.f32 %v978_v25, %v3846_v56  ;;  %v163_v56 = vadd.f32 %v3625_v10, %v162_v6 }
0x18b6   :  { %982 = vrot.lane.b32.xlu1 %v980_v0, %s3499_s19 }
0x1928   :  { %v983_v1 = vpop.permute.xlu1 %982 }
0x1929   :  { %3135 = vmatmul.msk.f32.vlgmr.msra.gmra.mxu2 %vm183_vm6, %v983_v1 }
0x192a   :  { %1252 = vmatpush.msra.mxu2 %v3671_v43 }
0x192c   :  { %1253 = vmatpush.msra.mxu2 %v3677_v44 }
0x192e   :  { %1254 = vmatpush.msra.mxu2 %v3683_v45 }
0x1930   :  { %1255 = vmatpush.msra.mxu2 %v3690_v46 }
0x19ac   :  { %v1003_v9 = vpop.f32.mrf.mxu2 }
0x19ad   :  { %v1004_v11 = vadd.f32 %v3618_v7, %v1003_v9 }
0x19af   :  { %1027 = vrot.lane.b32.xlu2 %v1004_v11, %s3499_s19  ;;  %v1006_v21 = vadd.f32 %v1004_v11, %v163_v56 }
0x19b1   :  { %v1007_v4 = vsub.f32 0.0, %v1006_v21  ;;  %v4043_v21 = vld [vmem:[%s4741_s4 + $0x10] sm:$0xff] }
0x19b3   :  { %v1008_v5 = vmul.f32 1.442695, %v1007_v4  ;;  %v4049_v4 = vld [vmem:[%s4741_s4 + $0x8] sm:$0xff] }
0x19b5   :  { %3266 = vpow2.f32 %v1008_v5  ;;  %v4055_v5 = vld [vmem:[%s4741_s4] sm:$0xff] }
0x19bb   :  { %v3267_v26 = vpop.eup %3266 }
0x19bc   :  { %v1010_v27 = vadd.f32 1.0, %v3267_v26 }
0x19be   :  { %3268 = vrcp.f32 %v1010_v27  ;;  %v1022_v33 = vand.u32 2147483648, %v1010_v27  ;;  %vm1016_vm12 = vweird.f32 %v1010_v27  ;;  %v1020_v7 = vand.u32 2147483647, %v1010_v27 }
0x19c0   :  { %v1023_v35 = vor.u32 1.1754944e-38, %v1022_v33  ;;  %vm1021_vm14 = vcmp.eq.f32.partialorder %v1020_v7, 8.507059e+37 }
0x19c4   :  { %v3269_v28 = vpop.eup %3268 }
0x19c5   :  { %v1012_v29 = vmul.f32 %v3269_v28, %v1010_v27  ;;  %vm1017_vm11 = vweird.f32 %v3269_v28 }
0x19c6   :  { %vm1018_vm13 = vmor %vm1016_vm12, %vm1017_vm11 }
0x19c7   :  { %v1013_v30 = vsub.f32 1.0, %v1012_v29 }
0x19c9   :  { %v1014_v31 = vmul.f32 %v3269_v28, %v1013_v30 }
0x19cb   :  { %v1015_v32 = vadd.f32 %v3269_v28, %v1014_v31 }
0x19cd   :  { %v1019_v34 = vsel %vm1018_vm13, %v3269_v28, %v1015_v32 }
0x19ce   :  { %v1024_v40 = vsel %vm1021_vm14, %v1023_v35, %v1019_v34  ;;  %v4095_v35 = vld [vmem:[%s4743_s6 + $0x10] sm:$0xff] }
0x1a09   :  { %v1028_v10 = vpop.permute.xlu2 %1027 }
0x1a0a   :  { %v1030_v42 = vmul.f32 %v1028_v10, %v1024_v40  ;;  %v4101_v10 = vld [vmem:[%s4743_s6 + $0x8] sm:$0xff] }
0x1a0c   :  { %1032 = vrot.lane.b32.xlu0 %v1030_v42, %s3499_s19 }
0x1a7e   :  { %v1033_v48 = vpop.permute.xlu0 %1032 }
0x1a7f   :  { %v1035_v49 = vadd.f32 %v1033_v48, %v163_v56  ;;  %v4037_v56 = vld [vmem:[%s4741_s4 + $0x18] sm:$0xff] }
0x1a81   :  { %3270 = vtanh.f32 %v1035_v49 }
0x1a87   :  { %v3271_v50 = vpop.eup %3270 }
0x1a88   :  { %v1037_v57 = vsub.f32 %v980_v0, %v3271_v50 }
0x1a8a   :  { %1039 = vrot.lane.b32.xlu1 %v1037_v57, %s3500_s22 }
0x1afc   :  { %v1040_v58 = vpop.permute.xlu1 %1039 }
0x1afd   :  { %v1042_v60 = vmul.f32 %v1040_v58, %v1024_v40  ;;  %v4107_v40 = vld [vmem:[%s4743_s6] sm:$0xff] }
0x1aff   :  { %1044 = vrot.lane.b32.xlu2 %v1042_v60, %s3501_s23 }
0x1b59   :  { %v1045_v63 = vpop.permute.xlu2 %1044 }
0x1b5a   :  { %v3996_v2 = vadd.f32 %v3271_v50, %v1045_v63 }
0x1b5c   :  { %1050 = vrot.lane.b32.xlu0 %v3996_v2, %s3499_s19 }
0x1bce   :  { %v1051_v3 = vpop.permute.xlu0 %1050 }
0x1bcf   :  { %3137 = vmatmul.msk.f32.vlgmr.msra.gmra.mxu3 %vm183_vm6, %v1051_v3  ;;  %v4121_v3 = vld [vmem:[%s4745_s8 + $0x18] sm:$0xff] }
0x1bd0   :  { %1276 = vmatpush.msra.mxu3 %v3715_v51 }
0x1bd2   :  { %1277 = vmatpush.msra.mxu3 %v3718_v52 }
0x1bd4   :  { %1278 = vmatpush.msra.mxu3 %v3720_v53 }
0x1bd6   :  { %1279 = vmatpush.msra.mxu3 %v3723_v54 }
0x1c52   :  { %v1071_v6 = vpop.f32.mrf.mxu3 }
0x1c53   :  { %v1072_v41 = vadd.f32 %v3707_v47, %v1071_v6  ;;  %v4127_v6 = vld [vmem:[%s4745_s8 + $0x10] sm:$0xff] }
0x1c55   :  { %3272 = vtanh.f32 %v1072_v41  ;;  %v4133_v41 = vld [vmem:[%s4745_s8 + $0x8] sm:$0xff] }
0x1c5b   :  { %v3273_v61 = vpop.eup %3272 }
0x1c5c   :  { %3138 = vmatmul.msk.f32.vlgmr.msra.gmra.mxu0 %vm183_vm6, %v3273_v61  ;;  %v4139_v61 = vld [vmem:[%s4745_s8] sm:$0xff] }
0x1c5d   :  { %1309 = vmatpush.msra.mxu0 %v3634_v36 }
0x1c5f   :  { %1310 = vmatpush.msra.mxu0 %v3639_v37 }
0x1c61   :  { %1311 = vmatpush.msra.mxu0 %v3645_v38 }
0x1c63   :  { %1312 = vmatpush.msra.mxu0 %v3651_v39 }
0x1cd9   :  { %v1095_v62 = vpop.f32.mrf.mxu0 }
0x1cda   :  { %v1096_v16 = vadd.f32 %v3734_v55, %v1095_v62 }
0x1cdc   :  { %3274 = vtanh.f32 %v1096_v16 }
0x1ce2   :  { %v3275_v17 = vpop.eup %3274 }
0x1ce3   :  { %3139 = vmatmul.msk.f32.vlgmr.msrb.gmra.mxu1 %vm183_vm6, %v3275_v17 }
0x1ce4   :  { %1333 = vmatpush.msrb.mxu1 %v3671_v43 }
0x1ce6   :  { %1334 = vmatpush.msrb.mxu1 %v3677_v44 }
0x1ce8   :  { %1335 = vmatpush.msrb.mxu1 %v3683_v45 }
0x1cea   :  { %1336 = vmatpush.msrb.mxu1 %v3690_v46 }
0x1d60   :  { %v1119_v18 = vpop.f32.mrf.mxu1 }
0x1d61   :  { %v4020_v20 = vadd.f32 %v3745_v59, %v1119_v18 }
0x1d63   :  { %v1123_v22 = vmul.f32 %v4017_v19, %v4020_v20  ;;  %v1203_v31 = vmul.f32 0.33333334, %v4020_v20 }
0x1d65   :  { %v1124_v23 = vmul.f32 0.33333334, %v1123_v22 }
0x1d67   :  { %1126 = vrot.lane.b32.xlu1 %v1124_v23, %s3499_s19 }
0x1dd9   :  { %v1127_v24 = vpop.permute.xlu1 %1126 }
0x1dda   :  { %v1129_v25 = vadd.f32 %v1127_v24, %v3996_v2 }
0x1ddc   :  { %1131 = vrot.lane.b32.xlu2 %v1129_v25, %s3499_s19 }
0x1e36   :  { %v1132_v0 = vpop.permute.xlu2 %1131 }
0x1e37   :  { %3140 = vmatmul.msk.f32.vlgmr.msrb.gmra.mxu2 %vm183_vm6, %v1132_v0 }
0x1e38   :  { %1357 = vmatpush.msrb.mxu2 %v3715_v51 }
0x1e3a   :  { %1358 = vmatpush.msrb.mxu2 %v3718_v52 }
0x1e3c   :  { %1359 = vmatpush.msrb.mxu2 %v3720_v53 }
0x1e3e   :  { %1360 = vmatpush.msrb.mxu2 %v3723_v54 }
0x1eba   :  { %v1152_v1 = vpop.f32.mrf.mxu2 }
0x1ebb   :  { %v1153_v9 = vadd.f32 %v3707_v47, %v1152_v1 }
0x1ebd   :  { %3276 = vtanh.f32 %v1153_v9 }
0x1ec3   :  { %v3277_v11 = vpop.eup %3276 }
0x1ec4   :  { %3141 = vmatmul.msk.f32.vlgmr.msrb.gmra.mxu3 %vm183_vm6, %v3277_v11 }
0x1ec5   :  { %1393 = vmatpush.msrb.mxu3 %v4037_v56 }
0x1ec7   :  { %1394 = vmatpush.msrb.mxu3 %v4043_v21 }
0x1ec9   :  { %1395 = vmatpush.msrb.mxu3 %v4049_v4 }
0x1ecb   :  { %1396 = vmatpush.msrb.mxu3 %v4055_v5 }
0x1f47   :  { %v1176_v26 = vpop.f32.mrf.mxu3 }
0x1f48   :  { %v1177_v27 = vadd.f32 %v3734_v55, %v1176_v26 }
0x1f4a   :  { %3278 = vtanh.f32 %v1177_v27 }
0x1f50   :  { %v3279_v28 = vpop.eup %3278 }
0x1f51   :  { %3142 = vmatmul.msk.f32.vlgmr.msrb.gmra.mxu0 %vm183_vm6, %v3279_v28 }
0x1f52   :  { %1461 = vmatpush.msrb.mxu0 %v3634_v36 }
0x1f54   :  { %1462 = vmatpush.msrb.mxu0 %v3639_v37 }
0x1f56   :  { %1463 = vmatpush.msrb.mxu0 %v3645_v38 }
0x1f58   :  { %1464 = vmatpush.msrb.mxu0 %v3651_v39 }
0x1fce   :  { %v1200_v29 = vpop.f32.mrf.mxu0 }
0x1fcf   :  { %v4065_v30 = vadd.f32 %v3745_v59, %v1200_v29 }
0x1fd1   :  { %v1204_v32 = vsub.f32 %v4065_v30, %v1203_v31  ;;  %v1284_v49 = vsub.f32 %v4020_v20, %v4065_v30 }
0x1fd3   :  { %v1205_v33 = vmul.f32 %v1204_v32, %v4017_v19 }
0x1fd5   :  { %1207 = vrot.lane.b32.xlu0 %v1205_v33, %s3499_s19 }
0x2047   :  { %v1208_v7 = vpop.permute.xlu0 %1207 }
0x2048   :  { %v1210_v36 = vadd.f32 %v1208_v7, %v3996_v2 }
0x204a   :  { %1212 = vrot.lane.b32.xlu1 %v1210_v36, %s3499_s19 }
0x20bc   :  { %v1213_v37 = vpop.permute.xlu1 %1212 }
0x20bd   :  { %3143 = vmatmul.msk.f32.vlgmr.msra.gmra.mxu1 %vm183_vm6, %v1213_v37 }
0x20be   :  { %1485 = vmatpush.msra.mxu1 %v3671_v43 }
0x20c0   :  { %1486 = vmatpush.msra.mxu1 %v3677_v44 }
0x20c2   :  { %1487 = vmatpush.msra.mxu1 %v3683_v45 }
0x20c4   :  { %1488 = vmatpush.msra.mxu1 %v3690_v46  ;;  %v4089_v46 = vld [vmem:[%s4743_s6 + $0x18] sm:$0xff] }
0x213a   :  { %v1233_v38 = vpop.f32.mrf.mxu1 }
0x213b   :  { %v1234_v39 = vadd.f32 %v3707_v47, %v1233_v38 }
0x213d   :  { %3280 = vtanh.f32 %v1234_v39 }
0x2143   :  { %v3281_v34 = vpop.eup %3280 }
0x2144   :  { %3144 = vmatmul.msk.f32.vlgmr.msra.gmra.mxu2 %vm183_vm6, %v3281_v34 }
0x2145   :  { %1509 = vmatpush.msra.mxu2 %v3715_v51 }
0x2147   :  { %1510 = vmatpush.msra.mxu2 %v3718_v52 }
0x2149   :  { %1511 = vmatpush.msra.mxu2 %v3720_v53 }
0x214b   :  { %1512 = vmatpush.msra.mxu2 %v3723_v54 }
0x21c7   :  { %v1257_v43 = vpop.f32.mrf.mxu2 }
0x21c8   :  { %v1258_v44 = vadd.f32 %v3734_v55, %v1257_v43 }
0x21ca   :  { %3282 = vtanh.f32 %v1258_v44 }
0x21d0   :  { %v3283_v45 = vpop.eup %3282 }
0x21d1   :  { %3145 = vmatmul.msk.f32.vlgmr.msra.gmra.mxu3 %vm183_vm6, %v3283_v45 }
0x21d2   :  { %1542 = vmatpush.msra.mxu3 %v4089_v46 }
0x21d4   :  { %1543 = vmatpush.msra.mxu3 %v4095_v35 }
0x21d6   :  { %1544 = vmatpush.msra.mxu3 %v4101_v10 }
0x21d8   :  { %1545 = vmatpush.msra.mxu3 %v4107_v40 }
0x2254   :  { %v1281_v42 = vpop.f32.mrf.mxu3 }
0x2255   :  { %v1282_v48 = vadd.f32 %v3745_v59, %v1281_v42 }
0x2257   :  { %v1285_v50 = vadd.f32 %v1284_v49, %v1282_v48 }
0x2259   :  { %v1286_v57 = vmul.f32 %v1285_v50, %v4017_v19 }
0x225b   :  { %1288 = vrot.lane.b32.xlu2 %v1286_v57, %s3499_s19 }
0x22b5   :  { %v1289_v58 = vpop.permute.xlu2 %1288 }
0x22b6   :  { %v1291_v60 = vadd.f32 %v1289_v58, %v3996_v2 }
0x22b8   :  { %1293 = vrot.lane.b32.xlu0 %v1291_v60, %s3499_s19 }
0x232a   :  { %v1294_v63 = vpop.permute.xlu0 %1293 }
0x232b   :  { %3146 = vmatmul.msk.f32.vlgmr.msra.gmra.mxu0 %vm183_vm6, %v1294_v63 }
0x232c   :  { %1566 = vmatpush.msra.mxu0 %v4121_v3 }
0x232e   :  { %1567 = vmatpush.msra.mxu0 %v4127_v6 }
0x2330   :  { %1568 = vmatpush.msra.mxu0 %v4133_v41 }
0x2332   :  { %1569 = vmatpush.msra.mxu0 %v4139_v61 }
0x23a8   :  { %v1314_v62 = vpop.f32.mrf.mxu0 }
0x23a9   :  { %v1315_v16 = vadd.f32 %v3707_v47, %v1314_v62  ;;  %v1365_v47 = vadd.f32 %v1282_v48, %v4065_v30  ;;  %v4188_v62 = vld [vmem:[#allocation6 + $0x18] sm:$0xff] }
0x23ab   :  { %3284 = vtanh.f32 %v1315_v16  ;;  %v4191_v16 = vld [vmem:[#allocation6 + $0x10] sm:$0xff] }
0x23b1   :  { %v3285_v17 = vpop.eup %3284 }
0x23b2   :  { %3147 = vmatmul.msk.f32.vlgmr.msrb.gmra.mxu1 %vm183_vm6, %v3285_v17  ;;  %v4194_v17 = vld [vmem:[#allocation6 + $0x8] sm:$0xff] }
0x23b3   :  { %1590 = vmatpush.msrb.mxu1 %v3715_v51  ;;  %v1366_v51 = vmul.f32 3.0, %v1365_v47 }
0x23b5   :  { %1591 = vmatpush.msrb.mxu1 %v3718_v52 }
0x23b7   :  { %1592 = vmatpush.msrb.mxu1 %v3720_v53 }
0x23b9   :  { %1593 = vmatpush.msrb.mxu1 %v3723_v54  ;;  %v1367_v54 = vadd.f32 %v1366_v51, %v4020_v20  ;;  %v4176_v20 = vld [vmem:[%s4740_s3] ss:$0 sm:$0xff] }
0x23ba   :  { %v166_v11 = vadd.f32 %v4176_v20, %v3962_v8 }
0x242f   :  { %v1338_v18 = vpop.f32.mrf.mxu1 }
0x2430   :  { %v1339_v22 = vadd.f32 %v3734_v55, %v1338_v18  ;;  %v4197_v18 = vld [vmem:[#allocation6] sm:$0xff] }
0x2432   :  { %3286 = vtanh.f32 %v1339_v22 }
0x2438   :  { %v3287_v23 = vpop.eup %3286 }
0x2439   :  { %3148 = vmatmul.msk.f32.vlgmr.msrb.gmra.mxu2 %vm183_vm6, %v3287_v23  ;;  %v4203_v23 = vld [vmem:[%s4744_s7] ss:$0 sm:$0xff] }
0x243a   :  { %1623 = vmatpush.msrb.mxu2 %v4089_v46 }
0x243c   :  { %1624 = vmatpush.msrb.mxu2 %v4095_v35 }
0x243e   :  { %1625 = vmatpush.msrb.mxu2 %v4101_v10 }
0x2440   :  { %1626 = vmatpush.msrb.mxu2 %v4107_v40 }
0x24bc   :  { %v1362_v52 = vpop.f32.mrf.mxu2 }
0x24bd   :  { %v1363_v53 = vadd.f32 %v3745_v59, %v1362_v52 }
0x24bf   :  { %v1368_v55 = vadd.f32 %v1367_v54, %v1363_v53  ;;  %v4214_v53 = vld [vmem:[%s4746_s9] ss:$0 sm:$0xff] }
0x24c1   :  { %v1369_v24 = vmul.f32 %v1368_v55, %v4017_v19  ;;  %v4169_v19 = vld [vmem:[%s4742_s5] ss:$0 sm:$0xff] }
0x24c3   :  { %v1370_v25 = vmul.f32 0.125, %v1369_v24 }
0x24c5   :  { %1372 = vrot.lane.b32.xlu1 %v1370_v25, %s3499_s19  ;;  %v4222_v25 = vstv %s3150_s27 }
0x2537   :  { %v1373_v0 = vpop.permute.xlu1 %1372 }
0x2538   :  { %v1375_v1 = vadd.f32 %v1373_v0, %v3996_v2  ;;  %v4227_v0 = vld [vmem:[%s4748_s11] ss:$0 sm:$0xff] }
0x253a   :  { %1377 = vrot.lane.b32.xlu2 %v1375_v1, %s3499_s19 }
0x2594   :  { %v1378_v9 = vpop.permute.xlu2 %1377 }
0x2595   :  { %3149 = vmatmul.msk.f32.vlgmr.msrb.gmra.mxu3 %vm183_vm6, %v1378_v9 }
0x2596   :  { %1647 = vmatpush.msrb.mxu3 %v4121_v3 }
0x2598   :  { %1648 = vmatpush.msrb.mxu3 %v4127_v6 }
0x259a   :  { %1649 = vmatpush.msrb.mxu3 %v4133_v41 }
0x259c   :  { %1650 = vmatpush.msrb.mxu3 %v4139_v61 }
0x2618   :  { %v1398_v59 = vpop.f32.mrf.mxu3 }
0x2619   :  { %v1399_v2 = vadd.f32 %v4169_v19, %v1398_v59 }
0x261b   :  { %1422 = vrot.lane.b32.xlu0 %v1399_v2, %s3499_s19  ;;  %v1401_v26 = vadd.f32 %v1399_v2, %v166_v11 }
0x261d   :  { %v1402_v27 = vsub.f32 0.0, %v1401_v26 }
0x261f   :  { %v1403_v28 = vmul.f32 1.442695, %v1402_v27 }
0x2621   :  { %3288 = vpow2.f32 %v1403_v28 }
0x2627   :  { %v3289_v29 = vpop.eup %3288 }
0x2628   :  { %v1405_v30 = vadd.f32 1.0, %v3289_v29 }
0x262a   :  { %3290 = vrcp.f32 %v1405_v30  ;;  %v1417_v37 = vand.u32 2147483648, %v1405_v30  ;;  %vm1411_vm0 = vweird.f32 %v1405_v30  ;;  %v1415_v38 = vand.u32 2147483647, %v1405_v30 }
0x262c   :  { %v1418_v34 = vor.u32 1.1754944e-38, %v1417_v37  ;;  %vm1416_vm2 = vcmp.eq.f32.partialorder %v1415_v38, 8.507059e+37 }
0x2630   :  { %v3291_v31 = vpop.eup %3290 }
0x2631   :  { %v1407_v32 = vmul.f32 %v3291_v31, %v1405_v30  ;;  %vm1412_vm15 = vweird.f32 %v3291_v31 }
0x2632   :  { %vm1413_vm1 = vmor %vm1411_vm0, %vm1412_vm15 }
0x2633   :  { %v1408_v33 = vsub.f32 1.0, %v1407_v32 }
0x2635   :  { %v1409_v7 = vmul.f32 %v3291_v31, %v1408_v33 }
0x2637   :  { %v1410_v36 = vadd.f32 %v3291_v31, %v1409_v7 }
0x2639   :  { %v1414_v39 = vsel %vm1413_vm1, %v3291_v31, %v1410_v36 }
0x263a   :  { %v1419_v43 = vsel %vm1416_vm2, %v1418_v34, %v1414_v39 }
0x268d   :  { %v1423_v8 = vpop.permute.xlu0 %1422 }
0x268e   :  { %v1425_v44 = vmul.f32 %v1423_v8, %v1419_v43 }
0x2690   :  { %1427 = vrot.lane.b32.xlu1 %v1425_v44, %s3499_s19 }
0x2702   :  { %v1428_v45 = vpop.permute.xlu1 %1427 }
0x2703   :  { %v1430_v42 = vadd.f32 %v1428_v45, %v166_v11 }
0x2705   :  { %3292 = vtanh.f32 %v1430_v42 }
0x270b   :  { %v3293_v48 = vpop.eup %3292 }
0x270c   :  { %v1432_v49 = vsub.f32 %v1375_v1, %v3293_v48 }
0x270e   :  { %1434 = vrot.lane.b32.xlu2 %v1432_v49, %s3500_s22 }
0x2768   :  { %v1435_v50 = vpop.permute.xlu2 %1434 }
0x2769   :  { %v1437_v57 = vmul.f32 %v1435_v50, %v1419_v43 }
0x276b   :  { %1439 = vrot.lane.b32.xlu0 %v1437_v57, %s3501_s23 }
0x27dd   :  { %v1440_v58 = vpop.permute.xlu0 %1439 }
0x27de   :  { %v4183_v60 = vadd.f32 %v3293_v48, %v1440_v58 }
0x27e0   :  { %1445 = vrot.lane.b32.xlu1 %v4183_v60, %s3499_s19 }
0x2852   :  { %v1446_v63 = vpop.permute.xlu1 %1445 }
0x2853   :  { %3151 = vmatmul.msk.f32.vlgmr.msrb.gmra.mxu0 %vm183_vm6, %v1446_v63 }
0x2854   :  { %1671 = vmatpush.msrb.mxu0 %v4188_v62 }
0x2856   :  { %1672 = vmatpush.msrb.mxu0 %v4191_v16 }
0x2858   :  { %1673 = vmatpush.msrb.mxu0 %v4194_v17 }
0x285a   :  { %1674 = vmatpush.msrb.mxu0 %v4197_v18 }
0x28d0   :  { %v1466_v22 = vpop.f32.mrf.mxu0 }
0x28d1   :  { %v1467_v47 = vadd.f32 %v4203_v23, %v1466_v22 }
0x28d3   :  { %3294 = vtanh.f32 %v1467_v47 }
0x28d9   :  { %v3295_v51 = vpop.eup %3294 }
0x28da   :  { %3152 = vmatmul.msk.f32.vlgmr.msra.gmra.mxu1 %vm183_vm6, %v3295_v51 }
0x28db   :  { %1704 = vmatpush.msra.mxu1 %v4089_v46 }
0x28dd   :  { %1705 = vmatpush.msra.mxu1 %v4095_v35 }
0x28df   :  { %1706 = vmatpush.msra.mxu1 %v4101_v10 }
0x28e1   :  { %1707 = vmatpush.msra.mxu1 %v4107_v40 }
0x2957   :  { %v1490_v52 = vpop.f32.mrf.mxu1 }
0x2958   :  { %v1491_v54 = vadd.f32 %v4214_v53, %v1490_v52 }
0x295a   :  { %3296 = vtanh.f32 %v1491_v54 }
0x2960   :  { %v3297_v55 = vpop.eup %3296 }
0x2961   :  { %3153 = vmatmul.msk.f32.vlgmr.msra.gmra.mxu2 %vm183_vm6, %v3297_v55 }
0x2962   :  { %1728 = vmatpush.msra.mxu2 %v4121_v3 }
0x2964   :  { %1729 = vmatpush.msra.mxu2 %v4127_v6 }
0x2966   :  { %1730 = vmatpush.msra.mxu2 %v4133_v41 }
0x2968   :  { %1731 = vmatpush.msra.mxu2 %v4139_v61 }
0x29e4   :  { %v1514_v24 = vpop.f32.mrf.mxu2 }
0x29e5   :  { %v4230_v1 = vadd.f32 %v4227_v0, %v1514_v24 }
0x29e7   :  { %v1518_v9 = vmul.f32 %v4222_v25, %v4230_v1  ;;  %v1598_v36 = vmul.f32 0.33333334, %v4230_v1 }
0x29e9   :  { %v1519_v59 = vmul.f32 0.33333334, %v1518_v9 }
0x29eb   :  { %1521 = vrot.lane.b32.xlu2 %v1519_v59, %s3499_s19 }
0x2a45   :  { %v1522_v2 = vpop.permute.xlu2 %1521 }
0x2a46   :  { %v1524_v11 = vadd.f32 %v1522_v2, %v4183_v60 }
0x2a48   :  { %1526 = vrot.lane.b32.xlu0 %v1524_v11, %s3499_s19 }
0x2aba   :  { %v1527_v26 = vpop.permute.xlu0 %1526 }
0x2abb   :  { %3154 = vmatmul.msk.f32.vlgmr.msra.gmra.mxu3 %vm183_vm6, %v1527_v26 }
0x2abc   :  { %1752 = vmatpush.msra.mxu3 %v4188_v62 }
0x2abe   :  { %1753 = vmatpush.msra.mxu3 %v4191_v16 }
0x2ac0   :  { %1754 = vmatpush.msra.mxu3 %v4194_v17 }
0x2ac2   :  { %1755 = vmatpush.msra.mxu3 %v4197_v18 }
0x2b3e   :  { %v1547_v27 = vpop.f32.mrf.mxu3 }
0x2b3f   :  { %v1548_v28 = vadd.f32 %v4203_v23, %v1547_v27 }
0x2b41   :  { %3298 = vtanh.f32 %v1548_v28 }
0x2b47   :  { %v3299_v29 = vpop.eup %3298 }
0x2b48   :  { %3155 = vmatmul.msk.f32.vlgmr.msra.gmra.mxu0 %vm183_vm6, %v3299_v29 }
0x2b49   :  { %1788 = vmatpush.msra.mxu0 %v4037_v56 }
0x2b4b   :  { %1789 = vmatpush.msra.mxu0 %v4043_v21 }
0x2b4d   :  { %1790 = vmatpush.msra.mxu0 %v4049_v4 }
0x2b4f   :  { %1791 = vmatpush.msra.mxu0 %v4055_v5 }
0x2bc5   :  { %v1571_v30 = vpop.f32.mrf.mxu0 }
0x2bc6   :  { %v1572_v31 = vadd.f32 %v4214_v53, %v1571_v30 }
0x2bc8   :  { %3300 = vtanh.f32 %v1572_v31 }
0x2bce   :  { %v3301_v32 = vpop.eup %3300 }
0x2bcf   :  { %3156 = vmatmul.msk.f32.vlgmr.msrb.gmra.mxu1 %vm183_vm6, %v3301_v32 }
0x2bd0   :  { %1856 = vmatpush.msrb.mxu1 %v4089_v46 }
0x2bd2   :  { %1857 = vmatpush.msrb.mxu1 %v4095_v35 }
0x2bd4   :  { %1858 = vmatpush.msrb.mxu1 %v4101_v10 }
0x2bd6   :  { %1859 = vmatpush.msrb.mxu1 %v4107_v40 }
0x2c4c   :  { %v1595_v33 = vpop.f32.mrf.mxu1 }
0x2c4d   :  { %v4255_v7 = vadd.f32 %v4227_v0, %v1595_v33 }
0x2c4f   :  { %v1599_v37 = vsub.f32 %v4255_v7, %v1598_v36  ;;  %v1679_v58 = vsub.f32 %v4230_v1, %v4255_v7 }
0x2c51   :  { %v1600_v38 = vmul.f32 %v1599_v37, %v4222_v25 }
0x2c53   :  { %1602 = vrot.lane.b32.xlu1 %v1600_v38, %s3499_s19 }
0x2cc5   :  { %v1603_v39 = vpop.permute.xlu1 %1602 }
0x2cc6   :  { %v1605_v34 = vadd.f32 %v1603_v39, %v4183_v60 }
0x2cc8   :  { %1607 = vrot.lane.b32.xlu2 %v1605_v34, %s3499_s19 }
0x2d22   :  { %v1608_v8 = vpop.permute.xlu2 %1607 }
0x2d23   :  { %3157 = vmatmul.msk.f32.vlgmr.msrb.gmra.mxu2 %vm183_vm6, %v1608_v8 }
0x2d24   :  { %1880 = vmatpush.msrb.mxu2 %v4121_v3 }
0x2d26   :  { %1881 = vmatpush.msrb.mxu2 %v4127_v6 }
0x2d28   :  { %1882 = vmatpush.msrb.mxu2 %v4133_v41 }
0x2d2a   :  { %1883 = vmatpush.msrb.mxu2 %v4139_v61 }
0x2da6   :  { %v1628_v43 = vpop.f32.mrf.mxu2 }
0x2da7   :  { %v1629_v44 = vadd.f32 %v4203_v23, %v1628_v43 }
0x2da9   :  { %3302 = vtanh.f32 %v1629_v44 }
0x2daf   :  { %v3303_v45 = vpop.eup %3302 }
0x2db0   :  { %3158 = vmatmul.msk.f32.vlgmr.msrb.gmra.mxu3 %vm183_vm6, %v3303_v45 }
0x2db1   :  { %1904 = vmatpush.msrb.mxu3 %v4188_v62 }
0x2db3   :  { %1905 = vmatpush.msrb.mxu3 %v4191_v16 }
0x2db5   :  { %1906 = vmatpush.msrb.mxu3 %v4194_v17 }
0x2db7   :  { %1907 = vmatpush.msrb.mxu3 %v4197_v18 }
0x2e33   :  { %v1652_v42 = vpop.f32.mrf.mxu3 }
0x2e34   :  { %v1653_v48 = vadd.f32 %v4214_v53, %v1652_v42 }
0x2e36   :  { %3304 = vtanh.f32 %v1653_v48 }
0x2e3c   :  { %v3305_v49 = vpop.eup %3304 }
0x2e3d   :  { %3159 = vmatmul.msk.f32.vlgmr.msrb.gmra.mxu0 %vm183_vm6, %v3305_v49 }
0x2e3e   :  { %1937 = vmatpush.msrb.mxu0 %v4089_v46 }
0x2e40   :  { %1938 = vmatpush.msrb.mxu0 %v4095_v35 }
0x2e42   :  { %1939 = vmatpush.msrb.mxu0 %v4101_v10 }
0x2e44   :  { %1940 = vmatpush.msrb.mxu0 %v4107_v40 }
0x2eba   :  { %v1676_v50 = vpop.f32.mrf.mxu0 }
0x2ebb   :  { %v1677_v57 = vadd.f32 %v4227_v0, %v1676_v50 }
0x2ebd   :  { %v1680_v63 = vadd.f32 %v1679_v58, %v1677_v57  ;;  %v1760_v11 = vadd.f32 %v1677_v57, %v4255_v7 }
0x2ebf   :  { %v1681_v22 = vmul.f32 %v1680_v63, %v4222_v25  ;;  %v1761_v26 = vmul.f32 3.0, %v1760_v11 }
0x2ec1   :  { %1683 = vrot.lane.b32.xlu0 %v1681_v22, %s3499_s19  ;;  %v1762_v29 = vadd.f32 %v1761_v26, %v4230_v1 }
0x2f33   :  { %v1684_v47 = vpop.permute.xlu0 %1683 }
0x2f34   :  { %v1686_v51 = vadd.f32 %v1684_v47, %v4183_v60 }
0x2f36   :  { %1688 = vrot.lane.b32.xlu1 %v1686_v51, %s3499_s19 }
0x2fa8   :  { %v1689_v52 = vpop.permute.xlu1 %1688 }
0x2fa9   :  { %3160 = vmatmul.msk.f32.vlgmr.msra.gmra.mxu1 %vm183_vm6, %v1689_v52 }
0x2faa   :  { %1961 = vmatpush.msra.mxu1 %v4121_v3 }
0x2fac   :  { %1962 = vmatpush.msra.mxu1 %v4127_v6 }
0x2fae   :  { %1963 = vmatpush.msra.mxu1 %v4133_v41 }
0x2fb0   :  { %1964 = vmatpush.msra.mxu1 %v4139_v61 }
0x3026   :  { %v1709_v54 = vpop.f32.mrf.mxu1 }
0x3027   :  { %v1710_v55 = vadd.f32 %v4203_v23, %v1709_v54 }
0x3029   :  { %3306 = vtanh.f32 %v1710_v55 }
0x302f   :  { %v3307_v24 = vpop.eup %3306 }
0x3030   :  { %3161 = vmatmul.msk.f32.vlgmr.msra.gmra.mxu2 %vm183_vm6, %v3307_v24 }
0x3031   :  { %1985 = vmatpush.msra.mxu2 %v4188_v62 }
0x3033   :  { %1986 = vmatpush.msra.mxu2 %v4191_v16 }
0x3035   :  { %1987 = vmatpush.msra.mxu2 %v4194_v17 }
0x3037   :  { %1988 = vmatpush.msra.mxu2 %v4197_v18 }
0x30b3   :  { %v1733_v9 = vpop.f32.mrf.mxu2 }
0x30b4   :  { %v1734_v59 = vadd.f32 %v4214_v53, %v1733_v9 }
0x30b6   :  { %3308 = vtanh.f32 %v1734_v59 }
0x30bc   :  { %v3309_v2 = vpop.eup %3308 }
0x30bd   :  { %3162 = vmatmul.msk.f32.vlgmr.msra.gmra.mxu3 %vm183_vm6, %v3309_v2 }
0x30be   :  { %2018 = vmatpush.msra.mxu3 %v4089_v46 }
0x30c0   :  { %2019 = vmatpush.msra.mxu3 %v4095_v35 }
0x30c2   :  { %2020 = vmatpush.msra.mxu3 %v4101_v10 }
0x30c4   :  { %2021 = vmatpush.msra.mxu3 %v4107_v40 }
0x3140   :  { %v1757_v27 = vpop.f32.mrf.mxu3 }
0x3141   :  { %v1758_v28 = vadd.f32 %v4227_v0, %v1757_v27 }
0x3143   :  { %v1763_v30 = vadd.f32 %v1762_v29, %v1758_v28 }
0x3145   :  { %v1764_v31 = vmul.f32 %v1763_v30, %v4222_v25 }
0x3147   :  { %v1765_v32 = vmul.f32 0.125, %v1764_v31 }
0x3149   :  { %1767 = vrot.lane.b32.xlu2 %v1765_v32, %s3499_s19  ;;  %v4344_v32 = vstv %s3164_s29 }
0x31a3   :  { %v1768_v33 = vpop.permute.xlu2 %1767 }
0x31a4   :  { %v1770_v36 = vadd.f32 %v1768_v33, %v4183_v60  ;;  %v169_v60 = vadd.f32 %v4176_v20, %v3964_v12 }
0x31a6   :  { %1772 = vrot.lane.b32.xlu0 %v1770_v36, %s3499_s19 }
0x3218   :  { %v1773_v37 = vpop.permute.xlu0 %1772 }
0x3219   :  { %3163 = vmatmul.msk.f32.vlgmr.msra.gmra.mxu0 %vm183_vm6, %v1773_v37 }
0x321a   :  { %2042 = vmatpush.msra.mxu0 %v4121_v3 }
0x321c   :  { %2043 = vmatpush.msra.mxu0 %v4127_v6 }
0x321e   :  { %2044 = vmatpush.msra.mxu0 %v4133_v41 }
0x3220   :  { %2045 = vmatpush.msra.mxu0 %v4139_v61 }
0x3296   :  { %v1793_v25 = vpop.f32.mrf.mxu0 }
0x3297   :  { %v1794_v1 = vadd.f32 %v4169_v19, %v1793_v25 }
0x3299   :  { %1817 = vrot.lane.b32.xlu1 %v1794_v1, %s3499_s19  ;;  %v1796_v7 = vadd.f32 %v1794_v1, %v169_v60 }
0x329b   :  { %v1797_v38 = vsub.f32 0.0, %v1796_v7 }
0x329d   :  { %v1798_v39 = vmul.f32 1.442695, %v1797_v38 }
0x329f   :  { %3310 = vpow2.f32 %v1798_v39 }
0x32a5   :  { %v3311_v34 = vpop.eup %3310 }
0x32a6   :  { %v1800_v8 = vadd.f32 1.0, %v3311_v34 }
0x32a8   :  { %3312 = vrcp.f32 %v1800_v8  ;;  %v1812_v49 = vand.u32 2147483648, %v1800_v8  ;;  %vm1806_vm4 = vweird.f32 %v1800_v8  ;;  %v1810_v50 = vand.u32 2147483647, %v1800_v8 }
0x32aa   :  { %v1813_v58 = vor.u32 1.1754944e-38, %v1812_v49  ;;  %vm1811_vm7 = vcmp.eq.f32.partialorder %v1810_v50, 8.507059e+37 }
0x32ae   :  { %v3313_v43 = vpop.eup %3312 }
0x32af   :  { %v1802_v44 = vmul.f32 %v3313_v43, %v1800_v8  ;;  %vm1807_vm3 = vweird.f32 %v3313_v43 }
0x32b0   :  { %vm1808_vm5 = vmor %vm1806_vm4, %vm1807_vm3  ;;  %vm3056_vm4 = vcmask 64512  }
0x32b1   :  { %v1803_v45 = vsub.f32 1.0, %v1802_v44 }
0x32b3   :  { %v1804_v42 = vmul.f32 %v3313_v43, %v1803_v45 }
0x32b5   :  { %v1805_v48 = vadd.f32 %v3313_v43, %v1804_v42 }
0x32b7   :  { %v1809_v57 = vsel %vm1808_vm5, %v3313_v43, %v1805_v48 }
0x32b8   :  { %v1814_v63 = vsel %vm1811_vm7, %v1813_v58, %v1809_v57 }
0x330b   :  { %v1818_v12 = vpop.permute.xlu1 %1817 }
0x330c   :  { %v1820_v22 = vmul.f32 %v1818_v12, %v1814_v63 }
0x330e   :  { %1822 = vrot.lane.b32.xlu2 %v1820_v22, %s3499_s19 }
0x3368   :  { %v1823_v47 = vpop.permute.xlu2 %1822 }
0x3369   :  { %v1825_v51 = vadd.f32 %v1823_v47, %v169_v60 }
0x336b   :  { %3314 = vtanh.f32 %v1825_v51 }
0x3371   :  { %v3315_v52 = vpop.eup %3314 }
0x3372   :  { %v1827_v54 = vsub.f32 %v1770_v36, %v3315_v52 }
0x3374   :  { %1829 = vrot.lane.b32.xlu0 %v1827_v54, %s3500_s22 }
0x33e6   :  { %v1830_v55 = vpop.permute.xlu0 %1829 }
0x33e7   :  { %v1832_v24 = vmul.f32 %v1830_v55, %v1814_v63 }
0x33e9   :  { %1834 = vrot.lane.b32.xlu1 %v1832_v24, %s3501_s23 }
0x345b   :  { %v1835_v9 = vpop.permute.xlu1 %1834 }
0x345c   :  { %v4323_v59 = vadd.f32 %v3315_v52, %v1835_v9 }
0x345e   :  { %1840 = vrot.lane.b32.xlu2 %v4323_v59, %s3499_s19 }
0x34b8   :  { %v1841_v2 = vpop.permute.xlu2 %1840 }
0x34b9   :  { %3165 = vmatmul.msk.f32.vlgmr.msrb.gmra.mxu1 %vm183_vm6, %v1841_v2 }
0x34ba   :  { %2066 = vmatpush.msrb.mxu1 %v4188_v62 }
0x34bc   :  { %2067 = vmatpush.msrb.mxu1 %v4191_v16 }
0x34be   :  { %2068 = vmatpush.msrb.mxu1 %v4194_v17 }
0x34c0   :  { %2069 = vmatpush.msrb.mxu1 %v4197_v18 }
0x3536   :  { %v1861_v11 = vpop.f32.mrf.mxu1 }
0x3537   :  { %v1862_v26 = vadd.f32 %v4203_v23, %v1861_v11 }
0x3539   :  { %3316 = vtanh.f32 %v1862_v26 }
0x353f   :  { %v3317_v27 = vpop.eup %3316 }
0x3540   :  { %3166 = vmatmul.msk.f32.vlgmr.msrb.gmra.mxu2 %vm183_vm6, %v3317_v27 }
0x3541   :  { %2099 = vmatpush.msrb.mxu2 %v4089_v46 }
0x3543   :  { %2100 = vmatpush.msrb.mxu2 %v4095_v35 }
0x3545   :  { %2101 = vmatpush.msrb.mxu2 %v4101_v10 }
0x3547   :  { %2102 = vmatpush.msrb.mxu2 %v4107_v40 }
0x35c3   :  { %v1885_v28 = vpop.f32.mrf.mxu2 }
0x35c4   :  { %v1886_v29 = vadd.f32 %v4214_v53, %v1885_v28 }
0x35c6   :  { %3318 = vtanh.f32 %v1886_v29 }
0x35cc   :  { %v3319_v30 = vpop.eup %3318 }
0x35cd   :  { %3167 = vmatmul.msk.f32.vlgmr.msrb.gmra.mxu3 %vm183_vm6, %v3319_v30 }
0x35ce   :  { %2123 = vmatpush.msrb.mxu3 %v4121_v3 }
0x35d0   :  { %2124 = vmatpush.msrb.mxu3 %v4127_v6 }
0x35d2   :  { %2125 = vmatpush.msrb.mxu3 %v4133_v41 }
0x35d4   :  { %2126 = vmatpush.msrb.mxu3 %v4139_v61 }
0x3650   :  { %v1909_v31 = vpop.f32.mrf.mxu3 }
0x3651   :  { %v4347_v33 = vadd.f32 %v4227_v0, %v1909_v31 }
0x3653   :  { %v1913_v36 = vmul.f32 %v4344_v32, %v4347_v33 }
0x3655   :  { %v1914_v37 = vmul.f32 0.33333334, %v1913_v36 }
0x3657   :  { %1916 = vrot.lane.b32.xlu0 %v1914_v37, %s3499_s19 }
0x36c9   :  { %v1917_v25 = vpop.permute.xlu0 %1916 }
0x36ca   :  { %v1919_v1 = vadd.f32 %v1917_v25, %v4323_v59 }
0x36cc   :  { %1921 = vrot.lane.b32.xlu1 %v1919_v1, %s3499_s19 }
0x373e   :  { %v1922_v60 = vpop.permute.xlu1 %1921 }
0x373f   :  { %3168 = vmatmul.msk.f32.vlgmr.msrb.gmra.mxu0 %vm183_vm6, %v1922_v60 }
0x3740   :  { %2147 = vmatpush.msrb.mxu0 %v4188_v62 }
0x3742   :  { %2148 = vmatpush.msrb.mxu0 %v4191_v16 }
0x3744   :  { %2149 = vmatpush.msrb.mxu0 %v4194_v17 }
0x3746   :  { %2150 = vmatpush.msrb.mxu0 %v4197_v18 }
0x37bc   :  { %v1942_v7 = vpop.f32.mrf.mxu0 }
0x37bd   :  { %v1943_v38 = vadd.f32 %v4203_v23, %v1942_v7 }
0x37bf   :  { %3320 = vtanh.f32 %v1943_v38 }
0x37c5   :  { %v3321_v39 = vpop.eup %3320 }
0x37c6   :  { %3169 = vmatmul.msk.f32.vlgmr.msra.gmra.mxu1 %vm183_vm6, %v3321_v39 }
0x37c7   :  { %2183 = vmatpush.msra.mxu1 %v4037_v56 }
0x37c9   :  { %2184 = vmatpush.msra.mxu1 %v4043_v21 }
0x37cb   :  { %2185 = vmatpush.msra.mxu1 %v4049_v4  ;;  %v1993_v4 = vmul.f32 0.33333334, %v4347_v33 }
0x37cd   :  { %2186 = vmatpush.msra.mxu1 %v4055_v5 }
0x3843   :  { %v1966_v34 = vpop.f32.mrf.mxu1 }
0x3844   :  { %v1967_v8 = vadd.f32 %v4214_v53, %v1966_v34 }
0x3846   :  { %3322 = vtanh.f32 %v1967_v8 }
0x384c   :  { %v3323_v43 = vpop.eup %3322 }
0x384d   :  { %3170 = vmatmul.msk.f32.vlgmr.msra.gmra.mxu2 %vm183_vm6, %v3323_v43 }
0x384e   :  { %2251 = vmatpush.msra.mxu2 %v4089_v46 }
0x3850   :  { %2252 = vmatpush.msra.mxu2 %v4095_v35 }
0x3852   :  { %2253 = vmatpush.msra.mxu2 %v4101_v10 }
0x3854   :  { %2254 = vmatpush.msra.mxu2 %v4107_v40 }
0x38d0   :  { %v1990_v56 = vpop.f32.mrf.mxu2 }
0x38d1   :  { %v4372_v21 = vadd.f32 %v4227_v0, %v1990_v56 }
0x38d3   :  { %v1994_v5 = vsub.f32 %v4372_v21, %v1993_v4  ;;  %v2074_v51 = vsub.f32 %v4347_v33, %v4372_v21 }
0x38d5   :  { %v1995_v44 = vmul.f32 %v1994_v5, %v4344_v32 }
0x38d7   :  { %1997 = vrot.lane.b32.xlu2 %v1995_v44, %s3499_s19 }
0x3931   :  { %v1998_v45 = vpop.permute.xlu2 %1997 }
0x3932   :  { %v2000_v42 = vadd.f32 %v1998_v45, %v4323_v59 }
0x3934   :  { %2002 = vrot.lane.b32.xlu0 %v2000_v42, %s3499_s19 }
0x39a6   :  { %v2003_v48 = vpop.permute.xlu0 %2002 }
0x39a7   :  { %3171 = vmatmul.msk.f32.vlgmr.msra.gmra.mxu3 %vm183_vm6, %v2003_v48 }
0x39a8   :  { %2275 = vmatpush.msra.mxu3 %v4121_v3 }
0x39aa   :  { %2276 = vmatpush.msra.mxu3 %v4127_v6 }
0x39ac   :  { %2277 = vmatpush.msra.mxu3 %v4133_v41 }
0x39ae   :  { %2278 = vmatpush.msra.mxu3 %v4139_v61 }
0x3a2a   :  { %v2023_v49 = vpop.f32.mrf.mxu3 }
0x3a2b   :  { %v2024_v50 = vadd.f32 %v4203_v23, %v2023_v49 }
0x3a2d   :  { %3324 = vtanh.f32 %v2024_v50 }
0x3a33   :  { %v3325_v57 = vpop.eup %3324 }
0x3a34   :  { %3172 = vmatmul.msk.f32.vlgmr.msra.gmra.mxu0 %vm183_vm6, %v3325_v57 }
0x3a35   :  { %2299 = vmatpush.msra.mxu0 %v4188_v62 }
0x3a37   :  { %2300 = vmatpush.msra.mxu0 %v4191_v16 }
0x3a39   :  { %2301 = vmatpush.msra.mxu0 %v4194_v17 }
0x3a3b   :  { %2302 = vmatpush.msra.mxu0 %v4197_v18 }
0x3ab1   :  { %v2047_v58 = vpop.f32.mrf.mxu0 }
0x3ab2   :  { %v2048_v12 = vadd.f32 %v4214_v53, %v2047_v58 }
0x3ab4   :  { %3326 = vtanh.f32 %v2048_v12 }
0x3aba   :  { %v3327_v63 = vpop.eup %3326 }
0x3abb   :  { %3173 = vmatmul.msk.f32.vlgmr.msrb.gmra.mxu1 %vm183_vm6, %v3327_v63 }
0x3abc   :  { %2332 = vmatpush.msrb.mxu1 %v4089_v46 }
0x3abe   :  { %2333 = vmatpush.msrb.mxu1 %v4095_v35 }
0x3ac0   :  { %2334 = vmatpush.msrb.mxu1 %v4101_v10 }
0x3ac2   :  { %2335 = vmatpush.msrb.mxu1 %v4107_v40 }
0x3b38   :  { %v2071_v22 = vpop.f32.mrf.mxu1 }
0x3b39   :  { %v2072_v47 = vadd.f32 %v4227_v0, %v2071_v22 }
0x3b3b   :  { %v2075_v52 = vadd.f32 %v2074_v51, %v2072_v47  ;;  %v2155_v30 = vadd.f32 %v2072_v47, %v4372_v21 }
0x3b3d   :  { %v2076_v54 = vmul.f32 %v2075_v52, %v4344_v32  ;;  %v2156_v31 = vmul.f32 3.0, %v2155_v30 }
0x3b3f   :  { %2078 = vrot.lane.b32.xlu1 %v2076_v54, %s3499_s19  ;;  %v2157_v25 = vadd.f32 %v2156_v31, %v4347_v33 }
0x3bb1   :  { %v2079_v55 = vpop.permute.xlu1 %2078 }
0x3bb2   :  { %v2081_v24 = vadd.f32 %v2079_v55, %v4323_v59 }
0x3bb4   :  { %2083 = vrot.lane.b32.xlu2 %v2081_v24, %s3499_s19 }
0x3c0e   :  { %v2084_v9 = vpop.permute.xlu2 %2083 }
0x3c0f   :  { %3174 = vmatmul.msk.f32.vlgmr.msrb.gmra.mxu2 %vm183_vm6, %v2084_v9 }
0x3c10   :  { %2356 = vmatpush.msrb.mxu2 %v4121_v3 }
0x3c12   :  { %2357 = vmatpush.msrb.mxu2 %v4127_v6 }
0x3c14   :  { %2358 = vmatpush.msrb.mxu2 %v4133_v41 }
0x3c16   :  { %2359 = vmatpush.msrb.mxu2 %v4139_v61 }
0x3c92   :  { %v2104_v2 = vpop.f32.mrf.mxu2 }
0x3c93   :  { %v2105_v11 = vadd.f32 %v4203_v23, %v2104_v2 }
0x3c95   :  { %3328 = vtanh.f32 %v2105_v11 }
0x3c9b   :  { %v3329_v26 = vpop.eup %3328 }
0x3c9c   :  { %3175 = vmatmul.msk.f32.vlgmr.msrb.gmra.mxu3 %vm183_vm6, %v3329_v26 }
0x3c9d   :  { %2380 = vmatpush.msrb.mxu3 %v4188_v62 }
0x3c9f   :  { %2381 = vmatpush.msrb.mxu3 %v4191_v16 }
0x3ca1   :  { %2382 = vmatpush.msrb.mxu3 %v4194_v17 }
0x3ca3   :  { %2383 = vmatpush.msrb.mxu3 %v4197_v18 }
0x3d1f   :  { %v2128_v27 = vpop.f32.mrf.mxu3 }
0x3d20   :  { %v2129_v28 = vadd.f32 %v4214_v53, %v2128_v27 }
0x3d22   :  { %3330 = vtanh.f32 %v2129_v28 }
0x3d28   :  { %v3331_v29 = vpop.eup %3330 }
0x3d29   :  { %3176 = vmatmul.msk.f32.vlgmr.msrb.gmra.mxu0 %vm183_vm6, %v3331_v29 }
0x3d2a   :  { %2413 = vmatpush.msrb.mxu0 %v4089_v46 }
0x3d2c   :  { %2414 = vmatpush.msrb.mxu0 %v4095_v35 }
0x3d2e   :  { %2415 = vmatpush.msrb.mxu0 %v4101_v10 }
0x3d30   :  { %2416 = vmatpush.msrb.mxu0 %v4107_v40 }
0x3da6   :  { %v2152_v36 = vpop.f32.mrf.mxu0 }
0x3da7   :  { %v2153_v37 = vadd.f32 %v4227_v0, %v2152_v36  ;;  %v4481_v36 = vld [vmem:[%s4741_s4 + $0x18] sm:$0xff] }
0x3da9   :  { %v2158_v1 = vadd.f32 %v2157_v25, %v2153_v37  ;;  %v4487_v37 = vld [vmem:[%s4741_s4 + $0x10] sm:$0xff]  ;;  %v4493_v25 = vld [vmem:[%s4741_s4 + $0x8] sm:$0xff] }
0x3dab   :  { %v2159_v60 = vmul.f32 %v2158_v1, %v4344_v32  ;;  %v4499_v1 = vld [vmem:[%s4741_s4] sm:$0xff] }
0x3dad   :  { %v2160_v7 = vmul.f32 0.125, %v2159_v60 }
0x3daf   :  { %2162 = vrot.lane.b32.xlu0 %v2160_v7, %s3499_s19 }
0x3e21   :  { %v2163_v38 = vpop.permute.xlu0 %2162 }
0x3e22   :  { %v2165_v39 = vadd.f32 %v2163_v38, %v4323_v59  ;;  %v172_v59 = vadd.f32 %v4176_v20, %v3966_v13 }
0x3e24   :  { %2167 = vrot.lane.b32.xlu1 %v2165_v39, %s3499_s19 }
0x3e96   :  { %v2168_v34 = vpop.permute.xlu1 %2167 }
0x3e97   :  { %3177 = vmatmul.msk.f32.vlgmr.msra.gmra.mxu1 %vm183_vm6, %v2168_v34  ;;  %v4513_v34 = vld [vmem:[%s4743_s6 + $0x10] sm:$0xff] }
0x3e98   :  { %2437 = vmatpush.msra.mxu1 %v4121_v3 }
0x3e9a   :  { %2438 = vmatpush.msra.mxu1 %v4127_v6 }
0x3e9c   :  { %2439 = vmatpush.msra.mxu1 %v4133_v41 }
0x3e9e   :  { %2440 = vmatpush.msra.mxu1 %v4139_v61 }
0x3f14   :  { %v2188_v32 = vpop.f32.mrf.mxu1 }
0x3f15   :  { %v2189_v33 = vadd.f32 %v4169_v19, %v2188_v32  ;;  %v4519_v32 = vld [vmem:[%s4743_s6 + $0x8] sm:$0xff] }
0x3f17   :  { %2212 = vrot.lane.b32.xlu2 %v2189_v33, %s3499_s19  ;;  %v2191_v8 = vadd.f32 %v2189_v33, %v172_v59  ;;  %v4525_v33 = vld [vmem:[%s4743_s6] sm:$0xff] }
0x3f19   :  { %v2192_v43 = vsub.f32 0.0, %v2191_v8 }
0x3f1b   :  { %v2193_v56 = vmul.f32 1.442695, %v2192_v43 }
0x3f1d   :  { %3332 = vpow2.f32 %v2193_v56 }
0x3f23   :  { %v3333_v21 = vpop.eup %3332 }
0x3f24   :  { %v2195_v4 = vadd.f32 1.0, %v3333_v21 }
0x3f26   :  { %3334 = vrcp.f32 %v2195_v4  ;;  %v2207_v49 = vand.u32 2147483648, %v2195_v4  ;;  %vm2201_vm9 = vweird.f32 %v2195_v4  ;;  %v2205_v19 = vand.u32 2147483647, %v2195_v4 }
0x3f28   :  { %v2208_v57 = vor.u32 1.1754944e-38, %v2207_v49  ;;  %vm2206_vm11 = vcmp.eq.f32.partialorder %v2205_v19, 8.507059e+37  ;;  %v4559_v49 = vld [vmem:[%s4745_s8] sm:$0xff] }
0x3f2c   :  { %v3335_v5 = vpop.eup %3334 }
0x3f2d   :  { %v2197_v44 = vmul.f32 %v3335_v5, %v2195_v4  ;;  %vm2202_vm8 = vweird.f32 %v3335_v5 }
0x3f2e   :  { %vm2203_vm10 = vmor %vm2201_vm9, %vm2202_vm8 }
0x3f2f   :  { %v2198_v45 = vsub.f32 1.0, %v2197_v44 }
0x3f31   :  { %v2199_v42 = vmul.f32 %v3335_v5, %v2198_v45  ;;  %v4541_v45 = vld [vmem:[%s4745_s8 + $0x18] sm:$0xff] }
0x3f33   :  { %v2200_v48 = vadd.f32 %v3335_v5, %v2199_v42  ;;  %v4547_v42 = vld [vmem:[%s4745_s8 + $0x10] sm:$0xff] }
0x3f35   :  { %v2204_v50 = vsel %vm2203_vm10, %v3335_v5, %v2200_v48  ;;  %v4553_v48 = vld [vmem:[%s4745_s8 + $0x8] sm:$0xff] }
0x3f36   :  { %v2209_v20 = vsel %vm2206_vm11, %v2208_v57, %v2204_v50 }
0x3f71   :  { %v2213_v13 = vpop.permute.xlu2 %2212 }
0x3f72   :  { %v2215_v58 = vmul.f32 %v2213_v13, %v2209_v20 }
0x3f74   :  { %2217 = vrot.lane.b32.xlu0 %v2215_v58, %s3499_s19 }
0x3fe6   :  { %v2218_v12 = vpop.permute.xlu0 %2217 }
0x3fe7   :  { %v2220_v63 = vadd.f32 %v2218_v12, %v172_v59 }
0x3fe9   :  { %3336 = vtanh.f32 %v2220_v63 }
0x3fef   :  { %v3337_v22 = vpop.eup %3336 }
0x3ff0   :  { %v2222_v47 = vsub.f32 %v2165_v39, %v3337_v22  ;;  %v4507_v39 = vld [vmem:[%s4743_s6 + $0x18] sm:$0xff] }
0x3ff2   :  { %2224 = vrot.lane.b32.xlu1 %v2222_v47, %s3500_s22 }
0x4064   :  { %v2225_v51 = vpop.permute.xlu1 %2224 }
0x4065   :  { %v2227_v52 = vmul.f32 %v2225_v51, %v2209_v20 }
0x4067   :  { %2229 = vrot.lane.b32.xlu2 %v2227_v52, %s3501_s23 }
0x40c1   :  { %v2230_v54 = vpop.permute.xlu2 %2229 }
0x40c2   :  { %v4440_v55 = vadd.f32 %v3337_v22, %v2230_v54 }
0x40c4   :  { %2235 = vrot.lane.b32.xlu0 %v4440_v55, %s3499_s19 }
0x4136   :  { %v2236_v24 = vpop.permute.xlu0 %2235 }
0x4137   :  { %3179 = vmatmul.msk.f32.vlgmr.msra.gmra.mxu2 %vm183_vm6, %v2236_v24 }
0x4138   :  { %2461 = vmatpush.msra.mxu2 %v4188_v62 }
0x413a   :  { %2462 = vmatpush.msra.mxu2 %v4191_v16 }
0x413c   :  { %2463 = vmatpush.msra.mxu2 %v4194_v17 }
0x413e   :  { %2464 = vmatpush.msra.mxu2 %v4197_v18 }
0x41ba   :  { %v2256_v9 = vpop.f32.mrf.mxu2 }
0x41bb   :  { %v2257_v2 = vadd.f32 %v4203_v23, %v2256_v9 }
0x41bd   :  { %3338 = vtanh.f32 %v2257_v2 }
0x41c3   :  { %v3339_v11 = vpop.eup %3338 }
0x41c4   :  { %3180 = vmatmul.msk.f32.vlgmr.msra.gmra.mxu3 %vm183_vm6, %v3339_v11 }
0x41c5   :  { %2494 = vmatpush.msra.mxu3 %v4089_v46 }
0x41c7   :  { %2495 = vmatpush.msra.mxu3 %v4095_v35  ;;  %v4461_v35 = vstv %s3178_s30 }
0x41c9   :  { %2496 = vmatpush.msra.mxu3 %v4101_v10 }
0x41cb   :  { %2497 = vmatpush.msra.mxu3 %v4107_v40 }
0x4247   :  { %v2280_v26 = vpop.f32.mrf.mxu3 }
0x4248   :  { %v2281_v27 = vadd.f32 %v4214_v53, %v2280_v26 }
0x424a   :  { %3340 = vtanh.f32 %v2281_v27 }
0x4250   :  { %v3341_v28 = vpop.eup %3340 }
0x4251   :  { %3181 = vmatmul.msk.f32.vlgmr.msra.gmra.mxu0 %vm183_vm6, %v3341_v28 }
0x4252   :  { %2518 = vmatpush.msra.mxu0 %v4121_v3 }
0x4254   :  { %2519 = vmatpush.msra.mxu0 %v4127_v6 }
0x4256   :  { %2520 = vmatpush.msra.mxu0 %v4133_v41 }
0x4258   :  { %2521 = vmatpush.msra.mxu0 %v4139_v61 }
0x42ce   :  { %v2304_v46 = vpop.f32.mrf.mxu0 }
0x42cf   :  { %v4464_v10 = vadd.f32 %v4227_v0, %v2304_v46 }
0x42d1   :  { %v2308_v40 = vmul.f32 %v4461_v35, %v4464_v10  ;;  %v2388_v43 = vmul.f32 0.33333334, %v4464_v10 }
0x42d3   :  { %v2309_v29 = vmul.f32 0.33333334, %v2308_v40 }
0x42d5   :  { %2311 = vrot.lane.b32.xlu1 %v2309_v29, %s3499_s19 }
0x4347   :  { %v2312_v3 = vpop.permute.xlu1 %2311 }
0x4348   :  { %v2314_v6 = vadd.f32 %v2312_v3, %v4440_v55 }
0x434a   :  { %2316 = vrot.lane.b32.xlu2 %v2314_v6, %s3499_s19 }
0x43a4   :  { %v2317_v41 = vpop.permute.xlu2 %2316 }
0x43a5   :  { %3182 = vmatmul.msk.f32.vlgmr.msrb.gmra.mxu1 %vm183_vm6, %v2317_v41 }
0x43a6   :  { %2542 = vmatpush.msrb.mxu1 %v4188_v62 }
0x43a8   :  { %2543 = vmatpush.msrb.mxu1 %v4191_v16 }
0x43aa   :  { %2544 = vmatpush.msrb.mxu1 %v4194_v17 }
0x43ac   :  { %2545 = vmatpush.msrb.mxu1 %v4197_v18 }
0x4422   :  { %v2337_v61 = vpop.f32.mrf.mxu1 }
0x4423   :  { %v2338_v30 = vadd.f32 %v4203_v23, %v2337_v61 }
0x4425   :  { %3342 = vtanh.f32 %v2338_v30 }
0x442b   :  { %v3343_v31 = vpop.eup %3342 }
0x442c   :  { %3183 = vmatmul.msk.f32.vlgmr.msrb.gmra.mxu2 %vm183_vm6, %v3343_v31 }
0x442d   :  { %2578 = vmatpush.msrb.mxu2 %v4481_v36 }
0x442f   :  { %2579 = vmatpush.msrb.mxu2 %v4487_v37 }
0x4431   :  { %2580 = vmatpush.msrb.mxu2 %v4493_v25 }
0x4433   :  { %2581 = vmatpush.msrb.mxu2 %v4499_v1 }
0x44af   :  { %v2361_v60 = vpop.f32.mrf.mxu2 }
0x44b0   :  { %v2362_v7 = vadd.f32 %v4214_v53, %v2361_v60 }
0x44b2   :  { %3344 = vtanh.f32 %v2362_v7 }
0x44b8   :  { %v3345_v38 = vpop.eup %3344 }
0x44b9   :  { %3184 = vmatmul.msk.f32.vlgmr.msrb.gmra.mxu3 %vm183_vm6, %v3345_v38 }
0x44ba   :  { %2646 = vmatpush.msrb.mxu3 %v4507_v39 }
0x44bc   :  { %2647 = vmatpush.msrb.mxu3 %v4513_v34 }
0x44be   :  { %2648 = vmatpush.msrb.mxu3 %v4519_v32 }
0x44c0   :  { %2649 = vmatpush.msrb.mxu3 %v4525_v33 }
0x453c   :  { %v2385_v59 = vpop.f32.mrf.mxu3 }
0x453d   :  { %v4529_v8 = vadd.f32 %v4227_v0, %v2385_v59 }
0x453f   :  { %v2389_v56 = vsub.f32 %v4529_v8, %v2388_v43  ;;  %v2469_v22 = vsub.f32 %v4464_v10, %v4529_v8 }
0x4541   :  { %v2390_v21 = vmul.f32 %v2389_v56, %v4461_v35 }
0x4543   :  { %2392 = vrot.lane.b32.xlu0 %v2390_v21, %s3499_s19 }
0x45b5   :  { %v2393_v4 = vpop.permute.xlu0 %2392 }
0x45b6   :  { %v2395_v5 = vadd.f32 %v2393_v4, %v4440_v55 }
0x45b8   :  { %2397 = vrot.lane.b32.xlu1 %v2395_v5, %s3499_s19 }
0x462a   :  { %v2398_v44 = vpop.permute.xlu1 %2397 }
0x462b   :  { %3185 = vmatmul.msk.f32.vlgmr.msrb.gmra.mxu0 %vm183_vm6, %v2398_v44 }
0x462c   :  { %2670 = vmatpush.msrb.mxu0 %v4541_v45 }
0x462e   :  { %2671 = vmatpush.msrb.mxu0 %v4547_v42 }
0x4630   :  { %2672 = vmatpush.msrb.mxu0 %v4553_v48 }
0x4632   :  { %2673 = vmatpush.msrb.mxu0 %v4559_v49 }
0x46a8   :  { %v2418_v19 = vpop.f32.mrf.mxu0 }
0x46a9   :  { %v2419_v50 = vadd.f32 %v4203_v23, %v2418_v19 }
0x46ab   :  { %3346 = vtanh.f32 %v2419_v50 }
0x46b1   :  { %v3347_v57 = vpop.eup %3346 }
0x46b2   :  { %3186 = vmatmul.msk.f32.vlgmr.msra.gmra.mxu1 %vm183_vm6, %v3347_v57 }
0x46b3   :  { %2694 = vmatpush.msra.mxu1 %v4188_v62 }
0x46b5   :  { %2695 = vmatpush.msra.mxu1 %v4191_v16 }
0x46b7   :  { %2696 = vmatpush.msra.mxu1 %v4194_v17 }
0x46b9   :  { %2697 = vmatpush.msra.mxu1 %v4197_v18 }
0x472f   :  { %v2442_v13 = vpop.f32.mrf.mxu1 }
0x4730   :  { %v2443_v20 = vadd.f32 %v4214_v53, %v2442_v13 }
0x4732   :  { %3348 = vtanh.f32 %v2443_v20 }
0x4738   :  { %v3349_v58 = vpop.eup %3348 }
0x4739   :  { %3187 = vmatmul.msk.f32.vlgmr.msra.gmra.mxu2 %vm183_vm6, %v3349_v58 }
0x473a   :  { %2727 = vmatpush.msra.mxu2 %v4507_v39 }
0x473c   :  { %2728 = vmatpush.msra.mxu2 %v4513_v34 }
0x473e   :  { %2729 = vmatpush.msra.mxu2 %v4519_v32 }
0x4740   :  { %2730 = vmatpush.msra.mxu2 %v4525_v33 }
0x47bc   :  { %v2466_v12 = vpop.f32.mrf.mxu2 }
0x47bd   :  { %v2467_v63 = vadd.f32 %v4227_v0, %v2466_v12 }
0x47bf   :  { %v2470_v47 = vadd.f32 %v2469_v22, %v2467_v63 }
0x47c1   :  { %v2471_v51 = vmul.f32 %v2470_v47, %v4461_v35 }
0x47c3   :  { %2473 = vrot.lane.b32.xlu2 %v2471_v51, %s3499_s19 }
0x481d   :  { %v2474_v52 = vpop.permute.xlu2 %2473 }
0x481e   :  { %v2476_v54 = vadd.f32 %v2474_v52, %v4440_v55  ;;  %v3421_v52 = vld [vmem:[#allocation6 + $0x18] sm:$0xff] }
0x4820   :  { %2478 = vrot.lane.b32.xlu0 %v2476_v54, %s3499_s19  ;;  %v3422_v54 = vld [vmem:[#allocation6 + $0x10] sm:$0xff] }
0x4892   :  { %v2479_v24 = vpop.permute.xlu0 %2478 }
0x4893   :  { %3188 = vmatmul.msk.f32.vlgmr.msra.gmra.mxu3 %vm183_vm6, %v2479_v24  ;;  %v3423_v24 = vld [vmem:[#allocation6 + $0x8] sm:$0xff] }
0x4894   :  { %2751 = vmatpush.msra.mxu3 %v4541_v45 }
0x4896   :  { %2752 = vmatpush.msra.mxu3 %v4547_v42 }
0x4898   :  { %2753 = vmatpush.msra.mxu3 %v4553_v48 }
0x489a   :  { %2754 = vmatpush.msra.mxu3 %v4559_v49 }
0x4916   :  { %v2499_v9 = vpop.f32.mrf.mxu3 }
0x4917   :  { %v2500_v2 = vadd.f32 %v4203_v23, %v2499_v9  ;;  %v3424_v9 = vld [vmem:[#allocation6] sm:$0xff] }
0x4919   :  { %3350 = vtanh.f32 %v2500_v2 }
0x491f   :  { %v3351_v11 = vpop.eup %3350 }
0x4920   :  { %3189 = vmatmul.msk.f32.vlgmr.msra.gmra.mxu0 %vm183_vm6, %v3351_v11  ;;  %v4635_v11 = vld [vmem:[%s4744_s7] ss:$0 sm:$0xff]  ;;  %s3192_s7 = sld [smem:[#allocation2 + $0x6]] }
0x4921   :  { %2775 = vmatpush.msra.mxu0 %v4188_v62  ;;  %v2550_v62 = vadd.f32 %v2467_v63, %v4529_v8 }
0x4923   :  { %2776 = vmatpush.msra.mxu0 %v4191_v16  ;;  %v2551_v16 = vmul.f32 3.0, %v2550_v62  ;;  %v4646_v62 = vld [vmem:[%s4746_s9] ss:$0 sm:$0xff] }
0x4925   :  { %2777 = vmatpush.msra.mxu0 %v4194_v17  ;;  %v2552_v23 = vadd.f32 %v2551_v16, %v4464_v10  ;;  %v4620_v10 = vld [vmem:[%s4740_s3] ss:$0 sm:$0xff] }
0x4926   :  { %v175_v41 = vadd.f32 %v4620_v10, %v3968_v14 }
0x4927   :  { %2778 = vmatpush.msra.mxu0 %v4197_v18 }
0x499d   :  { %v2523_v26 = vpop.f32.mrf.mxu0 }
0x499e   :  { %v2524_v27 = vadd.f32 %v4214_v53, %v2523_v26 }
0x49a0   :  { %3352 = vtanh.f32 %v2524_v27 }
0x49a6   :  { %v3353_v28 = vpop.eup %3352 }
0x49a7   :  { %3190 = vmatmul.msk.f32.vlgmr.msrb.gmra.mxu1 %vm183_vm6, %v3353_v28 }
0x49a8   :  { %2808 = vmatpush.msrb.mxu1 %v4507_v39 }
0x49aa   :  { %2809 = vmatpush.msrb.mxu1 %v4513_v34 }
0x49ac   :  { %2810 = vmatpush.msrb.mxu1 %v4519_v32 }
0x49ae   :  { %2811 = vmatpush.msrb.mxu1 %v4525_v33 }
0x4a24   :  { %v2547_v17 = vpop.f32.mrf.mxu1 }
0x4a25   :  { %v2548_v18 = vadd.f32 %v4227_v0, %v2547_v17 }
0x4a27   :  { %v2553_v53 = vadd.f32 %v2552_v23, %v2548_v18 }
0x4a29   :  { %v2554_v46 = vmul.f32 %v2553_v53, %v4461_v35  ;;  %v4613_v35 = vld [vmem:[%s4742_s5] ss:$0 sm:$0xff] }
0x4a2b   :  { %v2555_v40 = vmul.f32 0.125, %v2554_v46 }
0x4a2d   :  { %2557 = vrot.lane.b32.xlu1 %v2555_v40, %s3499_s19 }
0x4a9f   :  { %v2558_v29 = vpop.permute.xlu1 %2557 }
0x4aa0   :  { %v2560_v3 = vadd.f32 %v2558_v29, %v4440_v55 }
0x4aa2   :  { %2562 = vrot.lane.b32.xlu2 %v2560_v3, %s3499_s19 }
0x4afc   :  { %v2563_v6 = vpop.permute.xlu2 %2562 }
0x4afd   :  { %3191 = vmatmul.msk.f32.vlgmr.msrb.gmra.mxu2 %vm183_vm6, %v2563_v6 }
0x4afe   :  { %2832 = vmatpush.msrb.mxu2 %v4541_v45 }
0x4b00   :  { %2833 = vmatpush.msrb.mxu2 %v4547_v42 }
0x4b02   :  { %2834 = vmatpush.msrb.mxu2 %v4553_v48 }
0x4b04   :  { %2835 = vmatpush.msrb.mxu2 %v4559_v49 }
0x4b80   :  { %v2583_v0 = vpop.f32.mrf.mxu2 }
0x4b81   :  { %v2584_v55 = vadd.f32 %v4613_v35, %v2583_v0 }
0x4b83   :  { %2607 = vrot.lane.b32.xlu0 %v2584_v55, %s3499_s19  ;;  %v2586_v61 = vadd.f32 %v2584_v55, %v175_v41 }
0x4b85   :  { %v2587_v30 = vsub.f32 0.0, %v2586_v61 }
0x4b87   :  { %v2588_v31 = vmul.f32 1.442695, %v2587_v30 }
0x4b89   :  { %3354 = vpow2.f32 %v2588_v31 }
0x4b8f   :  { %v3355_v60 = vpop.eup %3354 }
0x4b90   :  { %v2590_v7 = vadd.f32 1.0, %v3355_v60 }
0x4b92   :  { %3356 = vrcp.f32 %v2590_v7  ;;  %v2602_v21 = vand.u32 2147483648, %v2590_v7  ;;  %vm2596_vm13 = vweird.f32 %v2590_v7  ;;  %v2600_v4 = vand.u32 2147483647, %v2590_v7 }
0x4b94   :  { %v2603_v44 = vor.u32 1.1754944e-38, %v2602_v21  ;;  %vm2601_vm15 = vcmp.eq.f32.partialorder %v2600_v4, 8.507059e+37 }
0x4b98   :  { %v3357_v38 = vpop.eup %3356 }
0x4b99   :  { %v2592_v59 = vmul.f32 %v3357_v38, %v2590_v7  ;;  %vm2597_vm12 = vweird.f32 %v3357_v38 }
0x4b9a   :  { %vm2598_vm14 = vmor %vm2596_vm13, %vm2597_vm12 }
0x4b9b   :  { %v2593_v8 = vsub.f32 1.0, %v2592_v59 }
0x4b9d   :  { %v2594_v43 = vmul.f32 %v3357_v38, %v2593_v8 }
0x4b9f   :  { %v2595_v56 = vadd.f32 %v3357_v38, %v2594_v43 }
0x4ba1   :  { %v2599_v5 = vsel %vm2598_vm14, %v3357_v38, %v2595_v56 }
0x4ba2   :  { %v2604_v19 = vsel %vm2601_vm15, %v2603_v44, %v2599_v5 }
0x4bf5   :  { %v2608_v14 = vpop.permute.xlu0 %2607 }
0x4bf6   :  { %v2610_v50 = vmul.f32 %v2608_v14, %v2604_v19 }
0x4bf8   :  { %2612 = vrot.lane.b32.xlu1 %v2610_v50, %s3499_s19 }
0x4c6a   :  { %v2613_v57 = vpop.permute.xlu1 %2612 }
0x4c6b   :  { %v2615_v13 = vadd.f32 %v2613_v57, %v175_v41 }
0x4c6d   :  { %3358 = vtanh.f32 %v2615_v13 }
0x4c73   :  { %v3359_v20 = vpop.eup %3358 }
0x4c74   :  { %v2617_v58 = vsub.f32 %v2560_v3, %v3359_v20 }
0x4c76   :  { %2619 = vrot.lane.b32.xlu2 %v2617_v58, %s3500_s22 }
0x4cd0   :  { %v2620_v12 = vpop.permute.xlu2 %2619 }
0x4cd1   :  { %v2622_v63 = vmul.f32 %v2620_v12, %v2604_v19 }
0x4cd3   :  { %2624 = vrot.lane.b32.xlu0 %v2622_v63, %s3501_s23 }
0x4d45   :  { %v2625_v22 = vpop.permute.xlu0 %2624 }
0x4d46   :  { %v4627_v47 = vadd.f32 %v3359_v20, %v2625_v22 }
0x4d48   :  { %2630 = vrot.lane.b32.xlu1 %v4627_v47, %s3499_s19 }
0x4dba   :  { %v2631_v51 = vpop.permute.xlu1 %2630 }
0x4dbb   :  { %3193 = vmatmul.msk.f32.vlgmr.msrb.gmra.mxu3 %vm183_vm6, %v2631_v51 }
0x4dbc   :  { %2856 = vmatpush.msrb.mxu3 %v3421_v52 }
0x4dbe   :  { %2857 = vmatpush.msrb.mxu3 %v3422_v54 }
0x4dc0   :  { %2858 = vmatpush.msrb.mxu3 %v3423_v24 }
0x4dc2   :  { %2859 = vmatpush.msrb.mxu3 %v3424_v9 }
0x4e3e   :  { %v2651_v2 = vpop.f32.mrf.mxu3 }
0x4e3f   :  { %v2652_v26 = vadd.f32 %v4635_v11, %v2651_v2 }
0x4e41   :  { %3360 = vtanh.f32 %v2652_v26 }
0x4e47   :  { %v3361_v27 = vpop.eup %3360 }
0x4e48   :  { %3194 = vmatmul.msk.f32.vlgmr.msrb.gmra.mxu0 %vm183_vm6, %v3361_v27 }
0x4e49   :  { %2889 = vmatpush.msrb.mxu0 %v4507_v39 }
0x4e4b   :  { %2890 = vmatpush.msrb.mxu0 %v4513_v34  ;;  %v4654_v34 = vstv %s3192_s7 }
0x4e4d   :  { %2891 = vmatpush.msrb.mxu0 %v4519_v32  ;;  %v4659_v32 = vld [vmem:[%s4748_s11] ss:$0 sm:$0xff] }
0x4e4f   :  { %2892 = vmatpush.msrb.mxu0 %v4525_v33 }
0x4ec5   :  { %v2675_v28 = vpop.f32.mrf.mxu0 }
0x4ec6   :  { %v2676_v16 = vadd.f32 %v4646_v62, %v2675_v28  ;;  %v178_v28 = vadd.f32 %v4620_v10, %v3970_v15 }
0x4ec8   :  { %3362 = vtanh.f32 %v2676_v16 }
0x4ece   :  { %v3363_v17 = vpop.eup %3362 }
0x4ecf   :  { %3195 = vmatmul.msk.f32.vlgmr.msra.gmra.mxu1 %vm183_vm6, %v3363_v17 }
0x4ed0   :  { %2913 = vmatpush.msra.mxu1 %v4541_v45 }
0x4ed2   :  { %2914 = vmatpush.msra.mxu1 %v4547_v42 }
0x4ed4   :  { %2915 = vmatpush.msra.mxu1 %v4553_v48 }
0x4ed6   :  { %2916 = vmatpush.msra.mxu1 %v4559_v49 }
0x4f4c   :  { %v2699_v39 = vpop.f32.mrf.mxu1 }
0x4f4d   :  { %v4662_v33 = vadd.f32 %v4659_v32, %v2699_v39 }
0x4f4f   :  { %v2703_v45 = vmul.f32 %v4654_v34, %v4662_v33  ;;  %v2783_v55 = vmul.f32 0.33333334, %v4662_v33 }
0x4f51   :  { %v2704_v42 = vmul.f32 0.33333334, %v2703_v45 }
0x4f53   :  { %2706 = vrot.lane.b32.xlu2 %v2704_v42, %s3499_s19 }
0x4fad   :  { %v2707_v48 = vpop.permute.xlu2 %2706 }
0x4fae   :  { %v2709_v49 = vadd.f32 %v2707_v48, %v4627_v47 }
0x4fb0   :  { %2711 = vrot.lane.b32.xlu0 %v2709_v49, %s3499_s19 }
0x5022   :  { %v2712_v18 = vpop.permute.xlu0 %2711 }
0x5023   :  { %3196 = vmatmul.msk.f32.vlgmr.msra.gmra.mxu2 %vm183_vm6, %v2712_v18 }
0x5024   :  { %2937 = vmatpush.msra.mxu2 %v3421_v52 }
0x5026   :  { %2938 = vmatpush.msra.mxu2 %v3422_v54 }
0x5028   :  { %2939 = vmatpush.msra.mxu2 %v3423_v24 }
0x502a   :  { %2940 = vmatpush.msra.mxu2 %v3424_v9 }
0x50a6   :  { %v2732_v23 = vpop.f32.mrf.mxu2 }
0x50a7   :  { %v2733_v53 = vadd.f32 %v4635_v11, %v2732_v23 }
0x50a9   :  { %3364 = vtanh.f32 %v2733_v53 }
0x50af   :  { %v3365_v46 = vpop.eup %3364 }
0x50b0   :  { %3197 = vmatmul.msk.f32.vlgmr.msra.gmra.mxu3 %vm183_vm6, %v3365_v46 }
0x50b1   :  { %2973 = vmatpush.msra.mxu3 %v4481_v36 }
0x50b3   :  { %2974 = vmatpush.msra.mxu3 %v4487_v37 }
0x50b5   :  { %2975 = vmatpush.msra.mxu3 %v4493_v25 }
0x50b7   :  { %2976 = vmatpush.msra.mxu3 %v4499_v1 }
0x5133   :  { %v2756_v40 = vpop.f32.mrf.mxu3 }
0x5134   :  { %v2757_v29 = vadd.f32 %v4646_v62, %v2756_v40 }
0x5136   :  { %3366 = vtanh.f32 %v2757_v29 }
0x513c   :  { %v3367_v3 = vpop.eup %3366 }
0x513d   :  { %3198 = vmatmul.msk.f32.vlgmr.msra.gmra.mxu0 %vm183_vm6, %v3367_v3 }
0x51ba   :  { %v2780_v6 = vpop.f32.mrf.mxu0 }
0x51bb   :  { %v2781_v0 = vadd.f32 %v4659_v32, %v2780_v6 }
0x51bd   :  { %v2784_v41 = vsub.f32 %v2781_v0, %v2783_v55  ;;  %v2864_v43 = vsub.f32 %v4662_v33, %v2781_v0  ;;  %v3025_v55 = vld [vmem:[%s4749_s12 + $0x10] sm:$0xff] }
0x51bf   :  { %v2785_v36 = vmul.f32 %v2784_v41, %v4654_v34  ;;  %v3024_v41 = vld [vmem:[%s4749_s12 + $0x8] sm:$0xff] }
0x51c1   :  { %2787 = vrot.lane.b32.xlu1 %v2785_v36, %s3499_s19  ;;  %v3023_v36 = vld [vmem:[%s4749_s12] sm:$0xff] }
0x5233   :  { %v2788_v37 = vpop.permute.xlu1 %2787 }
0x5234   :  { %v2790_v25 = vadd.f32 %v2788_v37, %v4627_v47 }
0x5236   :  { %2792 = vrot.lane.b32.xlu2 %v2790_v25, %s3499_s19 }
0x5290   :  { %v2793_v1 = vpop.permute.xlu2 %2792 }
0x5291   :  { %3199 = vmatmul.msk.f32.vlgmr.msrb.gmra.mxu1 %vm183_vm6, %v2793_v1 }
0x530e   :  { %v2813_v61 = vpop.f32.mrf.mxu1 }
0x530f   :  { %v2814_v30 = vadd.f32 %v4635_v11, %v2813_v61  ;;  %v3221_v61 = vld [vmem:[%s4750_s13] ss:$0 sm:$0xff] }
0x5311   :  { %3368 = vtanh.f32 %v2814_v30 }
0x5317   :  { %v3369_v31 = vpop.eup %3368 }
0x5318   :  { %3200 = vmatmul.msk.f32.vlgmr.msrb.gmra.mxu2 %vm183_vm6, %v3369_v31 }
0x539b   :  { %v2837_v60 = vpop.f32.mrf.mxu2 }
0x539c   :  { %v2838_v7 = vadd.f32 %v4646_v62, %v2837_v60 }
0x539e   :  { %3370 = vtanh.f32 %v2838_v7 }
0x53a4   :  { %v3371_v38 = vpop.eup %3370 }
0x53a5   :  { %3201 = vmatmul.msk.f32.vlgmr.msrb.gmra.mxu3 %vm183_vm6, %v3371_v38 }
0x5428   :  { %v2861_v59 = vpop.f32.mrf.mxu3 }
0x5429   :  { %v2862_v8 = vadd.f32 %v4659_v32, %v2861_v59 }
0x542b   :  { %v2865_v56 = vadd.f32 %v2864_v43, %v2862_v8  ;;  %v2945_v58 = vadd.f32 %v2862_v8, %v2781_v0  ;;  %v3026_v0 = vld [vmem:[%s4749_s12 + $0x18] sm:$0xff]  ;;  %s3502_s12 = smov [#allocation7]  }
0x542c   :  { %3048 = vmatpush.msra.mxu0 %v3026_v0  ;;  %s3087_s13 = sshll.u32 %s3502_s12, 4  ;;  %s3088_s13 = int_to_ptr.vmem [resolvable:$true] %s3087_s13 }
0x542d   :  { %v2866_v21 = vmul.f32 %v2865_v56, %v4654_v34  ;;  %v2946_v12 = vmul.f32 3.0, %v2945_v58 }
0x542e   :  { %3049 = vmatpush.msra.mxu0 %v3025_v55 }
0x542f   :  { %2868 = vrot.lane.b32.xlu0 %v2866_v21, %s3499_s19  ;;  %v2947_v51 = vadd.f32 %v2946_v12, %v4662_v33 }
0x5430   :  { %3050 = vmatpush.msra.mxu0 %v3024_v41 }
0x5432   :  { %3051 = vmatpush.msra.mxu0 %v3023_v36 }
0x54a1   :  { %v2869_v4 = vpop.permute.xlu0 %2868 }
0x54a2   :  { %v2871_v5 = vadd.f32 %v2869_v4, %v4627_v47 }
0x54a4   :  { %2873 = vrot.lane.b32.xlu1 %v2871_v5, %s3499_s19 }
0x5516   :  { %v2874_v44 = vpop.permute.xlu1 %2873 }
0x5517   :  { %3202 = vmatmul.msk.f32.vlgmr.msrb.gmra.mxu0 %vm183_vm6, %v2874_v44 }
0x5594   :  { %v2894_v14 = vpop.f32.mrf.mxu0 }
0x5595   :  { %v2895_v19 = vadd.f32 %v4635_v11, %v2894_v14 }
0x5597   :  { %3372 = vtanh.f32 %v2895_v19 }
0x559d   :  { %v3373_v50 = vpop.eup %3372 }
0x559e   :  { %3203 = vmatmul.msk.f32.vlgmr.msra.gmra.mxu1 %vm183_vm6, %v3373_v50 }
0x561b   :  { %v2918_v57 = vpop.f32.mrf.mxu1 }
0x561c   :  { %v2919_v13 = vadd.f32 %v4646_v62, %v2918_v57 }
0x561e   :  { %3374 = vtanh.f32 %v2919_v13 }
0x5624   :  { %v3375_v20 = vpop.eup %3374 }
0x5625   :  { %3204 = vmatmul.msk.f32.vlgmr.msra.gmra.mxu2 %vm183_vm6, %v3375_v20 }
0x56a8   :  { %v2942_v63 = vpop.f32.mrf.mxu2 }
0x56a9   :  { %v2943_v22 = vadd.f32 %v4659_v32, %v2942_v63 }
0x56ab   :  { %v2948_v52 = vadd.f32 %v2947_v51, %v2943_v22 }
0x56ad   :  { %v2949_v54 = vmul.f32 %v2948_v52, %v4654_v34 }
0x56af   :  { %v2950_v24 = vmul.f32 0.125, %v2949_v54 }
0x56b1   :  { %2952 = vrot.lane.b32.xlu2 %v2950_v24, %s3499_s19 }
0x570b   :  { %v2953_v9 = vpop.permute.xlu2 %2952 }
0x570c   :  { %v2955_v2 = vadd.f32 %v2953_v9, %v4627_v47 }
0x570e   :  { %2957 = vrot.lane.b32.xlu0 %v2955_v2, %s3499_s19 }
0x5780   :  { %v2958_v11 = vpop.permute.xlu0 %2957 }
0x5781   :  { %3205 = vmatmul.msk.f32.vlgmr.msra.gmra.mxu3 %vm183_vm6, %v2958_v11 }
0x5804   :  { %v2978_v26 = vpop.f32.mrf.mxu3 }
0x5805   :  { %v2979_v27 = vadd.f32 %v4613_v35, %v2978_v26 }
0x5807   :  { %3002 = vrot.lane.b32.xlu1 %v2979_v27, %s3499_s19  ;;  %v2981_v62 = vadd.f32 %v2979_v27, %v178_v28 }
0x5809   :  { %v2982_v16 = vsub.f32 0.0, %v2981_v62 }
0x580b   :  { %v2983_v17 = vmul.f32 1.442695, %v2982_v16 }
0x580d   :  { %3376 = vpow2.f32 %v2983_v17 }
0x5813   :  { %v3377_v39 = vpop.eup %3376 }
0x5814   :  { %v2985_v34 = vadd.f32 1.0, %v3377_v39 }
0x5816   :  { %3378 = vrcp.f32 %v2985_v34  ;;  %v2997_v48 = vand.u32 2147483648, %v2985_v34  ;;  %vm2991_vm1 = vweird.f32 %v2985_v34  ;;  %v2995_v35 = vand.u32 2147483647, %v2985_v34 }
0x5818   :  { %v2998_v18 = vor.u32 1.1754944e-38, %v2997_v48  ;;  %vm2996_vm3 = vcmp.eq.f32.partialorder %v2995_v35, 8.507059e+37 }
0x581c   :  { %v3379_v47 = vpop.eup %3378 }
0x581d   :  { %v2987_v32 = vmul.f32 %v3379_v47, %v2985_v34  ;;  %vm2992_vm0 = vweird.f32 %v3379_v47 }
0x581e   :  { %vm2993_vm2 = vmor %vm2991_vm1, %vm2992_vm0 }
0x581f   :  { %v2988_v33 = vsub.f32 1.0, %v2987_v32 }
0x5821   :  { %v2989_v45 = vmul.f32 %v3379_v47, %v2988_v33 }
0x5823   :  { %v2990_v42 = vadd.f32 %v3379_v47, %v2989_v45 }
0x5825   :  { %v2994_v49 = vsel %vm2993_vm2, %v3379_v47, %v2990_v42 }
0x5826   :  { %v2999_v10 = vsel %vm2996_vm3, %v2998_v18, %v2994_v49 }
0x5879   :  { %v3003_v15 = vpop.permute.xlu1 %3002 }
0x587a   :  { %v3005_v23 = vmul.f32 %v3003_v15, %v2999_v10 }
0x587c   :  { %3007 = vrot.lane.b32.xlu2 %v3005_v23, %s3499_s19 }
0x58d6   :  { %v3008_v53 = vpop.permute.xlu2 %3007 }
0x58d7   :  { %v3010_v46 = vadd.f32 %v3008_v53, %v178_v28 }
0x58d9   :  { %3380 = vtanh.f32 %v3010_v46 }
0x58df   :  { %v3381_v40 = vpop.eup %3380 }
0x58e0   :  { %v3012_v29 = vsub.f32 %v2955_v2, %v3381_v40 }
0x58e2   :  { %3014 = vrot.lane.b32.xlu0 %v3012_v29, %s3500_s22 }
0x5954   :  { %v3015_v3 = vpop.permute.xlu0 %3014 }
0x5955   :  { %v3017_v6 = vmul.f32 %v3015_v3, %v2999_v10 }
0x5957   :  { %3019 = vrot.lane.b32.xlu1 %v3017_v6, %s3501_s23 }
0x59c9   :  { %v3020_v37 = vpop.permute.xlu1 %3019 }
0x59ca   :  { %v3022_v25 = vadd.f32 %v3381_v40, %v3020_v37 }
0x59cc   :  { %3032 = vrot.lane.b32.xlu2 %v3022_v25, %s3499_s19 }
0x5a26   :  { %v3033_v1 = vpop.permute.xlu2 %3032 }
0x5a27   :  { %3206 = vmatmul.msk.f32.vlgmr.msra.gmra.mxu0 %vm183_vm6, %v3033_v1 }
0x5aa4   :  { %v3053_v30 = vpop.f32.mrf.mxu0 }
0x5aa5   :  { %v3054_v31 = vadd.f32 %v3221_v61, %v3053_v30 }
0x5aa7   :  { %v3057_v60 = vsel %vm3056_vm4, %v3054_v31, -inf }
0x5aa8   :  { %3058 = vmax.xlane.f32.xlu0 %v3057_v60 }
0x5b1b   :  { %v3059_v7 = vpop.xlane.xlu0 %3058 }
0x5b1c   :  { %v3060_v38 = vsub.f32 %v3054_v31, %v3059_v7 }
0x5b1e   :  { %v3061_v59 = vmul.f32 1.442695, %v3060_v38 }
0x5b20   :  { %3382 = vpow2.f32 %v3061_v59 }
0x5b26   :  { %v3383_v8 = vpop.eup %3382 }
0x5b27   :  { %v3063_v43 = vsel %vm3056_vm4, %v3383_v8, 0.0 }
0x5b28   :  { %3064 = vadd.xlane.f32.xlu1 %v3063_v43 }
0x5b9b   :  { %v3065_v56 = vpop.xlane.xlu1 %3064 }
0x5b9c   :  { %3384 = vrcp.f32 %v3065_v56  ;;  %v3077_v44 = vand.u32 2147483648, %v3065_v56  ;;  %v3075_v19 = vand.u32 2147483647, %v3065_v56  ;;  %vm3071_vm5 = vweird.f32 %v3065_v56 }
0x5b9e   :  { %v3078_v57 = vor.u32 1.1754944e-38, %v3077_v44  ;;  %vm3076_vm8 = vcmp.eq.f32.partialorder %v3075_v19, 8.507059e+37 }
0x5ba2   :  { %v3385_v21 = vpop.eup %3384 }
0x5ba3   :  { %v3067_v4 = vmul.f32 %v3385_v21, %v3065_v56  ;;  %vm3072_vm6 = vweird.f32 %v3385_v21 }
0x5ba4   :  { %vm3073_vm7 = vmor %vm3071_vm5, %vm3072_vm6 }
0x5ba5   :  { %v3068_v5 = vsub.f32 1.0, %v3067_v4 }
0x5ba7   :  { %v3069_v14 = vmul.f32 %v3385_v21, %v3068_v5 }
0x5ba9   :  { %v3070_v50 = vadd.f32 %v3385_v21, %v3069_v14 }
0x5bab   :  { %v3074_v13 = vsel %vm3073_vm7, %v3385_v21, %v3070_v50 }
0x5bac   :  { %v3079_v20 = vsel %vm3076_vm8, %v3078_v57, %v3074_v13 }
0x5bad   :  { %v3080_v58 = vmul.f32 %v3383_v8, %v3079_v20 }
0x5baf   :  { %3081 = vst.msk [vmem:[#allocation7] sm:$0xff] %vm3056_vm4, %v3080_v58 }
0x5bb0   :  { %3092 = dma.vmem_to_hbm [thread:$0]  %s3088_s13, 128, %s3090_s15, [#allocation4]  }
0x5bb1   :  { %3492 = dma.done.wait [#allocation4], 128  }
0x5bb2   :  { %3493 = vsyncadd [#allocation4], 4294967168 }
0x5bb3   :  { %3097 = vsyncpa [#allocation3], 1 }
0x5bb4   :  { %3098 = vsyncpa [#allocation4], 1 }
0x5bb5   :  { %3099 = vsyncpa [#allocation5], 1 }

</bundles_post_ra>
